<compile_context>
chip_gen: v7x
topology: tpu7x:2x2x1
jax: 0.10.0
libtpu: 0.0.40
codegen_flags: <defaults>
</compile_context>

<pallas_src>
import jax
import jax.numpy as jnp
from jax.experimental import pallas as pl
from jax.experimental.pallas import tpu as pltpu


# ------------------------------ fused kernel --------------------------------

def _gcn4_fused_kernel(
    a_ref, x_ref, mask_ref,
    w1_ref, b1_ref, w2_ref, b2_ref, w3_ref, b3_ref, w4_ref, b4_ref,
    mw1_ref, mb1_ref, mw2_ref, mb2_ref, mw3_ref, mb3_ref,
    o_ref,
):
    a = a_ref[...]                                   # (Np, Np) bf16, loaded once

    def gcn(h, w_ref, b_ref, leaky):
        w = w_ref[...]
        f_in, f_out = h.shape[1], w.shape[1]
        if f_in <= f_out:
            # (A @ H) @ W  : cheaper when F_in <= F_out
            ah = jnp.dot(a, h, preferred_element_type=jnp.float32)
            out = jnp.dot(ah.astype(jnp.bfloat16), w,
                          preferred_element_type=jnp.float32)
        else:
            # A @ (H @ W)
            hw = jnp.dot(h, w, preferred_element_type=jnp.float32)
            out = jnp.dot(a, hw.astype(jnp.bfloat16),
                          preferred_element_type=jnp.float32)
        out = out + b_ref[...]                       # f32 bias
        if leaky:
            out = jnp.where(out > 0, out, 0.01 * out)   # LeakyReLU(0.01)
        return out.astype(jnp.bfloat16)

    # ---- 4 GCN layers (activations stay resident, bf16) ----
    h = x_ref[...]
    h = gcn(h, w1_ref, b1_ref, leaky=True)
    h = gcn(h, w2_ref, b2_ref, leaky=True)
    h = gcn(h, w3_ref, b3_ref, leaky=True)
    h = gcn(h, w4_ref, b4_ref, leaky=False)          # cconv4: no activation

    # ---- global max pool per graph: vectorized masked (G, N, F) max ----
    mask = mask_ref[...]                             # (Gp, Np) f32 one-hot membership
    hf = h.astype(jnp.float32)                       # (Np, F4)
    neg = jnp.float32(jnp.finfo(jnp.float32).min)
    masked = jnp.where(mask[:, :, None] > 0, hf[None, :, :], neg)
    pooled = jnp.max(masked, axis=1)                 # (Gp, F4)
    has_node = jnp.max(mask, axis=1, keepdims=True) > 0
    pooled = jnp.where(has_node, pooled, 0.0)        # keep padded graph rows finite

    # ---- fused 3-layer MLP head (weights VMEM-resident) ----
    z = pooled.astype(jnp.bfloat16)                  # (Gp, 256)
    z = jnp.dot(z, mw1_ref[...], preferred_element_type=jnp.float32) + mb1_ref[...]
    z = jnp.maximum(z, 0.0).astype(jnp.bfloat16)
    z = jnp.dot(z, mw2_ref[...], preferred_element_type=jnp.float32) + mb2_ref[...]
    z = jnp.maximum(z, 0.0).astype(jnp.bfloat16)
    out = jnp.dot(z, mw3_ref[...], preferred_element_type=jnp.float32) + mb3_ref[...]

    o_ref[...] = out.astype(o_ref.dtype)             # (Gp, 128) lane-dense store


# ------------------------------ model wrapper --------------------------------

def _round_up(v, m):
    return ((v + m - 1) // m) * m


def _pad2(x, rows, cols):
    r, c = x.shape
    return jnp.pad(x, ((0, rows - r), (0, cols - c)))


def gcn4_forward(x, a_hat, batch_mask, gcn_w, gcn_b, mlp_w, mlp_b):
    """x:(N,F0) f32, a_hat:(N,N) f32, batch_mask:(G,N) f32 one-hot membership."""
    n, f0 = x.shape
    g = batch_mask.shape[0]

    n_pad = _round_up(n, 128)                        # lane-dense adjacency / activations
    g_pad = _round_up(max(g, 8), 8)                  # fill the sublane dim of the MLP

    gcn_dims = [f0] + [w.shape[1] for w in gcn_w]
    gcn_pad = [_round_up(d, 128) for d in gcn_dims]
    mlp_dims = [mlp_w[0].shape[0]] + [w.shape[1] for w in mlp_w]
    mlp_pad = [_round_up(d, 128) for d in mlp_dims]  # mlp_pad[0] == gcn_pad[-1]

    cd = jnp.bfloat16                                # MXU-native compute dtype
    args = [
        _pad2(a_hat, n_pad, n_pad).astype(cd),
        _pad2(x, n_pad, gcn_pad[0]).astype(cd),
        _pad2(batch_mask, g_pad, n_pad).astype(jnp.float32),
    ]
    for i in range(4):
        args.append(_pad2(gcn_w[i], gcn_pad[i], gcn_pad[i + 1]).astype(cd))
        args.append(_pad2(gcn_b[i], 1, gcn_pad[i + 1]).astype(jnp.float32))
    for i in range(3):
        args.append(_pad2(mlp_w[i], mlp_pad[i], mlp_pad[i + 1]).astype(cd))
        args.append(_pad2(mlp_b[i], 1, mlp_pad[i + 1]).astype(jnp.float32))

    out_pad = pl.pallas_call(
        _gcn4_fused_kernel,
        out_shape=jax.ShapeDtypeStruct((g_pad, mlp_pad[-1]), jnp.float32),
        in_specs=[pl.BlockSpec(memory_space=pltpu.MemorySpace.VMEM)] * len(args),
        out_specs=pl.BlockSpec(memory_space=pltpu.MemorySpace.VMEM),
    )(*args)

    return out_pad[:g, :mlp_dims[-1]]                # (G, 4)


# ---------------------------------- main -------------------------------------

if __name__ == "__main__":
    key = jax.random.PRNGKey(0)
    ks = jax.random.split(key, 16)

    # Small synthetic graph batch: 64 nodes total, 2 graphs of 32 nodes each.
    N, E, G = 64, 128, 2
    feature_dim, hidden = 16, 32

    x = jax.random.normal(ks[0], (N, feature_dim), jnp.float32)
    src = jax.random.randint(ks[1], (E,), 0, N)
    dst = jax.random.randint(ks[2], (E,), 0, N)
    batch = jnp.concatenate(
        [jnp.zeros(N // 2, jnp.int32), jnp.ones(N // 2, jnp.int32)]
    )

    # Dense normalized adjacency with self-loops: A_hat = D^-1/2 (A + I) D^-1/2.
    A = jnp.zeros((N, N), jnp.float32).at[dst, src].add(1.0)
    A = A + jnp.eye(N, dtype=jnp.float32)
    deg = A.sum(axis=1)
    dinv = jnp.where(deg > 0, 1.0 / jnp.sqrt(deg), 0.0)
    a_hat = dinv[:, None] * A * dinv[None, :]

    # One-hot membership mask (G, N) for global max pooling.
    batch_mask = (batch[None, :] == jnp.arange(G)[:, None]).astype(jnp.float32)

    # Deterministic parameter init (synthetic; not a checkpoint load).
    def winit(k, fan_in, fan_out):
        return jax.random.normal(k, (fan_in, fan_out), jnp.float32) / jnp.sqrt(
            jnp.float32(fan_in)
        )

    gcn_dims = [feature_dim, hidden, hidden * 2, hidden * 4, hidden * 8]
    gcn_w = [winit(ks[3 + i], gcn_dims[i], gcn_dims[i + 1]) for i in range(4)]
    gcn_b = [jnp.zeros((1, gcn_dims[i + 1]), jnp.float32) for i in range(4)]

    mlp_dims = [hidden * 8, 1024, 512, 4]
    mlp_w = [winit(ks[8 + i], mlp_dims[i], mlp_dims[i + 1]) for i in range(3)]
    mlp_b = [jnp.zeros((1, mlp_dims[i + 1]), jnp.float32) for i in range(3)]

    fwd = jax.jit(gcn4_forward)
    out = fwd(x, a_hat, batch_mask, gcn_w, gcn_b, mlp_w, mlp_b)
    out = jax.block_until_ready(out)
    assert out.shape == (G, 4) and out.dtype == jnp.float32
    assert bool(jnp.all(jnp.isfinite(out)))
    print("KERNEL_OK")
</pallas_src>

<mosaic_0001>
module attributes {stable_mosaic.version = 11 : i64} {
  func.func @_gcn4_fused_kernel(%arg0: memref<128x128xbf16, #tpu.memory_space<vmem>>, %arg1: memref<128x128xbf16, #tpu.memory_space<vmem>>, %arg2: memref<8x128xf32, #tpu.memory_space<vmem>>, %arg3: memref<128x128xbf16, #tpu.memory_space<vmem>>, %arg4: memref<1x128xf32, #tpu.memory_space<vmem>>, %arg5: memref<128x128xbf16, #tpu.memory_space<vmem>>, %arg6: memref<1x128xf32, #tpu.memory_space<vmem>>, %arg7: memref<128x128xbf16, #tpu.memory_space<vmem>>, %arg8: memref<1x128xf32, #tpu.memory_space<vmem>>, %arg9: memref<128x256xbf16, #tpu.memory_space<vmem>>, %arg10: memref<1x256xf32, #tpu.memory_space<vmem>>, %arg11: memref<256x1024xbf16, #tpu.memory_space<vmem>>, %arg12: memref<1x1024xf32, #tpu.memory_space<vmem>>, %arg13: memref<1024x512xbf16, #tpu.memory_space<vmem>>, %arg14: memref<1x512xf32, #tpu.memory_space<vmem>>, %arg15: memref<512x128xbf16, #tpu.memory_space<vmem>>, %arg16: memref<1x128xf32, #tpu.memory_space<vmem>>, %arg17: memref<8x128xf32, #tpu.memory_space<vmem>>) attributes {dimension_semantics = [], scalar_prefetch = 0 : i64, scratch_operands = 0 : i64, tpu.core_type = #tpu.core_type<tc>} {
    %c0 = arith.constant 0 : index
    %c0_0 = arith.constant 0 : index
    %0 = vector.load %arg0[%c0, %c0_0] : memref<128x128xbf16, #tpu.memory_space<vmem>>, vector<128x128xbf16>
    %c0_1 = arith.constant 0 : index
    %c0_2 = arith.constant 0 : index
    %1 = vector.load %arg1[%c0_1, %c0_2] : memref<128x128xbf16, #tpu.memory_space<vmem>>, vector<128x128xbf16>
    %c0_3 = arith.constant 0 : index
    %c0_4 = arith.constant 0 : index
    %2 = vector.load %arg3[%c0_3, %c0_4] : memref<128x128xbf16, #tpu.memory_space<vmem>>, vector<128x128xbf16>
    %cst = arith.constant dense<0.000000e+00> : vector<128x128xf32>
    %3 = tpu.matmul %0, %1, %cst {dimension_numbers = #tpu.dot_dimension_numbers<[1], [0], [0], [1], [0, 0, 1, 1], [], []>} : vector<128x128xbf16>, vector<128x128xbf16>, vector<128x128xf32> -> vector<128x128xf32>
    %4 = arith.truncf %3 : vector<128x128xf32> to vector<128x128xbf16>
    %cst_5 = arith.constant dense<0.000000e+00> : vector<128x128xf32>
    %5 = tpu.matmul %4, %2, %cst_5 {dimension_numbers = #tpu.dot_dimension_numbers<[1], [0], [0], [1], [0, 0, 1, 1], [], []>} : vector<128x128xbf16>, vector<128x128xbf16>, vector<128x128xf32> -> vector<128x128xf32>
    %c0_6 = arith.constant 0 : index
    %c0_7 = arith.constant 0 : index
    %6 = vector.load %arg4[%c0_6, %c0_7] : memref<1x128xf32, #tpu.memory_space<vmem>>, vector<1x128xf32>
    %7 = vector.broadcast %6 : vector<1x128xf32> to vector<128x128xf32>
    %8 = arith.addf %5, %7 : vector<128x128xf32>
    %cst_8 = arith.constant 0.000000e+00 : f32
    %9 = vector.broadcast %cst_8 : f32 to vector<128x128xf32>
    %10 = arith.cmpf ogt, %8, %9 : vector<128x128xf32>
    %cst_9 = arith.constant 0.00999999977 : f32
    %11 = vector.broadcast %cst_9 : f32 to vector<128x128xf32>
    %12 = arith.mulf %11, %8 : vector<128x128xf32>
    %13 = arith.select %10, %8, %12 : vector<128x128xi1>, vector<128x128xf32>
    %14 = arith.truncf %13 : vector<128x128xf32> to vector<128x128xbf16>
    %c0_10 = arith.constant 0 : index
    %c0_11 = arith.constant 0 : index
    %15 = vector.load %arg5[%c0_10, %c0_11] : memref<128x128xbf16, #tpu.memory_space<vmem>>, vector<128x128xbf16>
    %cst_12 = arith.constant dense<0.000000e+00> : vector<128x128xf32>
    %16 = tpu.matmul %0, %14, %cst_12 {dimension_numbers = #tpu.dot_dimension_numbers<[1], [0], [0], [1], [0, 0, 1, 1], [], []>} : vector<128x128xbf16>, vector<128x128xbf16>, vector<128x128xf32> -> vector<128x128xf32>
    %17 = arith.truncf %16 : vector<128x128xf32> to vector<128x128xbf16>
    %cst_13 = arith.constant dense<0.000000e+00> : vector<128x128xf32>
    %18 = tpu.matmul %17, %15, %cst_13 {dimension_numbers = #tpu.dot_dimension_numbers<[1], [0], [0], [1], [0, 0, 1, 1], [], []>} : vector<128x128xbf16>, vector<128x128xbf16>, vector<128x128xf32> -> vector<128x128xf32>
    %c0_14 = arith.constant 0 : index
    %c0_15 = arith.constant 0 : index
    %19 = vector.load %arg6[%c0_14, %c0_15] : memref<1x128xf32, #tpu.memory_space<vmem>>, vector<1x128xf32>
    %20 = vector.broadcast %19 : vector<1x128xf32> to vector<128x128xf32>
    %21 = arith.addf %18, %20 : vector<128x128xf32>
    %cst_16 = arith.constant 0.000000e+00 : f32
    %22 = vector.broadcast %cst_16 : f32 to vector<128x128xf32>
    %23 = arith.cmpf ogt, %21, %22 : vector<128x128xf32>
    %cst_17 = arith.constant 0.00999999977 : f32
    %24 = vector.broadcast %cst_17 : f32 to vector<128x128xf32>
    %25 = arith.mulf %24, %21 : vector<128x128xf32>
    %26 = arith.select %23, %21, %25 : vector<128x128xi1>, vector<128x128xf32>
    %27 = arith.truncf %26 : vector<128x128xf32> to vector<128x128xbf16>
    %c0_18 = arith.constant 0 : index
    %c0_19 = arith.constant 0 : index
    %28 = vector.load %arg7[%c0_18, %c0_19] : memref<128x128xbf16, #tpu.memory_space<vmem>>, vector<128x128xbf16>
    %cst_20 = arith.constant dense<0.000000e+00> : vector<128x128xf32>
    %29 = tpu.matmul %0, %27, %cst_20 {dimension_numbers = #tpu.dot_dimension_numbers<[1], [0], [0], [1], [0, 0, 1, 1], [], []>} : vector<128x128xbf16>, vector<128x128xbf16>, vector<128x128xf32> -> vector<128x128xf32>
    %30 = arith.truncf %29 : vector<128x128xf32> to vector<128x128xbf16>
    %cst_21 = arith.constant dense<0.000000e+00> : vector<128x128xf32>
    %31 = tpu.matmul %30, %28, %cst_21 {dimension_numbers = #tpu.dot_dimension_numbers<[1], [0], [0], [1], [0, 0, 1, 1], [], []>} : vector<128x128xbf16>, vector<128x128xbf16>, vector<128x128xf32> -> vector<128x128xf32>
    %c0_22 = arith.constant 0 : index
    %c0_23 = arith.constant 0 : index
    %32 = vector.load %arg8[%c0_22, %c0_23] : memref<1x128xf32, #tpu.memory_space<vmem>>, vector<1x128xf32>
    %33 = vector.broadcast %32 : vector<1x128xf32> to vector<128x128xf32>
    %34 = arith.addf %31, %33 : vector<128x128xf32>
    %cst_24 = arith.constant 0.000000e+00 : f32
    %35 = vector.broadcast %cst_24 : f32 to vector<128x128xf32>
    %36 = arith.cmpf ogt, %34, %35 : vector<128x128xf32>
    %cst_25 = arith.constant 0.00999999977 : f32
    %37 = vector.broadcast %cst_25 : f32 to vector<128x128xf32>
    %38 = arith.mulf %37, %34 : vector<128x128xf32>
    %39 = arith.select %36, %34, %38 : vector<128x128xi1>, vector<128x128xf32>
    %40 = arith.truncf %39 : vector<128x128xf32> to vector<128x128xbf16>
    %c0_26 = arith.constant 0 : index
    %c0_27 = arith.constant 0 : index
    %41 = vector.load %arg9[%c0_26, %c0_27] : memref<128x256xbf16, #tpu.memory_space<vmem>>, vector<128x256xbf16>
    %cst_28 = arith.constant dense<0.000000e+00> : vector<128x128xf32>
    %42 = tpu.matmul %0, %40, %cst_28 {dimension_numbers = #tpu.dot_dimension_numbers<[1], [0], [0], [1], [0, 0, 1, 1], [], []>} : vector<128x128xbf16>, vector<128x128xbf16>, vector<128x128xf32> -> vector<128x128xf32>
    %43 = arith.truncf %42 : vector<128x128xf32> to vector<128x128xbf16>
    %cst_29 = arith.constant dense<0.000000e+00> : vector<128x256xf32>
    %44 = tpu.matmul %43, %41, %cst_29 {dimension_numbers = #tpu.dot_dimension_numbers<[1], [0], [0], [1], [0, 0, 1, 1], [], []>} : vector<128x128xbf16>, vector<128x256xbf16>, vector<128x256xf32> -> vector<128x256xf32>
    %c0_30 = arith.constant 0 : index
    %c0_31 = arith.constant 0 : index
    %45 = vector.load %arg10[%c0_30, %c0_31] : memref<1x256xf32, #tpu.memory_space<vmem>>, vector<1x256xf32>
    %46 = vector.broadcast %45 : vector<1x256xf32> to vector<128x256xf32>
    %47 = arith.addf %44, %46 : vector<128x256xf32>
    %48 = arith.truncf %47 : vector<128x256xf32> to vector<128x256xbf16>
    %c0_32 = arith.constant 0 : index
    %c0_33 = arith.constant 0 : index
    %49 = vector.load %arg2[%c0_32, %c0_33] : memref<8x128xf32, #tpu.memory_space<vmem>>, vector<8x128xf32>
    %50 = arith.extf %48 : vector<128x256xbf16> to vector<128x256xf32>
    %51 = vector.shape_cast %49 : vector<8x128xf32> to vector<8x128x1xf32>
    %cst_34 = arith.constant 0.000000e+00 : f32
    %52 = vector.broadcast %cst_34 : f32 to vector<8x128x1xf32>
    %53 = arith.cmpf ogt, %51, %52 : vector<8x128x1xf32>
    %54 = vector.shape_cast %50 : vector<128x256xf32> to vector<1x128x256xf32>
    %cst_35 = arith.constant -3.40282347E+38 : f32
    %55 = vector.shape_cast %53 : vector<8x128x1xi1> to vector<8x128x1xi1>
    %56 = vector.broadcast %55 : vector<8x128x1xi1> to vector<8x128x256xi1>
    %57 = vector.shape_cast %54 : vector<1x128x256xf32> to vector<1x128x256xf32>
    %58 = vector.broadcast %57 : vector<1x128x256xf32> to vector<8x128x256xf32>
    %59 = vector.broadcast %cst_35 : f32 to vector<8x128x256xf32>
    %60 = arith.select %56, %58, %59 : vector<8x128x256xi1>, vector<8x128x256xf32>
    %cst_36 = arith.constant dense<0xFF800000> : vector<8x256xf32>
    %61 = vector.multi_reduction <maximumf>, %60, %cst_36 [1] : vector<8x128x256xf32> to vector<8x256xf32>
    %cst_37 = arith.constant dense<0xFF800000> : vector<8xf32>
    %62 = vector.multi_reduction <maximumf>, %49, %cst_37 [1] : vector<8x128xf32> to vector<8xf32>
    %63 = vector.shape_cast %62 : vector<8xf32> to vector<8x1xf32>
    %cst_38 = arith.constant 0.000000e+00 : f32
    %64 = vector.broadcast %cst_38 : f32 to vector<8x1xf32>
    %65 = arith.cmpf ogt, %63, %64 : vector<8x1xf32>
    %cst_39 = arith.constant 0.000000e+00 : f32
    %66 = vector.shape_cast %65 : vector<8x1xi1> to vector<8x1xi1>
    %67 = vector.broadcast %66 : vector<8x1xi1> to vector<8x256xi1>
    %68 = vector.broadcast %cst_39 : f32 to vector<8x256xf32>
    %69 = arith.select %67, %61, %68 : vector<8x256xi1>, vector<8x256xf32>
    %70 = arith.truncf %69 : vector<8x256xf32> to vector<8x256xbf16>
    %c0_40 = arith.constant 0 : index
    %c0_41 = arith.constant 0 : index
    %71 = vector.load %arg11[%c0_40, %c0_41] : memref<256x1024xbf16, #tpu.memory_space<vmem>>, vector<256x1024xbf16>
    %cst_42 = arith.constant dense<0.000000e+00> : vector<8x1024xf32>
    %72 = tpu.matmul %70, %71, %cst_42 {dimension_numbers = #tpu.dot_dimension_numbers<[1], [0], [0], [1], [0, 0, 1, 1], [], []>} : vector<8x256xbf16>, vector<256x1024xbf16>, vector<8x1024xf32> -> vector<8x1024xf32>
    %c0_43 = arith.constant 0 : index
    %c0_44 = arith.constant 0 : index
    %73 = vector.load %arg12[%c0_43, %c0_44] : memref<1x1024xf32, #tpu.memory_space<vmem>>, vector<1x1024xf32>
    %74 = vector.broadcast %73 : vector<1x1024xf32> to vector<8x1024xf32>
    %75 = arith.addf %72, %74 : vector<8x1024xf32>
    %cst_45 = arith.constant 0.000000e+00 : f32
    %76 = vector.broadcast %cst_45 : f32 to vector<8x1024xf32>
    %77 = arith.maximumf %75, %76 : vector<8x1024xf32>
    %78 = arith.truncf %77 : vector<8x1024xf32> to vector<8x1024xbf16>
    %c0_46 = arith.constant 0 : index
    %c0_47 = arith.constant 0 : index
    %79 = vector.load %arg13[%c0_46, %c0_47] : memref<1024x512xbf16, #tpu.memory_space<vmem>>, vector<1024x512xbf16>
    %cst_48 = arith.constant dense<0.000000e+00> : vector<8x512xf32>
    %80 = tpu.matmul %78, %79, %cst_48 {dimension_numbers = #tpu.dot_dimension_numbers<[1], [0], [0], [1], [0, 0, 1, 1], [], []>} : vector<8x1024xbf16>, vector<1024x512xbf16>, vector<8x512xf32> -> vector<8x512xf32>
    %c0_49 = arith.constant 0 : index
    %c0_50 = arith.constant 0 : index
    %81 = vector.load %arg14[%c0_49, %c0_50] : memref<1x512xf32, #tpu.memory_space<vmem>>, vector<1x512xf32>
    %82 = vector.broadcast %81 : vector<1x512xf32> to vector<8x512xf32>
    %83 = arith.addf %80, %82 : vector<8x512xf32>
    %cst_51 = arith.constant 0.000000e+00 : f32
    %84 = vector.broadcast %cst_51 : f32 to vector<8x512xf32>
    %85 = arith.maximumf %83, %84 : vector<8x512xf32>
    %86 = arith.truncf %85 : vector<8x512xf32> to vector<8x512xbf16>
    %c0_52 = arith.constant 0 : index
    %c0_53 = arith.constant 0 : index
    %87 = vector.load %arg15[%c0_52, %c0_53] : memref<512x128xbf16, #tpu.memory_space<vmem>>, vector<512x128xbf16>
    %cst_54 = arith.constant dense<0.000000e+00> : vector<8x128xf32>
    %88 = tpu.matmul %86, %87, %cst_54 {dimension_numbers = #tpu.dot_dimension_numbers<[1], [0], [0], [1], [0, 0, 1, 1], [], []>} : vector<8x512xbf16>, vector<512x128xbf16>, vector<8x128xf32> -> vector<8x128xf32>
    %c0_55 = arith.constant 0 : index
    %c0_56 = arith.constant 0 : index
    %89 = vector.load %arg16[%c0_55, %c0_56] : memref<1x128xf32, #tpu.memory_space<vmem>>, vector<1x128xf32>
    %90 = vector.broadcast %89 : vector<1x128xf32> to vector<8x128xf32>
    %91 = arith.addf %88, %90 : vector<8x128xf32>
    %c0_57 = arith.constant 0 : index
    %c0_58 = arith.constant 0 : index
    %92 = vector.load %arg17[%c0_57, %c0_58] : memref<8x128xf32, #tpu.memory_space<vmem>>, vector<8x128xf32>
    tpu.vector_store %arg17[%c0_57, %c0_58], %91 {strides = array<i32>} : memref<8x128xf32, #tpu.memory_space<vmem>>, vector<8x128xf32>,
    return
  }
}

</mosaic_0001>

<bundles_post_ra>
// kernel: gcn4_forward.1
= control target key start
LH: loop header
LB: loop body
LE: loop exit
PB: predicated region body
PF: predicated region fallthrough
CT: control target
= control target key end

     0   :  { %s11988_s1 = inlined_call_operand.vmem [shape: bf16[128,128], index: 1, kind: input, shape index: {}]   ;;  %s11989_s0 = inlined_call_operand.vmem [shape: bf16[128,128], index: 0, kind: input, shape index: {}]   ;;  %s11990_s3 = inlined_call_operand.vmem [shape: bf16[128,128], index: 3, kind: input, shape index: {}]   ;;  %s11991_s5 = inlined_call_operand.vmem [shape: bf16[128,128], index: 5, kind: input, shape index: {}]   ;;  %s11992_s4 = inlined_call_operand.vmem [shape: f32[1,128], index: 4, kind: input, shape index: {}]   ;;  %s11993_s7 = inlined_call_operand.vmem [shape: bf16[128,128], index: 7, kind: input, shape index: {}]   ;;  %s11994_s6 = inlined_call_operand.vmem [shape: f32[1,128], index: 6, kind: input, shape index: {}]   ;;  %s11995_s2 = inlined_call_operand.vmem [shape: f32[8,128], index: 2, kind: input, shape index: {}]   ;;  %s11996_s9 = inlined_call_operand.vmem [shape: bf16[128,256], index: 9, kind: input, shape index: {}]   ;;  %s11997_s8 = inlined_call_operand.vmem [shape: f32[1,128], index: 8, kind: input, shape index: {}]   ;;  %s11998_s11 = inlined_call_operand.vmem [shape: bf16[256,1024], index: 11, kind: input, shape index: {}]   ;;  %s11999_s10 = inlined_call_operand.vmem [shape: f32[1,256], index: 10, kind: input, shape index: {}]   ;;  %s12000_s13 = inlined_call_operand.vmem [shape: bf16[1024,512], index: 13, kind: input, shape index: {}]   ;;  %s12001_s12 = inlined_call_operand.vmem [shape: f32[1,1024], index: 12, kind: input, shape index: {}]   ;;  %s12002_s15 = inlined_call_operand.vmem [shape: bf16[512,128], index: 15, kind: input, shape index: {}]   ;;  %s12003_s14 = inlined_call_operand.vmem [shape: f32[1,512], index: 14, kind: input, shape index: {}]   ;;  %s12004_s16 = inlined_call_operand.vmem [shape: f32[1,128], index: 16, kind: input, shape index: {}]   ;;  %s12005_s17 = inlined_call_operand.vmem [shape: f32[8,128], index: 17, kind: output, shape index: {}]  }
   0x1   :  { %12168 = sst [smem:[#allocation89_spill]] %s11988_s1  ;;  %v7264_v7 = vld [vmem:[%s11990_s3] sm:$0xff]   ;;  %v7265_v8 = vld [vmem:[%s11990_s3 + $0x8] sm:$0xff]   ;;  %v7266_v10 = vld [vmem:[%s11990_s3 + $0x10] sm:$0xff]  }
   0x2   :  { %12169 = sst [smem:[#allocation90_spill]] %s11989_s0  ;;  %s12170_s26 = sld [smem:[#allocation89_spill]]  ;;  %7027 = vmatprep.subr.bf16.mxu1 %v7264_v7  ;;  %v7267_v12 = vld [vmem:[%s11990_s3 + $0x18] sm:$0xff]   ;;  %v7268_v13 = vld [vmem:[%s11990_s3 + $0x20] sm:$0xff]   ;;  %v7269_v16 = vld [vmem:[%s11990_s3 + $0x28] sm:$0xff]  }
   0x3   :  { %s12171_s20 = sld [smem:[#allocation90_spill]]  ;;  %7028 = vmatpush3.bf16.msra.mxu1 %v7264_v7  ;;  %v7270_v17 = vld [vmem:[%s11990_s3 + $0x30] sm:$0xff]   ;;  %v7271_v23 = vld [vmem:[%s11990_s3 + $0x38] sm:$0xff]   ;;  %v7272_v48 = vld [vmem:[%s11991_s5] sm:$0xff]  }
   0x4   :  { %7029 = vmatprep.subr.bf16.mxu1 %v7265_v8  ;;  %v7273_v49 = vld [vmem:[%s11991_s5 + $0x8] sm:$0xff]   ;;  %v7274_v50 = vld [vmem:[%s11991_s5 + $0x10] sm:$0xff]   ;;  %v7275_v51 = vld [vmem:[%s11991_s5 + $0x18] sm:$0xff]  }
   0x5   :  { %v7276_v52 = vld [vmem:[%s11991_s5 + $0x20] sm:$0xff]   ;;  %v7277_v53 = vld [vmem:[%s11991_s5 + $0x28] sm:$0xff]   ;;  %v7278_v54 = vld [vmem:[%s11991_s5 + $0x30] sm:$0xff]  }
   0x6   :  { %v7947_v55 = vld [vmem:[%s11992_s4] ss:$0 sm:$0xff] }
   0x7   :  { %7030 = vmatpush3.bf16.msra.mxu1 %v7265_v8 }
   0x8   :  { %v7248_v0 = vld [vmem:[%s12170_s26] sm:$0xff]   ;;  %v7249_v1 = vld [vmem:[%s12170_s26 + $0x8] sm:$0xff]   ;;  %v7250_v2 = vld [vmem:[%s12170_s26 + $0x10] sm:$0xff]   ;;  %7031 = vmatprep.subr.bf16.mxu1 %v7266_v10 }
   0x9   :  { %6995 = vmatprep.subr.bf16.mxu0 %v7248_v0  ;;  %v7251_v3 = vld [vmem:[%s12170_s26 + $0x18] sm:$0xff]   ;;  %v7841_v4 = vld [vmem:[%s12171_s20] sm:$0xff]   ;;  %v7253_v6 = vld [vmem:[%s12170_s26 + $0x28] sm:$0xff]  }
   0xa   :  { %6996 = vmatpush3.bf16.msra.mxu0 %v7248_v0  ;;  %7011 = vmatprep.mubr.bf16.mxu0 %v7841_v4  ;;  %v7252_v5 = vld [vmem:[%s12170_s26 + $0x20] sm:$0xff]   ;;  %v7254_v9 = vld [vmem:[%s12170_s26 + $0x30] sm:$0xff]   ;;  %v7255_v11 = vld [vmem:[%s12170_s26 + $0x38] sm:$0xff]  }
   0xb   :  { %6997 = vmatprep.subr.bf16.mxu0 %v7249_v1  ;;  %7032 = vmatpush3.bf16.msra.mxu1 %v7266_v10  ;;  %v7874_v14 = vld [vmem:[%s12171_s20 + $0x8] sm:$0xff]   ;;  %v7879_v15 = vld [vmem:[%s12171_s20 + $0x10] sm:$0xff]   ;;  %v7892_v18 = vld [vmem:[%s12171_s20 + $0x18] sm:$0xff]  }
   0xc   :  { %7033 = vmatprep.subr.bf16.mxu1 %v7267_v12  ;;  %v7897_v19 = vld [vmem:[%s12171_s20 + $0x20] sm:$0xff]   ;;  %v7904_v20 = vld [vmem:[%s12171_s20 + $0x28] sm:$0xff]   ;;  %v7909_v21 = vld [vmem:[%s12171_s20 + $0x30] sm:$0xff]  }
   0xd   :  { %v7916_v22 = vld [vmem:[%s12171_s20 + $0x38] sm:$0xff]  }
   0xe   :  { %6998 = vmatpush3.bf16.msra.mxu0 %v7249_v1 }
   0xf   :  { %6999 = vmatprep.subr.bf16.mxu0 %v7250_v2  ;;  %7034 = vmatpush3.bf16.msra.mxu1 %v7267_v12 }
  0x10   :  { %7035 = vmatprep.subr.bf16.mxu1 %v7268_v13 }
  0x12   :  { %7000 = vmatpush3.bf16.msra.mxu0 %v7250_v2 }
  0x13   :  { %7001 = vmatprep.subr.bf16.mxu0 %v7251_v3  ;;  %7036 = vmatpush3.bf16.msra.mxu1 %v7268_v13 }
  0x14   :  { %7037 = vmatprep.subr.bf16.mxu1 %v7269_v16 }
  0x16   :  { %7002 = vmatpush3.bf16.msra.mxu0 %v7251_v3 }
  0x17   :  { %7003 = vmatprep.subr.bf16.mxu0 %v7252_v5  ;;  %7038 = vmatpush3.bf16.msra.mxu1 %v7269_v16 }
  0x18   :  { %7039 = vmatprep.subr.bf16.mxu1 %v7270_v17 }
  0x1a   :  { %7004 = vmatpush3.bf16.msra.mxu0 %v7252_v5 }
  0x1b   :  { %7005 = vmatprep.subr.bf16.mxu0 %v7253_v6  ;;  %7040 = vmatpush3.bf16.msra.mxu1 %v7270_v17 }
  0x1c   :  { %7041 = vmatprep.subr.bf16.mxu1 %v7271_v23 }
  0x1e   :  { %7006 = vmatpush3.bf16.msra.mxu0 %v7253_v6 }
  0x1f   :  { %7007 = vmatprep.subr.bf16.mxu0 %v7254_v9  ;;  %7042 = vmatpush3.bf16.msra.mxu1 %v7271_v23 }
  0x20   :  { %7091 = vmatprep.subr.bf16.mxu1 %v7272_v48 }
  0x22   :  { %7008 = vmatpush3.bf16.msra.mxu0 %v7254_v9 }
  0x23   :  { %7009 = vmatprep.subr.bf16.mxu0 %v7255_v11 }
  0x26   :  { %7010 = vmatpush3.bf16.msra.mxu0 %v7255_v11 }
  0x29   :  { %7012 = vmatmul.mubr.bf16.vlgmr.msra.gmra.mrb[0].mxu0 %v7874_v14 }
  0x2a   :  { %7015 = vmatprep.mubr.bf16.mxu0 %v7879_v15 }
  0x31   :  { %7016 = vmatmul.mubr.bf16.gmra.mrb[4].mxu0 %v7892_v18 }
  0x32   :  { %7019 = vmatprep.mubr.bf16.mxu0 %v7897_v19 }
  0x39   :  { %7020 = vmatmul.mubr.bf16.gmra.mrb[8].mxu0 %v7904_v20 }
  0x3a   :  { %7023 = vmatprep.mubr.bf16.mxu0 %v7909_v21 }
  0x41   :  { %7024 = vmatmul.mubr.bf16.gmra.mrb[12].mxu0 %v7916_v22 }
  0x42   :  { %7075 = vmatprep.mubr.bf16.mxu0 %v7841_v4 }
  0xfc   :  { %v7013_v24 = vpop.f32.mrb[0].mxu0 }
  0xfd   :  { %v235_v25 = vpop.f32.mrb[1].mxu0 }
  0xfe   :  { %v7014_v26 = vpop.f32.mrb[2].mxu0 }
  0xff   :  { %v299_v27 = vpack.c.bf16 %v7014_v26, %v7013_v24  ;;  %v238_v28 = vpop.f32.mrb[3].mxu0 }
 0x100   :  { %v298_v29 = vpack.c.bf16 %v238_v28, %v235_v25 }
 0x102   :  { %7043 = vmatprep.mubr.bf16.mxu1 %v298_v29 }
 0x103   :  { %7044 = vmatmul.mubr.bf16.vlgmr.msra.gmra.mrb[0].mxu1 %v299_v27 }
 0x104   :  { %v7017_v30 = vpop.f32.mrb[4].mxu0  ;;  %7092 = vmatpush3.bf16.msra.mxu1 %v7272_v48 }
 0x105   :  { %v251_v31 = vpop.f32.mrb[5].mxu0  ;;  %7093 = vmatprep.subr.bf16.mxu1 %v7273_v49 }
 0x106   :  { %v7018_v32 = vpop.f32.mrb[6].mxu0 }
 0x107   :  { %v301_v33 = vpack.c.bf16 %v7018_v32, %v7017_v30  ;;  %v254_v34 = vpop.f32.mrb[7].mxu0 }
 0x108   :  { %v300_v35 = vpack.c.bf16 %v254_v34, %v251_v31  ;;  %7094 = vmatpush3.bf16.msra.mxu1 %v7273_v49 }
 0x109   :  { %7095 = vmatprep.subr.bf16.mxu1 %v7274_v50 }
 0x10a   :  { %7047 = vmatprep.mubr.bf16.mxu1 %v300_v35 }
 0x10b   :  { %7048 = vmatmul.mubr.bf16.gmra.mrb[4].mxu1 %v301_v33 }
 0x10c   :  { %v7021_v36 = vpop.f32.mrb[8].mxu0  ;;  %7096 = vmatpush3.bf16.msra.mxu1 %v7274_v50 }
 0x10d   :  { %v267_v37 = vpop.f32.mrb[9].mxu0  ;;  %7097 = vmatprep.subr.bf16.mxu1 %v7275_v51 }
 0x10e   :  { %v7022_v38 = vpop.f32.mrb[10].mxu0 }
 0x10f   :  { %v303_v39 = vpack.c.bf16 %v7022_v38, %v7021_v36  ;;  %v270_v40 = vpop.f32.mrb[11].mxu0 }
 0x110   :  { %v302_v41 = vpack.c.bf16 %v270_v40, %v267_v37  ;;  %7098 = vmatpush3.bf16.msra.mxu1 %v7275_v51 }
 0x111   :  { %7099 = vmatprep.subr.bf16.mxu1 %v7276_v52 }
 0x112   :  { %7051 = vmatprep.mubr.bf16.mxu1 %v302_v41 }
 0x113   :  { %7052 = vmatmul.mubr.bf16.gmra.mrb[8].mxu1 %v303_v39 }
 0x114   :  { %v7025_v42 = vpop.f32.mrb[12].mxu0  ;;  %7100 = vmatpush3.bf16.msra.mxu1 %v7276_v52 }
 0x115   :  { %v283_v43 = vpop.f32.mrb[13].mxu0  ;;  %7101 = vmatprep.subr.bf16.mxu1 %v7277_v53 }
 0x116   :  { %v7026_v44 = vpop.f32.mrb[14].mxu0 }
 0x117   :  { %v305_v45 = vpack.c.bf16 %v7026_v44, %v7025_v42  ;;  %v286_v46 = vpop.f32.mrb[15].mxu0 }
 0x118   :  { %v304_v47 = vpack.c.bf16 %v286_v46, %v283_v43  ;;  %7102 = vmatpush3.bf16.msra.mxu1 %v7277_v53 }
 0x119   :  { %7103 = vmatprep.subr.bf16.mxu1 %v7278_v54 }
 0x11a   :  { %7055 = vmatprep.mubr.bf16.mxu1 %v304_v47 }
 0x11b   :  { %7056 = vmatmul.mubr.bf16.gmra.mrb[12].mxu1 %v305_v45 }
 0x11c   :  { %7104 = vmatpush3.bf16.msra.mxu1 %v7278_v54 }
 0x1d6   :  { %v7045_v56 = vpop.f32.mrb[0].mxu1 }
 0x1d7   :  { %v404_v57 = vadd.f32 %v7045_v56, %v7947_v55  ;;  %v395_v58 = vpop.f32.mrb[1].mxu1 }
 0x1d8   :  { %v396_v59 = vadd.f32 %v7947_v55, %v395_v58  ;;  %v7046_v60 = vpop.f32.mrb[2].mxu1 }
 0x1d9   :  { %v476_v61 = vmul.f32 0.01, %v404_v57  ;;  %v407_v62 = vadd.f32 %v7046_v60, %v7947_v55  ;;  %v398_v63 = vpop.f32.mrb[3].mxu1  ;;  %vm460_vm0 = vcmp.gt.f32.partialorder %v404_v57, 0.0 }
 0x1da   :  { %v474_v0 = vmul.f32 0.01, %v396_v59  ;;  %v399_v1 = vadd.f32 %v7947_v55, %v398_v63  ;;  %vm458_vm1 = vcmp.gt.f32.partialorder %v396_v59, 0.0 }
 0x1db   :  { %vm461_vm2 = vcmp.gt.f32.partialorder %v407_v62, 0.0  ;;  %v477_v2 = vmul.f32 0.01, %v407_v62  ;;  %v492_v5 = vsel %vm460_vm0, %v404_v57, %v476_v61 }
 0x1dc   :  { %vm459_vm3 = vcmp.gt.f32.partialorder %v399_v1, 0.0  ;;  %v475_v3 = vmul.f32 0.01, %v399_v1  ;;  %v490_v8 = vsel %vm458_vm1, %v396_v59, %v474_v0 }
 0x1dd   :  { %v493_v6 = vsel %vm461_vm2, %v407_v62, %v477_v2 }
 0x1de   :  { %v7049_v7 = vpop.f32.mrb[4].mxu1  ;;  %v491_v9 = vsel %vm459_vm3, %v399_v1, %v475_v3  ;;  %v507_v10 = vpack.c.bf16 %v493_v6, %v492_v5 }
 0x1df   :  { %v420_v11 = vadd.f32 %v7049_v7, %v7947_v55  ;;  %v411_v12 = vpop.f32.mrb[5].mxu1  ;;  %v506_v13 = vpack.c.bf16 %v491_v9, %v490_v8 }
 0x1e0   :  { %v412_v16 = vadd.f32 %v7947_v55, %v411_v12  ;;  %v7050_v17 = vpop.f32.mrb[6].mxu1 }
 0x1e1   :  { %v480_v23 = vmul.f32 0.01, %v420_v11  ;;  %v423_v24 = vadd.f32 %v7050_v17, %v7947_v55  ;;  %v414_v25 = vpop.f32.mrb[7].mxu1  ;;  %7059 = vmatprep.subr.bf16.mxu0 %v506_v13  ;;  %vm464_vm4 = vcmp.gt.f32.partialorder %v420_v11, 0.0 }
 0x1e2   :  { %v478_v26 = vmul.f32 0.01, %v412_v16  ;;  %v415_v27 = vadd.f32 %v7947_v55, %v414_v25  ;;  %7060 = vmatpush3.bf16.msra.mxu0 %v506_v13  ;;  %vm462_vm5 = vcmp.gt.f32.partialorder %v412_v16, 0.0 }
 0x1e3   :  { %vm465_vm6 = vcmp.gt.f32.partialorder %v423_v24, 0.0  ;;  %v481_v28 = vmul.f32 0.01, %v423_v24  ;;  %7061 = vmatprep.subr.bf16.mxu0 %v507_v10  ;;  %v496_v30 = vsel %vm464_vm4, %v420_v11, %v480_v23 }
 0x1e4   :  { %vm463_vm7 = vcmp.gt.f32.partialorder %v415_v27, 0.0  ;;  %v479_v29 = vmul.f32 0.01, %v415_v27  ;;  %v494_v33 = vsel %vm462_vm5, %v412_v16, %v478_v26 }
 0x1e5   :  { %v497_v31 = vsel %vm465_vm6, %v423_v24, %v481_v28 }
 0x1e6   :  { %v7053_v32 = vpop.f32.mrb[8].mxu1  ;;  %7062 = vmatpush3.bf16.msra.mxu0 %v507_v10  ;;  %v495_v34 = vsel %vm463_vm7, %v415_v27, %v479_v29  ;;  %v509_v35 = vpack.c.bf16 %v497_v31, %v496_v30 }
 0x1e7   :  { %v436_v36 = vadd.f32 %v7053_v32, %v7947_v55  ;;  %v427_v37 = vpop.f32.mrb[9].mxu1  ;;  %v508_v38 = vpack.c.bf16 %v495_v34, %v494_v33 }
 0x1e8   :  { %v428_v39 = vadd.f32 %v7947_v55, %v427_v37  ;;  %v7054_v40 = vpop.f32.mrb[10].mxu1 }
 0x1e9   :  { %v484_v41 = vmul.f32 0.01, %v436_v36  ;;  %v439_v42 = vadd.f32 %v7054_v40, %v7947_v55  ;;  %v430_v43 = vpop.f32.mrb[11].mxu1  ;;  %7063 = vmatprep.subr.bf16.mxu0 %v508_v38  ;;  %vm468_vm8 = vcmp.gt.f32.partialorder %v436_v36, 0.0 }
 0x1ea   :  { %v482_v44 = vmul.f32 0.01, %v428_v39  ;;  %v431_v45 = vadd.f32 %v7947_v55, %v430_v43  ;;  %7064 = vmatpush3.bf16.msra.mxu0 %v508_v38  ;;  %vm466_vm9 = vcmp.gt.f32.partialorder %v428_v39, 0.0  ;;  %v7282_v43 = vld [vmem:[%s11993_s7 + $0x10] sm:$0xff]  }
 0x1eb   :  { %vm469_vm10 = vcmp.gt.f32.partialorder %v439_v42, 0.0  ;;  %v485_v46 = vmul.f32 0.01, %v439_v42  ;;  %7065 = vmatprep.subr.bf16.mxu0 %v509_v35  ;;  %v500_v48 = vsel %vm468_vm8, %v436_v36, %v484_v41  ;;  %v7280_v41 = vld [vmem:[%s11993_s7] sm:$0xff]  }
 0x1ec   :  { %vm467_vm11 = vcmp.gt.f32.partialorder %v431_v45, 0.0  ;;  %v483_v47 = vmul.f32 0.01, %v431_v45  ;;  %v498_v51 = vsel %vm466_vm9, %v428_v39, %v482_v44  ;;  %v7283_v44 = vld [vmem:[%s11993_s7 + $0x18] sm:$0xff]  }
 0x1ed   :  { %v501_v49 = vsel %vm469_vm10, %v439_v42, %v485_v46  ;;  %v7281_v42 = vld [vmem:[%s11993_s7 + $0x8] sm:$0xff]  }
 0x1ee   :  { %v7057_v50 = vpop.f32.mrb[12].mxu1  ;;  %7066 = vmatpush3.bf16.msra.mxu0 %v509_v35  ;;  %v499_v52 = vsel %vm467_vm11, %v431_v45, %v483_v47  ;;  %v511_v53 = vpack.c.bf16 %v501_v49, %v500_v48  ;;  %v7284_v45 = vld [vmem:[%s11993_s7 + $0x20] sm:$0xff]   ;;  %v7285_v46 = vld [vmem:[%s11993_s7 + $0x28] sm:$0xff]   ;;  %v7286_v47 = vld [vmem:[%s11993_s7 + $0x30] sm:$0xff]  }
 0x1ef   :  { %v452_v54 = vadd.f32 %v7057_v50, %v7947_v55  ;;  %v443_v56 = vpop.f32.mrb[13].mxu1  ;;  %v510_v57 = vpack.c.bf16 %v499_v52, %v498_v51  ;;  %v8000_v48 = vld [vmem:[%s11994_s6] ss:$0 sm:$0xff] }
 0x1f0   :  { %v444_v58 = vadd.f32 %v7947_v55, %v443_v56  ;;  %v7058_v59 = vpop.f32.mrb[14].mxu1 }
 0x1f1   :  { %v488_v60 = vmul.f32 0.01, %v452_v54  ;;  %v455_v61 = vadd.f32 %v7058_v59, %v7947_v55  ;;  %v446_v62 = vpop.f32.mrb[15].mxu1  ;;  %7067 = vmatprep.subr.bf16.mxu0 %v510_v57  ;;  %vm472_vm12 = vcmp.gt.f32.partialorder %v452_v54, 0.0 }
 0x1f2   :  { %v486_v63 = vmul.f32 0.01, %v444_v58  ;;  %v447_v0 = vadd.f32 %v7947_v55, %v446_v62  ;;  %7068 = vmatpush3.bf16.msra.mxu0 %v510_v57  ;;  %vm470_vm13 = vcmp.gt.f32.partialorder %v444_v58, 0.0  ;;  %v7279_v55 = vld [vmem:[%s11991_s5 + $0x38] sm:$0xff]  }
 0x1f3   :  { %vm473_vm14 = vcmp.gt.f32.partialorder %v455_v61, 0.0  ;;  %v489_v1 = vmul.f32 0.01, %v455_v61  ;;  %7069 = vmatprep.subr.bf16.mxu0 %v511_v53  ;;  %v504_v3 = vsel %vm472_vm12, %v452_v54, %v488_v60  ;;  %7105 = vmatprep.subr.bf16.mxu1 %v7279_v55 }
 0x1f4   :  { %vm471_vm15 = vcmp.gt.f32.partialorder %v447_v0, 0.0  ;;  %v487_v2 = vmul.f32 0.01, %v447_v0  ;;  %v502_v6 = vsel %vm470_vm13, %v444_v58, %v486_v63  ;;  %7106 = vmatpush3.bf16.msra.mxu1 %v7279_v55 }
 0x1f5   :  { %v505_v5 = vsel %vm473_vm14, %v455_v61, %v489_v1  ;;  %7155 = vmatprep.subr.bf16.mxu1 %v7280_v41 }
 0x1f6   :  { %7070 = vmatpush3.bf16.msra.mxu0 %v511_v53  ;;  %v503_v7 = vsel %vm471_vm15, %v447_v0, %v487_v2  ;;  %v513_v8 = vpack.c.bf16 %v505_v5, %v504_v3 }
 0x1f7   :  { %v512_v9 = vpack.c.bf16 %v503_v7, %v502_v6 }
 0x1f9   :  { %7071 = vmatprep.subr.bf16.mxu0 %v512_v9 }
 0x1fa   :  { %7072 = vmatpush3.bf16.msra.mxu0 %v512_v9 }
 0x1fb   :  { %7073 = vmatprep.subr.bf16.mxu0 %v513_v8 }
 0x1fe   :  { %7074 = vmatpush3.bf16.msra.mxu0 %v513_v8 }
 0x201   :  { %7076 = vmatmul.mubr.bf16.vlgmr.msra.gmra.mrb[16].mxu0 %v7874_v14 }
 0x202   :  { %7079 = vmatprep.mubr.bf16.mxu0 %v7879_v15 }
 0x209   :  { %7080 = vmatmul.mubr.bf16.gmra.mrb[20].mxu0 %v7892_v18 }
 0x20a   :  { %7083 = vmatprep.mubr.bf16.mxu0 %v7897_v19 }
 0x211   :  { %7084 = vmatmul.mubr.bf16.gmra.mrb[24].mxu0 %v7904_v20 }
 0x212   :  { %7087 = vmatprep.mubr.bf16.mxu0 %v7909_v21 }
 0x219   :  { %7088 = vmatmul.mubr.bf16.gmra.mrb[28].mxu0 %v7916_v22 }
 0x21a   :  { %7139 = vmatprep.mubr.bf16.mxu0 %v7841_v4 }
 0x2d4   :  { %v7077_v10 = vpop.f32.mrb[16].mxu0 }
 0x2d5   :  { %v564_v11 = vpop.f32.mrb[17].mxu0 }
 0x2d6   :  { %v7078_v12 = vpop.f32.mrb[18].mxu0 }
 0x2d7   :  { %v628_v13 = vpack.c.bf16 %v7078_v12, %v7077_v10  ;;  %v567_v16 = vpop.f32.mrb[19].mxu0 }
 0x2d8   :  { %v627_v17 = vpack.c.bf16 %v567_v16, %v564_v11 }
 0x2da   :  { %7107 = vmatprep.mubr.bf16.mxu1 %v627_v17 }
 0x2db   :  { %7108 = vmatmul.mubr.bf16.vlgmr.msra.gmra.mrb[16].mxu1 %v628_v13 }
 0x2dc   :  { %v7081_v23 = vpop.f32.mrb[20].mxu0  ;;  %7156 = vmatpush3.bf16.msra.mxu1 %v7280_v41 }
 0x2dd   :  { %v580_v24 = vpop.f32.mrb[21].mxu0  ;;  %7157 = vmatprep.subr.bf16.mxu1 %v7281_v42 }
 0x2de   :  { %v7082_v25 = vpop.f32.mrb[22].mxu0 }
 0x2df   :  { %v630_v26 = vpack.c.bf16 %v7082_v25, %v7081_v23  ;;  %v583_v27 = vpop.f32.mrb[23].mxu0 }
 0x2e0   :  { %v629_v28 = vpack.c.bf16 %v583_v27, %v580_v24  ;;  %7158 = vmatpush3.bf16.msra.mxu1 %v7281_v42 }
 0x2e1   :  { %7159 = vmatprep.subr.bf16.mxu1 %v7282_v43 }
 0x2e2   :  { %7111 = vmatprep.mubr.bf16.mxu1 %v629_v28 }
 0x2e3   :  { %7112 = vmatmul.mubr.bf16.gmra.mrb[20].mxu1 %v630_v26 }
 0x2e4   :  { %v7085_v29 = vpop.f32.mrb[24].mxu0  ;;  %7160 = vmatpush3.bf16.msra.mxu1 %v7282_v43 }
 0x2e5   :  { %v596_v30 = vpop.f32.mrb[25].mxu0  ;;  %7161 = vmatprep.subr.bf16.mxu1 %v7283_v44 }
 0x2e6   :  { %v7086_v31 = vpop.f32.mrb[26].mxu0 }
 0x2e7   :  { %v632_v32 = vpack.c.bf16 %v7086_v31, %v7085_v29  ;;  %v599_v33 = vpop.f32.mrb[27].mxu0 }
 0x2e8   :  { %v631_v34 = vpack.c.bf16 %v599_v33, %v596_v30  ;;  %7162 = vmatpush3.bf16.msra.mxu1 %v7283_v44 }
 0x2e9   :  { %7163 = vmatprep.subr.bf16.mxu1 %v7284_v45 }
 0x2ea   :  { %7115 = vmatprep.mubr.bf16.mxu1 %v631_v34 }
 0x2eb   :  { %7116 = vmatmul.mubr.bf16.gmra.mrb[24].mxu1 %v632_v32 }
 0x2ec   :  { %v7089_v35 = vpop.f32.mrb[28].mxu0  ;;  %7164 = vmatpush3.bf16.msra.mxu1 %v7284_v45 }
 0x2ed   :  { %v612_v36 = vpop.f32.mrb[29].mxu0  ;;  %7165 = vmatprep.subr.bf16.mxu1 %v7285_v46 }
 0x2ee   :  { %v7090_v37 = vpop.f32.mrb[30].mxu0 }
 0x2ef   :  { %v634_v38 = vpack.c.bf16 %v7090_v37, %v7089_v35  ;;  %v615_v39 = vpop.f32.mrb[31].mxu0 }
 0x2f0   :  { %v633_v40 = vpack.c.bf16 %v615_v39, %v612_v36  ;;  %7166 = vmatpush3.bf16.msra.mxu1 %v7285_v46 }
 0x2f1   :  { %7167 = vmatprep.subr.bf16.mxu1 %v7286_v47 }
 0x2f2   :  { %7119 = vmatprep.mubr.bf16.mxu1 %v633_v40 }
 0x2f3   :  { %7120 = vmatmul.mubr.bf16.gmra.mrb[28].mxu1 %v634_v38 }
 0x2f4   :  { %7168 = vmatpush3.bf16.msra.mxu1 %v7286_v47 }
 0x3ae   :  { %v7109_v49 = vpop.f32.mrb[16].mxu1 }
 0x3af   :  { %v733_v50 = vadd.f32 %v7109_v49, %v8000_v48  ;;  %v724_v51 = vpop.f32.mrb[17].mxu1 }
 0x3b0   :  { %v725_v52 = vadd.f32 %v8000_v48, %v724_v51  ;;  %v7110_v53 = vpop.f32.mrb[18].mxu1 }
 0x3b1   :  { %v805_v54 = vmul.f32 0.01, %v733_v50  ;;  %v736_v56 = vadd.f32 %v7110_v53, %v8000_v48  ;;  %v727_v57 = vpop.f32.mrb[19].mxu1  ;;  %vm789_vm0 = vcmp.gt.f32.partialorder %v733_v50, 0.0 }
 0x3b2   :  { %v803_v58 = vmul.f32 0.01, %v725_v52  ;;  %v728_v59 = vadd.f32 %v8000_v48, %v727_v57  ;;  %vm787_vm1 = vcmp.gt.f32.partialorder %v725_v52, 0.0 }
 0x3b3   :  { %vm790_vm2 = vcmp.gt.f32.partialorder %v736_v56, 0.0  ;;  %v806_v60 = vmul.f32 0.01, %v736_v56  ;;  %v821_v62 = vsel %vm789_vm0, %v733_v50, %v805_v54 }
 0x3b4   :  { %vm788_vm3 = vcmp.gt.f32.partialorder %v728_v59, 0.0  ;;  %v804_v61 = vmul.f32 0.01, %v728_v59  ;;  %v819_v1 = vsel %vm787_vm1, %v725_v52, %v803_v58 }
 0x3b5   :  { %v822_v63 = vsel %vm790_vm2, %v736_v56, %v806_v60 }
 0x3b6   :  { %v7113_v0 = vpop.f32.mrb[20].mxu1  ;;  %v820_v2 = vsel %vm788_vm3, %v728_v59, %v804_v61  ;;  %v836_v3 = vpack.c.bf16 %v822_v63, %v821_v62 }
 0x3b7   :  { %v749_v5 = vadd.f32 %v7113_v0, %v8000_v48  ;;  %v740_v6 = vpop.f32.mrb[21].mxu1  ;;  %v835_v7 = vpack.c.bf16 %v820_v2, %v819_v1 }
 0x3b8   :  { %v741_v8 = vadd.f32 %v8000_v48, %v740_v6  ;;  %v7114_v9 = vpop.f32.mrb[22].mxu1 }
 0x3b9   :  { %v809_v55 = vmul.f32 0.01, %v749_v5  ;;  %v752_v10 = vadd.f32 %v7114_v9, %v8000_v48  ;;  %v743_v11 = vpop.f32.mrb[23].mxu1  ;;  %7123 = vmatprep.subr.bf16.mxu0 %v835_v7  ;;  %vm793_vm4 = vcmp.gt.f32.partialorder %v749_v5, 0.0 }
 0x3ba   :  { %v807_v12 = vmul.f32 0.01, %v741_v8  ;;  %v744_v13 = vadd.f32 %v8000_v48, %v743_v11  ;;  %7124 = vmatpush3.bf16.msra.mxu0 %v835_v7  ;;  %vm791_vm5 = vcmp.gt.f32.partialorder %v741_v8, 0.0 }
 0x3bb   :  { %vm794_vm6 = vcmp.gt.f32.partialorder %v752_v10, 0.0  ;;  %v810_v16 = vmul.f32 0.01, %v752_v10  ;;  %7125 = vmatprep.subr.bf16.mxu0 %v836_v3  ;;  %v825_v23 = vsel %vm793_vm4, %v749_v5, %v809_v55 }
 0x3bc   :  { %vm792_vm7 = vcmp.gt.f32.partialorder %v744_v13, 0.0  ;;  %v808_v17 = vmul.f32 0.01, %v744_v13  ;;  %v823_v26 = vsel %vm791_vm5, %v741_v8, %v807_v12 }
 0x3bd   :  { %v826_v24 = vsel %vm794_vm6, %v752_v10, %v810_v16 }
 0x3be   :  { %v7117_v25 = vpop.f32.mrb[24].mxu1  ;;  %7126 = vmatpush3.bf16.msra.mxu0 %v836_v3  ;;  %v824_v27 = vsel %vm792_vm7, %v744_v13, %v808_v17  ;;  %v838_v28 = vpack.c.bf16 %v826_v24, %v825_v23 }
 0x3bf   :  { %v765_v29 = vadd.f32 %v7117_v25, %v8000_v48  ;;  %v756_v30 = vpop.f32.mrb[25].mxu1  ;;  %v837_v31 = vpack.c.bf16 %v824_v27, %v823_v26  ;;  %v1295_v26 = vlaneseq }
 0x3c0   :  { %v757_v32 = vadd.f32 %v8000_v48, %v756_v30  ;;  %v7118_v33 = vpop.f32.mrb[26].mxu1  ;;  %v8040_v30 = vld [vmem:[%s11995_s2] sm:$0xff] }
 0x3c1   :  { %v813_v34 = vmul.f32 0.01, %v765_v29  ;;  %v768_v35 = vadd.f32 %v7118_v33, %v8000_v48  ;;  %v759_v36 = vpop.f32.mrb[27].mxu1  ;;  %7127 = vmatprep.subr.bf16.mxu0 %v837_v31  ;;  %vm797_vm8 = vcmp.gt.f32.partialorder %v765_v29, 0.0  ;;  %v8029_v27 = vshrl.u32 %v1295_v26, 7 }
 0x3c2   :  { %v811_v37 = vmul.f32 0.01, %v757_v32  ;;  %v760_v38 = vadd.f32 %v8000_v48, %v759_v36  ;;  %7128 = vmatpush3.bf16.msra.mxu0 %v837_v31  ;;  %vm795_vm9 = vcmp.gt.f32.partialorder %v757_v32, 0.0  ;;  %v7293_v31 = vld [vmem:[%s11996_s9 + $0x14] ss:$8 sps:$4 sm:$0xff]  }
 0x3c3   :  { %vm798_vm10 = vcmp.gt.f32.partialorder %v768_v35, 0.0  ;;  %v814_v39 = vmul.f32 0.01, %v768_v35  ;;  %7129 = vmatprep.subr.bf16.mxu0 %v838_v28  ;;  %v829_v41 = vsel %vm797_vm8, %v765_v29, %v813_v34  ;;  %12172 = vst [vmem:[#allocation2_spill] sm:$0xff] %v8029_v27  ;;  %v7290_v29 = vld [vmem:[%s11996_s9 + $0x4] ss:$8 sps:$4 sm:$0xff]  }
 0x3c4   :  { %vm796_vm11 = vcmp.gt.f32.partialorder %v760_v38, 0.0  ;;  %v812_v40 = vmul.f32 0.01, %v760_v38  ;;  %v827_v44 = vsel %vm795_vm9, %v757_v32, %v811_v37  ;;  %v8046_v32 = vsub.s32 0, %v8029_v27  ;;  %v7291_v34 = vld [vmem:[%s11996_s9 + $0x10] ss:$8 sps:$4 sm:$0xff]  }
 0x3c5   :  { %v830_v42 = vsel %vm798_vm10, %v768_v35, %v814_v39  ;;  %v8049_v33 = vsub.s32 1, %v8029_v27  ;;  %v7296_v36 = vld [vmem:[%s11996_s9 + $0x24] ss:$8 sps:$4 sm:$0xff]   ;;  %v7294_v39 = vld [vmem:[%s11996_s9 + $0x20] ss:$8 sps:$4 sm:$0xff]  }
 0x3c6   :  { %v7121_v43 = vpop.f32.mrb[28].mxu1  ;;  %7130 = vmatpush3.bf16.msra.mxu0 %v838_v28  ;;  %v828_v45 = vsel %vm796_vm11, %v760_v38, %v812_v40  ;;  %v840_v46 = vpack.c.bf16 %v830_v42, %v829_v41  ;;  %v7288_v28 = vld [vmem:[%s11996_s9] ss:$8 sps:$4 sm:$0xff]   ;;  %12173 = vst [vmem:[#allocation3_spill] sm:$0xff] %v8046_v32  ;;  %v8056_v35 = vrot.slane %v8040_v30, %v8046_v32  ;;  %v8067_v38 = vsub.s32 2, %v8029_v27 }
 0x3c7   :  { %v781_v47 = vadd.f32 %v7121_v43, %v8000_v48  ;;  %v772_v49 = vpop.f32.mrb[29].mxu1  ;;  %v839_v50 = vpack.c.bf16 %v828_v45, %v827_v44  ;;  %12174 = vst [vmem:[#allocation4_spill] sm:$0xff] %v8049_v33  ;;  %v8063_v37 = vrot.slane %v8040_v30, %v8049_v33  ;;  %v7299_v40 = vld [vmem:[%s11996_s9 + $0x34] ss:$8 sps:$4 sm:$0xff]   ;;  %v7297_v42 = vld [vmem:[%s11996_s9 + $0x30] ss:$8 sps:$4 sm:$0xff]  }
 0x3c8   :  { %v773_v51 = vadd.f32 %v8000_v48, %v772_v49  ;;  %v7122_v52 = vpop.f32.mrb[30].mxu1  ;;  %1552 = vbcast.lane.b32.xlu0 %v8056_v35, 256  ;;  %12175 = vst [vmem:[#allocation5_spill] sm:$0xff] %v8067_v38  ;;  %v8079_v41 = vrot.slane %v8040_v30, %v8067_v38  ;;  %v7302_v43 = vld [vmem:[%s11996_s9 + $0x44] ss:$8 sps:$4 sm:$0xff]   ;;  %v8090_v44 = vsub.s32 3, %v8029_v27 }
 0x3c9   :  { %v817_v53 = vmul.f32 0.01, %v781_v47  ;;  %v784_v54 = vadd.f32 %v7122_v52, %v8000_v48  ;;  %v775_v56 = vpop.f32.mrb[31].mxu1  ;;  %7131 = vmatprep.subr.bf16.mxu0 %v839_v50  ;;  %vm801_vm12 = vcmp.gt.f32.partialorder %v781_v47, 0.0  ;;  %1619 = vbcast.lane.b32.xlu1 %v8063_v37, 256 }
 0x3ca   :  { %v815_v57 = vmul.f32 0.01, %v773_v51  ;;  %v776_v58 = vadd.f32 %v8000_v48, %v775_v56  ;;  %7132 = vmatpush3.bf16.msra.mxu0 %v839_v50  ;;  %vm799_vm13 = vcmp.gt.f32.partialorder %v773_v51, 0.0  ;;  %v7287_v48 = vld [vmem:[%s11993_s7 + $0x38] sm:$0xff]   ;;  %12176 = vst [vmem:[#allocation6_spill] sm:$0xff] %v8090_v44 }
 0x3cb   :  { %vm802_vm14 = vcmp.gt.f32.partialorder %v784_v54, 0.0  ;;  %v818_v59 = vmul.f32 0.01, %v784_v54  ;;  %7133 = vmatprep.subr.bf16.mxu0 %v840_v46  ;;  %v833_v61 = vsel %vm801_vm12, %v781_v47, %v817_v53  ;;  %7169 = vmatprep.subr.bf16.mxu1 %v7287_v48  ;;  %v7300_v45 = vld [vmem:[%s11996_s9 + $0x40] ss:$8 sps:$4 sm:$0xff]   ;;  %v8102_v47 = vrot.slane %v8040_v30, %v8090_v44 }
 0x3cc   :  { %vm800_vm15 = vcmp.gt.f32.partialorder %v776_v58, 0.0  ;;  %v816_v60 = vmul.f32 0.01, %v776_v58  ;;  %v831_v63 = vsel %vm799_vm13, %v773_v51, %v815_v57  ;;  %7170 = vmatpush3.bf16.msra.mxu1 %v7287_v48  ;;  %1556 = vbcast.lane.b32.xlu0 %v8056_v35, 264  ;;  %v7303_v49 = vld [vmem:[%s11996_s9 + $0x50] ss:$8 sps:$4 sm:$0xff]  }
 0x3cd   :  { %v834_v62 = vsel %vm802_vm14, %v784_v54, %v818_v59  ;;  %1385 = vmatprep.subr.bf16.mxu1 %v7290_v29  ;;  %1623 = vbcast.lane.b32.xlu1 %v8063_v37, 264  ;;  %v7308_v50 = vld [vmem:[%s11996_s9 + $0x64] ss:$8 sps:$4 sm:$0xff]   ;;  %v12010_v51 = vsub.s32 4, %v8029_v27  ;;  %v7306_v52 = vld [vmem:[%s11996_s9 + $0x60] ss:$8 sps:$4 sm:$0xff]  }
 0x3ce   :  { %7134 = vmatpush3.bf16.msra.mxu0 %v840_v46  ;;  %v832_v0 = vsel %vm800_vm15, %v776_v58, %v816_v60  ;;  %v842_v1 = vpack.c.bf16 %v834_v62, %v833_v61  ;;  %v7305_v46 = vld [vmem:[%s11996_s9 + $0x54] ss:$8 sps:$4 sm:$0xff]   ;;  %v12011_v54 = vsub.s32 5, %v8029_v27  ;;  %v12008_v57 = vsub.s32 6, %v8029_v27  ;;  %v8159_v61 = vld [vmem:[%s11997_s8] ss:$0 sm:$0xff] }
 0x3cf   :  { %v841_v2 = vpack.c.bf16 %v832_v0, %v831_v63  ;;  %v8120_v53 = vrot.slane %v8040_v30, %v12010_v51  ;;  %v12009_v59 = vsub.s32 7, %v8029_v27 }
 0x3d0   :  { %1686 = vbcast.lane.b32.xlu0 %v8079_v41, 256  ;;  %v8131_v56 = vrot.slane %v8040_v30, %v12011_v54  ;;  %v8141_v58 = vrot.slane %v8040_v30, %v12008_v57 }
 0x3d1   :  { %7135 = vmatprep.subr.bf16.mxu0 %v841_v2  ;;  %1690 = vbcast.lane.b32.xlu1 %v8079_v41, 264  ;;  %v8153_v60 = vrot.slane %v8040_v30, %v12009_v59 }
 0x3d2   :  { %7136 = vmatpush3.bf16.msra.mxu0 %v841_v2 }
 0x3d3   :  { %7137 = vmatprep.subr.bf16.mxu0 %v842_v1 }
 0x3d4   :  { %1560 = vbcast.lane.b32.xlu0 %v8056_v35, 272 }
 0x3d5   :  { %1627 = vbcast.lane.b32.xlu1 %v8063_v37, 272 }
 0x3d6   :  { %7138 = vmatpush3.bf16.msra.mxu0 %v842_v1 }
 0x3d8   :  { %1753 = vbcast.lane.b32.xlu0 %v8102_v47, 256 }
 0x3d9   :  { %7140 = vmatmul.mubr.bf16.vlgmr.msra.gmra.mrb[32].mxu0 %v7874_v14  ;;  %1757 = vbcast.lane.b32.xlu1 %v8102_v47, 264 }
 0x3da   :  { %7143 = vmatprep.mubr.bf16.mxu0 %v7879_v15 }
 0x3dc   :  { %1694 = vbcast.lane.b32.xlu0 %v8079_v41, 272 }
 0x3dd   :  { %1820 = vbcast.lane.b32.xlu1 %v8120_v53, 256 }
 0x3e0   :  { %1824 = vbcast.lane.b32.xlu0 %v8120_v53, 264 }
 0x3e1   :  { %7144 = vmatmul.mubr.bf16.gmra.mrb[36].mxu0 %v7892_v18  ;;  %1564 = vbcast.lane.b32.xlu1 %v8056_v35, 280 }
 0x3e2   :  { %7147 = vmatprep.mubr.bf16.mxu0 %v7897_v19 }
 0x3e4   :  { %1631 = vbcast.lane.b32.xlu0 %v8063_v37, 280 }
 0x3e5   :  { %1761 = vbcast.lane.b32.xlu1 %v8102_v47, 272 }
 0x3e8   :  { %1887 = vbcast.lane.b32.xlu0 %v8131_v56, 256 }
 0x3e9   :  { %7148 = vmatmul.mubr.bf16.gmra.mrb[40].mxu0 %v7904_v20  ;;  %1891 = vbcast.lane.b32.xlu1 %v8131_v56, 264 }
 0x3ea   :  { %7151 = vmatprep.mubr.bf16.mxu0 %v7909_v21 }
 0x3ec   :  { %1698 = vbcast.lane.b32.xlu0 %v8079_v41, 280 }
 0x3ed   :  { %1828 = vbcast.lane.b32.xlu1 %v8120_v53, 272 }
 0x3f0   :  { %1954 = vbcast.lane.b32.xlu0 %v8141_v58, 256 }
 0x3f1   :  { %7152 = vmatmul.mubr.bf16.gmra.mrb[44].mxu0 %v7916_v22  ;;  %1958 = vbcast.lane.b32.xlu1 %v8141_v58, 264 }
 0x3f2   :  { %7203 = vmatprep.mubr.bf16.mxu0 %v7841_v4 }
 0x3f4   :  { %1568 = vbcast.lane.b32.xlu0 %v8056_v35, 288 }
 0x3f5   :  { %1635 = vbcast.lane.b32.xlu1 %v8063_v37, 288 }
 0x3f8   :  { %1765 = vbcast.lane.b32.xlu0 %v8102_v47, 280 }
 0x3f9   :  { %1895 = vbcast.lane.b32.xlu1 %v8131_v56, 272 }
 0x3fc   :  { %2021 = vbcast.lane.b32.xlu0 %v8153_v60, 256 }
 0x3fd   :  { %2025 = vbcast.lane.b32.xlu1 %v8153_v60, 264 }
 0x400   :  { %1702 = vbcast.lane.b32.xlu0 %v8079_v41, 288 }
 0x401   :  { %1832 = vbcast.lane.b32.xlu1 %v8120_v53, 280 }
 0x404   :  { %1962 = vbcast.lane.b32.xlu0 %v8141_v58, 272 }
 0x405   :  { %1572 = vbcast.lane.b32.xlu1 %v8056_v35, 296 }
 0x408   :  { %1639 = vbcast.lane.b32.xlu0 %v8063_v37, 296 }
 0x409   :  { %1769 = vbcast.lane.b32.xlu1 %v8102_v47, 288 }
 0x40c   :  { %1899 = vbcast.lane.b32.xlu0 %v8131_v56, 280 }
 0x40d   :  { %2029 = vbcast.lane.b32.xlu1 %v8153_v60, 272 }
 0x410   :  { %1706 = vbcast.lane.b32.xlu0 %v8079_v41, 296 }
 0x411   :  { %1836 = vbcast.lane.b32.xlu1 %v8120_v53, 288 }
 0x414   :  { %1966 = vbcast.lane.b32.xlu0 %v8141_v58, 280 }
 0x415   :  { %1576 = vbcast.lane.b32.xlu1 %v8056_v35, 304 }
 0x418   :  { %1643 = vbcast.lane.b32.xlu0 %v8063_v37, 304 }
 0x419   :  { %1773 = vbcast.lane.b32.xlu1 %v8102_v47, 296 }
 0x41c   :  { %1903 = vbcast.lane.b32.xlu0 %v8131_v56, 288 }
 0x41d   :  { %2033 = vbcast.lane.b32.xlu1 %v8153_v60, 280 }
 0x420   :  { %1710 = vbcast.lane.b32.xlu0 %v8079_v41, 304 }
 0x421   :  { %1840 = vbcast.lane.b32.xlu1 %v8120_v53, 296 }
 0x424   :  { %1970 = vbcast.lane.b32.xlu0 %v8141_v58, 288 }
 0x425   :  { %1580 = vbcast.lane.b32.xlu1 %v8056_v35, 312 }
 0x428   :  { %1647 = vbcast.lane.b32.xlu0 %v8063_v37, 312 }
 0x429   :  { %1777 = vbcast.lane.b32.xlu1 %v8102_v47, 304 }
 0x42c   :  { %1907 = vbcast.lane.b32.xlu0 %v8131_v56, 296 }
 0x42d   :  { %2037 = vbcast.lane.b32.xlu1 %v8153_v60, 288 }
 0x430   :  { %1714 = vbcast.lane.b32.xlu0 %v8079_v41, 312 }
 0x431   :  { %1844 = vbcast.lane.b32.xlu1 %v8120_v53, 304 }
 0x434   :  { %1974 = vbcast.lane.b32.xlu0 %v8141_v58, 296 }
 0x435   :  { %1584 = vbcast.lane.b32.xlu1 %v8056_v35, 320 }
 0x438   :  { %1651 = vbcast.lane.b32.xlu0 %v8063_v37, 320 }
 0x439   :  { %1781 = vbcast.lane.b32.xlu1 %v8102_v47, 312 }
 0x43c   :  { %1911 = vbcast.lane.b32.xlu0 %v8131_v56, 304 }
 0x43d   :  { %2041 = vbcast.lane.b32.xlu1 %v8153_v60, 296 }
 0x440   :  { %1718 = vbcast.lane.b32.xlu0 %v8079_v41, 320 }
 0x441   :  { %1848 = vbcast.lane.b32.xlu1 %v8120_v53, 312 }
 0x444   :  { %1978 = vbcast.lane.b32.xlu0 %v8141_v58, 304 }
 0x445   :  { %1588 = vbcast.lane.b32.xlu1 %v8056_v35, 328 }
 0x448   :  { %1655 = vbcast.lane.b32.xlu0 %v8063_v37, 328 }
 0x449   :  { %1785 = vbcast.lane.b32.xlu1 %v8102_v47, 320 }
 0x44c   :  { %1915 = vbcast.lane.b32.xlu0 %v8131_v56, 312 }
 0x44d   :  { %2045 = vbcast.lane.b32.xlu1 %v8153_v60, 304 }
 0x450   :  { %1722 = vbcast.lane.b32.xlu0 %v8079_v41, 328 }
 0x451   :  { %1852 = vbcast.lane.b32.xlu1 %v8120_v53, 320 }
 0x454   :  { %1982 = vbcast.lane.b32.xlu0 %v8141_v58, 312 }
 0x455   :  { %1592 = vbcast.lane.b32.xlu1 %v8056_v35, 336 }
 0x458   :  { %1659 = vbcast.lane.b32.xlu0 %v8063_v37, 336 }
 0x459   :  { %1789 = vbcast.lane.b32.xlu1 %v8102_v47, 328 }
 0x45c   :  { %1919 = vbcast.lane.b32.xlu0 %v8131_v56, 320 }
 0x45d   :  { %2049 = vbcast.lane.b32.xlu1 %v8153_v60, 312 }
 0x460   :  { %1726 = vbcast.lane.b32.xlu0 %v8079_v41, 336 }
 0x461   :  { %1856 = vbcast.lane.b32.xlu1 %v8120_v53, 328 }
 0x464   :  { %1986 = vbcast.lane.b32.xlu0 %v8141_v58, 320 }
 0x465   :  { %1596 = vbcast.lane.b32.xlu1 %v8056_v35, 344 }
 0x468   :  { %1663 = vbcast.lane.b32.xlu0 %v8063_v37, 344 }
 0x469   :  { %1793 = vbcast.lane.b32.xlu1 %v8102_v47, 336 }
 0x46c   :  { %1923 = vbcast.lane.b32.xlu0 %v8131_v56, 328 }
 0x46d   :  { %2053 = vbcast.lane.b32.xlu1 %v8153_v60, 320 }
 0x470   :  { %1730 = vbcast.lane.b32.xlu0 %v8079_v41, 344 }
 0x471   :  { %1860 = vbcast.lane.b32.xlu1 %v8120_v53, 336 }
 0x474   :  { %1990 = vbcast.lane.b32.xlu0 %v8141_v58, 328 }
 0x475   :  { %1600 = vbcast.lane.b32.xlu1 %v8056_v35, 352 }
 0x478   :  { %1667 = vbcast.lane.b32.xlu0 %v8063_v37, 352 }
 0x479   :  { %1797 = vbcast.lane.b32.xlu1 %v8102_v47, 344 }
 0x47c   :  { %1927 = vbcast.lane.b32.xlu0 %v8131_v56, 336 }
 0x47d   :  { %2057 = vbcast.lane.b32.xlu1 %v8153_v60, 328 }
 0x480   :  { %1734 = vbcast.lane.b32.xlu0 %v8079_v41, 352 }
 0x481   :  { %1864 = vbcast.lane.b32.xlu1 %v8120_v53, 344 }
 0x484   :  { %1994 = vbcast.lane.b32.xlu0 %v8141_v58, 336 }
 0x485   :  { %1604 = vbcast.lane.b32.xlu1 %v8056_v35, 360 }
 0x488   :  { %1671 = vbcast.lane.b32.xlu0 %v8063_v37, 360 }
 0x489   :  { %1801 = vbcast.lane.b32.xlu1 %v8102_v47, 352 }
 0x4ac   :  { %v7141_v14 = vpop.f32.mrb[32].mxu0 }
 0x4ad   :  { %v893_v15 = vpop.f32.mrb[33].mxu0 }
 0x4ae   :  { %v7142_v3 = vpop.f32.mrb[34].mxu0 }
 0x4af   :  { %v957_v18 = vpack.c.bf16 %v7142_v3, %v7141_v14  ;;  %v896_v5 = vpop.f32.mrb[35].mxu0 }
 0x4b0   :  { %v956_v19 = vpack.c.bf16 %v896_v5, %v893_v15 }
 0x4b2   :  { %7171 = vmatprep.mubr.bf16.mxu1 %v956_v19 }
 0x4b3   :  { %7172 = vmatmul.mubr.bf16.vlgmr.msra.gmra.mrb[32].mxu1 %v957_v18 }
 0x4b4   :  { %v7145_v20 = vpop.f32.mrb[36].mxu0  ;;  %1386 = vmatpush1.bf16.msra.mxu1 %v7288_v28 }
 0x4b5   :  { %v909_v21 = vpop.f32.mrb[37].mxu0  ;;  %1387 = vmatprep.subr.bf16.mxu1 %v7293_v31 }
 0x4b6   :  { %v7146_v6 = vpop.f32.mrb[38].mxu0 }
 0x4b7   :  { %v959_v22 = vpack.c.bf16 %v7146_v6, %v7145_v20  ;;  %v912_v7 = vpop.f32.mrb[39].mxu0 }
 0x4b8   :  { %v958_v4 = vpack.c.bf16 %v912_v7, %v909_v21  ;;  %1388 = vmatpush1.bf16.msra.mxu1 %v7291_v34 }
 0x4b9   :  { %1389 = vmatprep.subr.bf16.mxu1 %v7296_v36 }
 0x4ba   :  { %7175 = vmatprep.mubr.bf16.mxu1 %v958_v4 }
 0x4bb   :  { %7176 = vmatmul.mubr.bf16.gmra.mrb[36].mxu1 %v959_v22 }
 0x4bc   :  { %v7149_v8 = vpop.f32.mrb[40].mxu0  ;;  %1390 = vmatpush1.bf16.msra.mxu1 %v7294_v39 }
 0x4bd   :  { %v925_v9 = vpop.f32.mrb[41].mxu0  ;;  %1391 = vmatprep.subr.bf16.mxu1 %v7299_v40 }
 0x4be   :  { %v7150_v55 = vpop.f32.mrb[42].mxu0 }
 0x4bf   :  { %v961_v10 = vpack.c.bf16 %v7150_v55, %v7149_v8  ;;  %v928_v11 = vpop.f32.mrb[43].mxu0 }
 0x4c0   :  { %v960_v12 = vpack.c.bf16 %v928_v11, %v925_v9  ;;  %1392 = vmatpush1.bf16.msra.mxu1 %v7297_v42 }
 0x4c1   :  { %1393 = vmatprep.subr.bf16.mxu1 %v7302_v43 }
 0x4c2   :  { %7179 = vmatprep.mubr.bf16.mxu1 %v960_v12 }
 0x4c3   :  { %7180 = vmatmul.mubr.bf16.gmra.mrb[40].mxu1 %v961_v10 }
 0x4c4   :  { %v7153_v13 = vpop.f32.mrb[44].mxu0  ;;  %1394 = vmatpush1.bf16.msra.mxu1 %v7300_v45 }
 0x4c5   :  { %v941_v16 = vpop.f32.mrb[45].mxu0  ;;  %1395 = vmatprep.subr.bf16.mxu1 %v7305_v46 }
 0x4c6   :  { %v7154_v17 = vpop.f32.mrb[46].mxu0 }
 0x4c7   :  { %v963_v23 = vpack.c.bf16 %v7154_v17, %v7153_v13  ;;  %v944_v24 = vpop.f32.mrb[47].mxu0 }
 0x4c8   :  { %v962_v25 = vpack.c.bf16 %v944_v24, %v941_v16  ;;  %1396 = vmatpush1.bf16.msra.mxu1 %v7303_v49 }
 0x4c9   :  { %1397 = vmatprep.subr.bf16.mxu1 %v7308_v50 }
 0x4ca   :  { %7183 = vmatprep.mubr.bf16.mxu1 %v962_v25 }
 0x4cb   :  { %7184 = vmatmul.mubr.bf16.gmra.mrb[44].mxu1 %v963_v23 }
 0x4cc   :  { %1398 = vmatpush1.bf16.msra.mxu1 %v7306_v52 }
 0x586   :  { %v7173_v62 = vpop.f32.mrb[32].mxu1 }
 0x587   :  { %v1062_v63 = vadd.f32 %v7173_v62, %v8159_v61  ;;  %v1053_v0 = vpop.f32.mrb[33].mxu1 }
 0x588   :  { %v1054_v1 = vadd.f32 %v8159_v61, %v1053_v0  ;;  %v7174_v2 = vpop.f32.mrb[34].mxu1 }
 0x589   :  { %v1134_v48 = vmul.f32 0.01, %v1062_v63  ;;  %v1065_v14 = vadd.f32 %v7174_v2, %v8159_v61  ;;  %v1056_v15 = vpop.f32.mrb[35].mxu1  ;;  %vm1118_vm0 = vcmp.gt.f32.partialorder %v1062_v63, 0.0 }
 0x58a   :  { %v1132_v3 = vmul.f32 0.01, %v1054_v1  ;;  %v1057_v18 = vadd.f32 %v8159_v61, %v1056_v15  ;;  %vm1116_vm1 = vcmp.gt.f32.partialorder %v1054_v1, 0.0 }
 0x58b   :  { %vm1119_vm2 = vcmp.gt.f32.partialorder %v1065_v14, 0.0  ;;  %v1135_v5 = vmul.f32 0.01, %v1065_v14  ;;  %v1150_v20 = vsel %vm1118_vm0, %v1062_v63, %v1134_v48 }
 0x58c   :  { %vm1117_vm3 = vcmp.gt.f32.partialorder %v1057_v18, 0.0  ;;  %v1133_v19 = vmul.f32 0.01, %v1057_v18  ;;  %v1148_v22 = vsel %vm1116_vm1, %v1054_v1, %v1132_v3 }
 0x58d   :  { %v1151_v21 = vsel %vm1119_vm2, %v1065_v14, %v1135_v5 }
 0x58e   :  { %v7177_v6 = vpop.f32.mrb[36].mxu1  ;;  %v1149_v7 = vsel %vm1117_vm3, %v1057_v18, %v1133_v19  ;;  %v1165_v4 = vpack.c.bf16 %v1151_v21, %v1150_v20 }
 0x58f   :  { %v1078_v8 = vadd.f32 %v7177_v6, %v8159_v61  ;;  %v1069_v9 = vpop.f32.mrb[37].mxu1  ;;  %v1164_v55 = vpack.c.bf16 %v1149_v7, %v1148_v22 }
 0x590   :  { %v1070_v10 = vadd.f32 %v8159_v61, %v1069_v9  ;;  %v7178_v11 = vpop.f32.mrb[38].mxu1 }
 0x591   :  { %v1138_v12 = vmul.f32 0.01, %v1078_v8  ;;  %v1081_v13 = vadd.f32 %v7178_v11, %v8159_v61  ;;  %v1072_v16 = vpop.f32.mrb[39].mxu1  ;;  %7187 = vmatprep.subr.bf16.mxu0 %v1164_v55  ;;  %vm1122_vm4 = vcmp.gt.f32.partialorder %v1078_v8, 0.0 }
 0x592   :  { %v1136_v17 = vmul.f32 0.01, %v1070_v10  ;;  %v1073_v23 = vadd.f32 %v8159_v61, %v1072_v16  ;;  %7188 = vmatpush3.bf16.msra.mxu0 %v1164_v55  ;;  %vm1120_vm5 = vcmp.gt.f32.partialorder %v1070_v10, 0.0 }
 0x593   :  { %vm1123_vm6 = vcmp.gt.f32.partialorder %v1081_v13, 0.0  ;;  %v1139_v24 = vmul.f32 0.01, %v1081_v13  ;;  %7189 = vmatprep.subr.bf16.mxu0 %v1165_v4  ;;  %v1154_v26 = vsel %vm1122_vm4, %v1078_v8, %v1138_v12 }
 0x594   :  { %vm1121_vm7 = vcmp.gt.f32.partialorder %v1073_v23, 0.0  ;;  %v1137_v25 = vmul.f32 0.01, %v1073_v23  ;;  %v1152_v31 = vsel %vm1120_vm5, %v1070_v10, %v1136_v17  ;;  %v7728_v17 = vld [vmem:[%s12171_s20 + $0x8] sm:$0xff]  }
 0x595   :  { %v1155_v28 = vsel %vm1123_vm6, %v1081_v13, %v1139_v24  ;;  %v7730_v24 = vld [vmem:[%s12171_s20 + $0x18] sm:$0xff]  }
 0x596   :  { %v7181_v29 = vpop.f32.mrb[40].mxu1  ;;  %7190 = vmatpush3.bf16.msra.mxu0 %v1165_v4  ;;  %v1153_v34 = vsel %vm1121_vm7, %v1073_v23, %v1137_v25  ;;  %v1167_v36 = vpack.c.bf16 %v1155_v28, %v1154_v26  ;;  %v7729_v23 = vld [vmem:[%s12171_s20 + $0x10] sm:$0xff]   ;;  %v7731_v25 = vld [vmem:[%s12171_s20 + $0x20] sm:$0xff]   ;;  %v7732_v26 = vld [vmem:[%s12171_s20 + $0x28] sm:$0xff]  }
 0x597   :  { %v1094_v39 = vadd.f32 %v7181_v29, %v8159_v61  ;;  %v1085_v40 = vpop.f32.mrb[41].mxu1  ;;  %v1166_v42 = vpack.c.bf16 %v1153_v34, %v1152_v31  ;;  %v7733_v28 = vld [vmem:[%s12171_s20 + $0x30] sm:$0xff]   ;;  %v7734_v29 = vld [vmem:[%s12171_s20 + $0x38] sm:$0xff]   ;;  %v8259_v31 = vpop.permute.xlu0 %1552  ;;  %1931 = vbcast.lane.b32.xlu0 %v8131_v56, 344 }
 0x598   :  { %v1086_v43 = vadd.f32 %v8159_v61, %v1085_v40  ;;  %v7182_v45 = vpop.f32.mrb[42].mxu1  ;;  %vm2083_vm0 = vcmp.gt.f32.partialorder %v8259_v31, 0.0 }
 0x599   :  { %v1142_v46 = vmul.f32 0.01, %v1094_v39  ;;  %v1097_v49 = vadd.f32 %v7182_v45, %v8159_v61  ;;  %v1088_v50 = vpop.f32.mrb[43].mxu1  ;;  %7191 = vmatprep.subr.bf16.mxu0 %v1166_v42  ;;  %vm1126_vm8 = vcmp.gt.f32.partialorder %v1094_v39, 0.0 }
 0x59a   :  { %v1140_v52 = vmul.f32 0.01, %v1086_v43  ;;  %v1089_v62 = vadd.f32 %v8159_v61, %v1088_v50  ;;  %7192 = vmatpush3.bf16.msra.mxu0 %v1166_v42  ;;  %vm1124_vm9 = vcmp.gt.f32.partialorder %v1086_v43, 0.0  ;;  %v7735_v42 = vmov 0  }
 0x59b   :  { %vm1127_vm10 = vcmp.gt.f32.partialorder %v1097_v49, 0.0  ;;  %v1143_v63 = vmul.f32 0.01, %v1097_v49  ;;  %7193 = vmatprep.subr.bf16.mxu0 %v1167_v36  ;;  %v1158_v1 = vsel %vm1126_vm8, %v1094_v39, %v1142_v46  ;;  %v8264_v34 = vpop.permute.xlu0 %1556  ;;  %v7309_v39 = vld [vmem:[%s11996_s9 + $0x70] ss:$8 sps:$4 sm:$0xff]   ;;  %1417 = vmatprep.mubr.bf16.mxu1 %v7735_v42 }
 0x59c   :  { %vm1125_vm11 = vcmp.gt.f32.partialorder %v1089_v62, 0.0  ;;  %v1141_v0 = vmul.f32 0.01, %v1089_v62  ;;  %v1156_v14 = vsel %vm1124_vm9, %v1086_v43, %v1140_v52  ;;  %1738 = vbcast.lane.b32.xlu0 %v8079_v41, 360  ;;  %vm2084_vm1 = vcmp.gt.f32.partialorder %v8264_v34, 0.0 }
 0x59d   :  { %v1159_v2 = vsel %vm1127_vm10, %v1097_v49, %v1143_v63  ;;  %v8291_v49 = vpop.permute.xlu1 %1619  ;;  %2061 = vbcast.lane.b32.xlu1 %v8153_v60, 336 }
 0x59e   :  { %v7185_v48 = vpop.f32.mrb[44].mxu1  ;;  %7194 = vmatpush3.bf16.msra.mxu0 %v1167_v36  ;;  %v1157_v15 = vsel %vm1125_vm11, %v1089_v62, %v1141_v0  ;;  %v1169_v3 = vpack.c.bf16 %v1159_v2, %v1158_v1  ;;  %v7311_v36 = vld [vmem:[%s11996_s9 + $0x74] ss:$8 sps:$4 sm:$0xff]   ;;  %vm2099_vm5 = vcmp.gt.f32.partialorder %v8291_v49, 0.0 }
 0x59f   :  { %v1110_v18 = vadd.f32 %v7185_v48, %v8159_v61  ;;  %v1101_v5 = vpop.f32.mrb[45].mxu1  ;;  %v1168_v19 = vpack.c.bf16 %v1157_v15, %v1156_v14  ;;  %1399 = vmatprep.subr.bf16.mxu1 %v7311_v36  ;;  %v8274_v40 = vpop.permute.xlu0 %1686 }
 0x5a0   :  { %v1102_v20 = vadd.f32 %v8159_v61, %v1101_v5  ;;  %v7186_v21 = vpop.f32.mrb[46].mxu1  ;;  %1400 = vmatpush1.bf16.msra.mxu1 %v7309_v39  ;;  %1998 = vbcast.lane.b32.xlu0 %v8141_v58, 344  ;;  %vm2115_vm2 = vcmp.gt.f32.partialorder %v8274_v40, 0.0 }
 0x5a1   :  { %v1146_v6 = vmul.f32 0.01, %v1110_v18  ;;  %v1113_v22 = vadd.f32 %v7186_v21, %v8159_v61  ;;  %v1104_v7 = vpop.f32.mrb[47].mxu1  ;;  %7195 = vmatprep.subr.bf16.mxu0 %v1168_v19  ;;  %vm1130_vm12 = vcmp.gt.f32.partialorder %v1110_v18, 0.0  ;;  %v8298_v52 = vpop.permute.xlu1 %1623  ;;  %1868 = vbcast.lane.b32.xlu1 %v8120_v53, 352 }
 0x5a2   :  { %v1144_v4 = vmul.f32 0.01, %v1102_v20  ;;  %v1105_v8 = vadd.f32 %v8159_v61, %v1104_v7  ;;  %7196 = vmatpush3.bf16.msra.mxu0 %v1168_v19  ;;  %vm1128_vm13 = vcmp.gt.f32.partialorder %v1102_v20, 0.0  ;;  %vm2100_vm7 = vcmp.gt.f32.partialorder %v8298_v52, 0.0 }
 0x5a3   :  { %vm1131_vm14 = vcmp.gt.f32.partialorder %v1113_v22, 0.0  ;;  %v1147_v9 = vmul.f32 0.01, %v1113_v22  ;;  %7197 = vmatprep.subr.bf16.mxu0 %v1169_v3  ;;  %v1162_v10 = vsel %vm1130_vm12, %v1110_v18, %v1146_v6  ;;  %v8279_v43 = vpop.permute.xlu0 %1560 }
 0x5a4   :  { %vm1129_vm15 = vcmp.gt.f32.partialorder %v1105_v8, 0.0  ;;  %v1145_v55 = vmul.f32 0.01, %v1105_v8  ;;  %v1160_v12 = vsel %vm1128_vm13, %v1102_v20, %v1144_v4  ;;  %1675 = vbcast.lane.b32.xlu0 %v8063_v37, 368 }
 0x5a5   :  { %v1163_v11 = vsel %vm1131_vm14, %v1113_v22, %v1147_v9  ;;  %v8304_v63 = vpop.permute.xlu1 %1690  ;;  %1608 = vbcast.lane.b32.xlu1 %v8056_v35, 368 }
 0x5a6   :  { %7198 = vmatpush3.bf16.msra.mxu0 %v1169_v3  ;;  %v1161_v13 = vsel %vm1129_vm15, %v1105_v8, %v1145_v55  ;;  %v1171_v16 = vpack.c.bf16 %v1163_v11, %v1162_v10  ;;  %vm2116_vm8 = vcmp.gt.f32.partialorder %v8304_v63, 0.0 }
 0x5a7   :  { %v1170_v61 = vpack.c.bf16 %v1161_v13, %v1160_v12  ;;  %v8283_v45 = vpop.permute.xlu0 %1753 }
 0x5a8   :  { %1935 = vbcast.lane.b32.xlu0 %v8131_v56, 352  ;;  %vm2131_vm3 = vcmp.gt.f32.partialorder %v8283_v45, 0.0 }
 0x5a9   :  { %7199 = vmatprep.subr.bf16.mxu0 %v1170_v61  ;;  %v8310_v1 = vpop.permute.xlu1 %1627  ;;  %1805 = vbcast.lane.b32.xlu1 %v8102_v47, 360 }
 0x5aa   :  { %7200 = vmatpush3.bf16.msra.mxu0 %v1170_v61 }
 0x5ab   :  { %7201 = vmatprep.subr.bf16.mxu0 %v1171_v16  ;;  %v8288_v46 = vpop.permute.xlu0 %1694 }
 0x5ac   :  { %1742 = vbcast.lane.b32.xlu0 %v8079_v41, 368 }
 0x5ad   :  { %v8314_v2 = vpop.permute.xlu1 %1757  ;;  %2065 = vbcast.lane.b32.xlu1 %v8153_v60, 344 }
 0x5ae   :  { %7202 = vmatpush3.bf16.msra.mxu0 %v1171_v16  ;;  %vm2132_vm10 = vcmp.gt.f32.partialorder %v8314_v2, 0.0 }
 0x5af   :  { %v8294_v50 = vpop.permute.xlu0 %1824 }
 0x5b0   :  { %2002 = vbcast.lane.b32.xlu0 %v8141_v58, 352  ;;  %vm2148_vm4 = vcmp.gt.f32.partialorder %v8294_v50, 0.0 }
 0x5b1   :  { %7204 = vmatmul.mubr.bf16.vlgmr.msra.gmra.mrb[48].mxu0 %v7728_v17  ;;  %v8320_v14 = vpop.permute.xlu1 %1820  ;;  %1872 = vbcast.lane.b32.xlu1 %v8120_v53, 360 }
 0x5b2   :  { %7207 = vmatprep.mubr.bf16.mxu0 %v7729_v23  ;;  %vm2147_vm11 = vcmp.gt.f32.partialorder %v8320_v14, 0.0 }
 0x5b3   :  { %v8301_v62 = vpop.permute.xlu0 %1631 }
 0x5b4   :  { %1679 = vbcast.lane.b32.xlu0 %v8063_v37, 376 }
 0x5b5   :  { %v8326_v3 = vpop.permute.xlu1 %1564  ;;  %1612 = vbcast.lane.b32.xlu1 %v8056_v35, 376 }
 0x5b7   :  { %v8307_v0 = vpop.permute.xlu0 %1887 }
 0x5b8   :  { %1939 = vbcast.lane.b32.xlu0 %v8131_v56, 360  ;;  %vm2163_vm6 = vcmp.gt.f32.partialorder %v8307_v0, 0.0 }
 0x5b9   :  { %7208 = vmatmul.mubr.bf16.gmra.mrb[52].mxu0 %v7730_v24  ;;  %v8330_v18 = vpop.permute.xlu1 %1761  ;;  %1809 = vbcast.lane.b32.xlu1 %v8102_v47, 368 }
 0x5ba   :  { %7211 = vmatprep.mubr.bf16.mxu0 %v7731_v25 }
 0x5bb   :  { %v8317_v48 = vpop.permute.xlu0 %1698 }
 0x5bc   :  { %1746 = vbcast.lane.b32.xlu0 %v8079_v41, 376 }
 0x5bd   :  { %v8336_v37 = vpop.permute.xlu1 %1891  ;;  %2069 = vbcast.lane.b32.xlu1 %v8153_v60, 352 }
 0x5be   :  { %vm2164_vm12 = vcmp.gt.f32.partialorder %v8336_v37, 0.0 }
 0x5bf   :  { %v8323_v15 = vpop.permute.xlu0 %1954 }
 0x5c0   :  { %2006 = vbcast.lane.b32.xlu0 %v8141_v58, 360  ;;  %vm2179_vm9 = vcmp.gt.f32.partialorder %v8323_v15, 0.0 }
 0x5c1   :  { %7212 = vmatmul.mubr.bf16.gmra.mrb[56].mxu0 %v7732_v26  ;;  %v8342_v20 = vpop.permute.xlu1 %1828  ;;  %1876 = vbcast.lane.b32.xlu1 %v8120_v53, 368 }
 0x5c2   :  { %7215 = vmatprep.mubr.bf16.mxu0 %v7733_v28 }
 0x5c3   :  { %v8333_v5 = vpop.permute.xlu0 %1568 }
 0x5c4   :  { %1943 = vbcast.lane.b32.xlu0 %v8131_v56, 368 }
 0x5c5   :  { %v8346_v35 = vpop.permute.xlu1 %1958  ;;  %1813 = vbcast.lane.b32.xlu1 %v8102_v47, 376 }
 0x5c6   :  { %vm2180_vm13 = vcmp.gt.f32.partialorder %v8346_v35, 0.0 }
 0x5c7   :  { %v8339_v19 = vpop.permute.xlu0 %1765 }
 0x5c8   :  { %1880 = vbcast.lane.b32.xlu0 %v8120_v53, 376 }
 0x5c9   :  { %7216 = vmatmul.mubr.bf16.gmra.mrb[60].mxu0 %v7734_v29  ;;  %v8352_v21 = vpop.permute.xlu1 %1635  ;;  %2073 = vbcast.lane.b32.xlu1 %v8153_v60, 360 }
 0x5cb   :  { %v8349_v41 = vpop.permute.xlu0 %2021 }
 0x5cc   :  { %1947 = vbcast.lane.b32.xlu0 %v8131_v56, 376  ;;  %vm2195_vm14 = vcmp.gt.f32.partialorder %v8349_v41, 0.0 }
 0x5cd   :  { %v8358_v22 = vpop.permute.xlu1 %1895  ;;  %2010 = vbcast.lane.b32.xlu1 %v8141_v58, 368 }
 0x5cf   :  { %v8355_v6 = vpop.permute.xlu0 %1702 }
 0x5d0   :  { %2014 = vbcast.lane.b32.xlu0 %v8141_v58, 376 }
 0x5d1   :  { %v8361_v53 = vpop.permute.xlu1 %2025  ;;  %2077 = vbcast.lane.b32.xlu1 %v8153_v60, 368 }
 0x5d2   :  { %vm2196_vm15 = vcmp.gt.f32.partialorder %v8361_v53, 0.0 }
 0x5d3   :  { %v8367_v56 = vpop.permute.xlu0 %1962 }
 0x5d5   :  { %v8364_v47 = vpop.permute.xlu1 %1832  ;;  %2081 = vbcast.lane.b32.xlu1 %v8153_v60, 376 }
 0x5ef   :  { %3059 = vmax.xlane.f32.xlu0 %v8040_v30 }
 0x684   :  { %v7205_v7 = vpop.f32.mrb[48].mxu0 }
 0x685   :  { %v1222_v4 = vpop.f32.mrb[49].mxu0 }
 0x686   :  { %v7206_v8 = vpop.f32.mrb[50].mxu0 }
 0x687   :  { %v1286_v9 = vpack.c.bf16 %v7206_v8, %v7205_v7  ;;  %v1225_v55 = vpop.f32.mrb[51].mxu0 }
 0x688   :  { %v1285_v10 = vpack.c.bf16 %v1225_v55, %v1222_v4  ;;  %v8374_v4 = vpop.permute.xlu1 %1572 }
 0x68a   :  { %1418 = vmatmul.mubr.bf16.vlgmr.msra.gmra.mrb[48].mxu1 %v1285_v10 }
 0x68b   :  { %1427 = vmatprep.mubr.bf16.mxu1 %v7735_v42 }
 0x68c   :  { %v7209_v58 = vpop.f32.mrb[52].mxu0  ;;  %v8377_v8 = vpop.permute.xlu1 %1769 }
 0x68d   :  { %v1238_v11 = vpop.f32.mrb[53].mxu0  ;;  %12177 = vst [vmem:[#allocation7_spill] sm:$0xff] %v8377_v8 }
 0x68e   :  { %v7210_v12 = vpop.f32.mrb[54].mxu0 }
 0x68f   :  { %v1288_v13 = vpack.c.bf16 %v7210_v12, %v7209_v58  ;;  %v1241_v16 = vpop.f32.mrb[55].mxu0 }
 0x690   :  { %v1287_v61 = vpack.c.bf16 %v1241_v16, %v1238_v11  ;;  %v8389_v11 = vpop.permute.xlu0 %1639 }
 0x692   :  { %1428 = vmatmul.mubr.bf16.gmra.mrb[52].mxu1 %v1286_v9  ;;  %v8380_v9 = vpop.permute.xlu1 %2029 }
 0x693   :  { %1437 = vmatprep.mubr.bf16.mxu1 %v7735_v42  ;;  %12178 = vst [vmem:[#allocation8_spill] sm:$0xff] %v8380_v9  ;;  %v3111_v9 = vld [vmem:[%s11998_s11 + $0x20] sm:$0xff] }
 0x694   :  { %v7213_v60 = vpop.f32.mrb[56].mxu0 }
 0x695   :  { %v1254_v30 = vpop.f32.mrb[57].mxu0 }
 0x696   :  { %v7214_v17 = vpop.f32.mrb[58].mxu0  ;;  %v8383_v55 = vpop.permute.xlu1 %1836 }
 0x697   :  { %v1290_v23 = vpack.c.bf16 %v7214_v17, %v7213_v60  ;;  %v1257_v24 = vpop.f32.mrb[59].mxu0  ;;  %12179 = vst [vmem:[#allocation9_spill] sm:$0xff] %v8383_v55 }
 0x698   :  { %v1289_v25 = vpack.c.bf16 %v1257_v24, %v1254_v30 }
 0x69a   :  { %1438 = vmatmul.mubr.bf16.gmra.mrb[56].mxu1 %v1287_v61  ;;  %v8385_v10 = vpop.permute.xlu1 %1576 }
 0x69b   :  { %1447 = vmatprep.mubr.bf16.mxu1 %v7735_v42  ;;  %12180 = vst [vmem:[#allocation10_spill] sm:$0xff] %v8385_v10  ;;  %v3172_v10 = vld [vmem:[%s11998_s11 + $0x208] sm:$0xff] }
 0x69c   :  { %v7217_v26 = vpop.f32.mrb[60].mxu0 }
 0x69d   :  { %v1270_v28 = vpop.f32.mrb[61].mxu0 }
 0x69e   :  { %v7218_v29 = vpop.f32.mrb[62].mxu0  ;;  %v8387_v58 = vpop.permute.xlu1 %1773 }
 0x69f   :  { %v1292_v36 = vpack.c.bf16 %v7218_v29, %v7217_v26  ;;  %v1273_v39 = vpop.f32.mrb[63].mxu0  ;;  %12181 = vst [vmem:[#allocation11_spill] sm:$0xff] %v8387_v58 }
 0x6a0   :  { %v1291_v7 = vpack.c.bf16 %v1273_v39, %v1270_v28 }
 0x6a2   :  { %1448 = vmatmul.mubr.bf16.gmra.mrb[60].mxu1 %v1288_v13  ;;  %v8391_v12 = vpop.permute.xlu1 %2033  ;;  %v8393_v13 = vpop.permute.xlu0 %1899 }
 0x6a3   :  { %1457 = vmatprep.mubr.bf16.mxu1 %v7735_v42  ;;  %12182 = vst [vmem:[#allocation12_spill] sm:$0xff] %v8391_v12 }
 0x6a6   :  { %v8395_v16 = vpop.permute.xlu1 %1840  ;;  %v8397_v61 = vpop.permute.xlu0 %1706 }
 0x6a7   :  { %12183 = vst [vmem:[#allocation13_spill] sm:$0xff] %v8395_v16 }
 0x6aa   :  { %1458 = vmatmul.mubr.bf16.gmra.mrb[64].mxu1 %v1289_v25  ;;  %v8399_v60 = vpop.permute.xlu1 %1580 }
 0x6ab   :  { %1467 = vmatprep.mubr.bf16.mxu1 %v7735_v42  ;;  %12184 = vst [vmem:[#allocation14_spill] sm:$0xff] %v8399_v60 }
 0x6ae   :  { %v8403_v30 = vpop.permute.xlu1 %1777 }
 0x6af   :  { %12185 = vst [vmem:[#allocation15_spill] sm:$0xff] %v8403_v30 }
 0x6b2   :  { %1468 = vmatmul.mubr.bf16.gmra.mrb[68].mxu1 %v1290_v23  ;;  %v8407_v23 = vpop.permute.xlu1 %2037 }
 0x6b3   :  { %1477 = vmatprep.mubr.bf16.mxu1 %v7735_v42  ;;  %12187 = vst [vmem:[#allocation17_spill] sm:$0xff] %v8407_v23 }
 0x6b6   :  { %v8411_v25 = vpop.permute.xlu1 %1844 }
 0x6b7   :  { %12189 = vst [vmem:[#allocation19_spill] sm:$0xff] %v8411_v25  ;;  %v3119_v25 = vld [vmem:[%s11998_s11 + $0x60] sm:$0xff] }
 0x6ba   :  { %1478 = vmatmul.mubr.bf16.gmra.mrb[72].mxu1 %v1291_v7  ;;  %v8415_v28 = vpop.permute.xlu1 %1584 }
 0x6bb   :  { %1487 = vmatprep.mubr.bf16.mxu1 %v7735_v42  ;;  %v8401_v42 = vpop.permute.xlu0 %1966  ;;  %12191 = vst [vmem:[#allocation21_spill] sm:$0xff] %v8415_v28 }
 0x6bf   :  { %v8405_v17 = vpop.permute.xlu0 %1643 }
 0x6c0   :  { %12186 = vst [vmem:[#allocation16_spill] sm:$0xff] %v8405_v17  ;;  %v3176_v17 = vld [vmem:[%s11998_s11 + $0x228] sm:$0xff] }
 0x6c2   :  { %1488 = vmatmul.mubr.bf16.gmra.mrb[76].mxu1 %v1292_v36  ;;  %v8419_v36 = vpop.permute.xlu1 %1781 }
 0x6c3   :  { %v8409_v24 = vpop.permute.xlu0 %1903  ;;  %12193 = vst [vmem:[#allocation23_spill] sm:$0xff] %v8419_v36  ;;  %v3115_v36 = vld [vmem:[%s11998_s11 + $0x40] sm:$0xff] }
 0x6c4   :  { %12188 = vst [vmem:[#allocation18_spill] sm:$0xff] %v8409_v24  ;;  %v6407_v30 = vcombine.high %v3115_v36, %v3119_v25 }
 0x6c6   :  { %v8423_v7 = vpop.permute.xlu1 %2041 }
 0x6c7   :  { %v8413_v26 = vpop.permute.xlu0 %1710  ;;  %12195 = vst [vmem:[#allocation25_spill] sm:$0xff] %v8423_v7  ;;  %v3107_v7 = vld [vmem:[%s11998_s11] sm:$0xff] }
 0x6c8   :  { %12190 = vst [vmem:[#allocation20_spill] sm:$0xff] %v8413_v26 }
 0x6ca   :  { %v8427_v59 = vpop.permute.xlu1 %1848 }
 0x6cb   :  { %v8417_v29 = vpop.permute.xlu0 %1970  ;;  %12197 = vst [vmem:[#allocation27_spill] sm:$0xff] %v8427_v59 }
 0x6cc   :  { %12192 = vst [vmem:[#allocation22_spill] sm:$0xff] %v8417_v29 }
 0x6ce   :  { %v8431_v54 = vpop.permute.xlu1 %1588 }
 0x6cf   :  { %v8421_v39 = vpop.permute.xlu0 %1647  ;;  %12199 = vst [vmem:[#allocation29_spill] sm:$0xff] %v8431_v54  ;;  %v3108_v54 = vld [vmem:[%s11998_s11 + $0x8] sm:$0xff] }
 0x6d0   :  { %12194 = vst [vmem:[#allocation24_spill] sm:$0xff] %v8421_v39 }
 0x6d2   :  { %v8435_v38 = vpop.permute.xlu1 %1785 }
 0x6d3   :  { %v8425_v57 = vpop.permute.xlu0 %1907  ;;  %12201 = vst [vmem:[#allocation31_spill] sm:$0xff] %v8435_v38  ;;  %v6399_v38 = vcombine.high %v3107_v7, %v3111_v9 }
 0x6d4   :  { %12196 = vst [vmem:[#allocation26_spill] sm:$0xff] %v8425_v57 }
 0x6d5   :  { %3917 = vmatprep.subr.bf16.mxu0 %v6399_v38  ;;  %v3120_v38 = vld [vmem:[%s11998_s11 + $0x68] sm:$0xff] }
 0x6d6   :  { %v8439_v23 = vpop.permute.xlu1 %2045 }
 0x6d7   :  { %v8429_v51 = vpop.permute.xlu0 %1714  ;;  %12203 = vst [vmem:[#allocation33_spill] sm:$0xff] %v8439_v23  ;;  %v3112_v23 = vld [vmem:[%s11998_s11 + $0x28] sm:$0xff] }
 0x6d8   :  { %12198 = vst [vmem:[#allocation28_spill] sm:$0xff] %v8429_v51  ;;  %v6400_v59 = vcombine.low %v3108_v54, %v3112_v23 }
 0x6da   :  { %v8452_v28 = vpop.permute.xlu1 %1852 }
 0x6db   :  { %v8433_v27 = vpop.permute.xlu0 %1974  ;;  %12205 = vst [vmem:[#allocation35_spill] sm:$0xff] %v8452_v28  ;;  %v3116_v28 = vld [vmem:[%s11998_s11 + $0x48] sm:$0xff] }
 0x6dc   :  { %12200 = vst [vmem:[#allocation30_spill] sm:$0xff] %v8433_v27 }
 0x6df   :  { %v8437_v44 = vpop.permute.xlu0 %1651 }
 0x6e0   :  { %12202 = vst [vmem:[#allocation32_spill] sm:$0xff] %v8437_v44  ;;  %v6398_v44 = vcombine.low %v3107_v7, %v3111_v9  ;;  %v6408_v9 = vcombine.low %v3116_v28, %v3120_v38 }
 0x6e2   :  { %3918 = vmatpush1.bf16.msra.mxu0 %v6398_v44  ;;  %v6406_v44 = vcombine.low %v3115_v36, %v3119_v25  ;;  %v3127_v25 = vld [vmem:[%s11998_s11 + $0xa0] sm:$0xff]  ;;  %v3128_v36 = vld [vmem:[%s11998_s11 + $0xa8] sm:$0xff] }
 0x6e3   :  { %v8441_v12 = vpop.permute.xlu0 %1911  ;;  %3919 = vmatprep.subr.bf16.mxu0 %v6407_v30 }
 0x6e4   :  { %12204 = vst [vmem:[#allocation34_spill] sm:$0xff] %v8441_v12  ;;  %v6401_v12 = vcombine.high %v3108_v54, %v3112_v23  ;;  %v8471_v23 = vpop.permute.xlu1 %1592 }
 0x6e5   :  { %12207 = vst [vmem:[#allocation37_spill] sm:$0xff] %v8471_v23  ;;  %v3131_v23 = vld [vmem:[%s11998_s11 + $0xc0] sm:$0xff] }
 0x6e6   :  { %3958 = vmatprep.subr.bf16.mxu1 %v6401_v12  ;;  %v6409_v12 = vcombine.high %v3116_v28, %v3120_v38  ;;  %3920 = vmatpush1.bf16.msra.mxu0 %v6406_v44  ;;  %v3124_v28 = vld [vmem:[%s11998_s11 + $0x88] sm:$0xff] }
 0x6e7   :  { %3959 = vmatpush1.bf16.msra.mxu1 %v6400_v59  ;;  %v8469_v54 = vpop.permute.xlu0 %1718  ;;  %v3123_v59 = vld [vmem:[%s11998_s11 + $0x80] sm:$0xff]  ;;  %v6416_v44 = vcombine.low %v3124_v28, %v3128_v36 }
 0x6e8   :  { %12206 = vst [vmem:[#allocation36_spill] sm:$0xff] %v8469_v54  ;;  %3960 = vmatprep.subr.bf16.mxu1 %v6409_v12  ;;  %v8475_v51 = vpop.permute.xlu1 %1789  ;;  %v6415_v30 = vcombine.high %v3123_v59, %v3127_v25  ;;  %v6414_v38 = vcombine.low %v3123_v59, %v3127_v25  ;;  %v3132_v54 = vld [vmem:[%s11998_s11 + $0xc8] sm:$0xff] }
 0x6e9   :  { %12209 = vst [vmem:[#allocation39_spill] sm:$0xff] %v8475_v51  ;;  %v3135_v51 = vld [vmem:[%s11998_s11 + $0xe0] sm:$0xff] }
 0x6ea   :  { %3921 = vmatprep.subr.bf16.mxu0 %v6415_v30  ;;  %v6423_v25 = vcombine.high %v3131_v23, %v3135_v51  ;;  %v6422_v30 = vcombine.low %v3131_v23, %v3135_v51  ;;  %v3140_v51 = vld [vmem:[%s11998_s11 + $0x108] sm:$0xff] }
 0x6eb   :  { %3961 = vmatpush1.bf16.msra.mxu1 %v6408_v9  ;;  %v8473_v7 = vpop.permute.xlu0 %1978  ;;  %v6417_v9 = vcombine.high %v3124_v28, %v3128_v36  ;;  %3922 = vmatpush1.bf16.msra.mxu0 %v6414_v38  ;;  %v3136_v28 = vld [vmem:[%s11998_s11 + $0xe8] sm:$0xff] }
 0x6ec   :  { %12208 = vst [vmem:[#allocation38_spill] sm:$0xff] %v8473_v7  ;;  %v8500_v59 = vpop.permute.xlu1 %2049  ;;  %v6424_v36 = vcombine.low %v3132_v54, %v3136_v28  ;;  %v6425_v38 = vcombine.high %v3132_v54, %v3136_v28  ;;  %3923 = vmatprep.subr.bf16.mxu0 %v6423_v25  ;;  %v3144_v23 = vld [vmem:[%s11998_s11 + $0x128] sm:$0xff] }
 0x6ed   :  { %3962 = vmatprep.subr.bf16.mxu1 %v6417_v9  ;;  %12211 = vst [vmem:[#allocation41_spill] sm:$0xff] %v8500_v59  ;;  %v3143_v59 = vld [vmem:[%s11998_s11 + $0x120] sm:$0xff]  ;;  %v6432_v28 = vcombine.low %v3140_v51, %v3144_v23 }
 0x6ef   :  { %v8489_v12 = vpop.permute.xlu0 %1655  ;;  %3963 = vmatpush1.bf16.msra.mxu1 %v6416_v44  ;;  %3924 = vmatpush1.bf16.msra.mxu0 %v6422_v30  ;;  %v3139_v44 = vld [vmem:[%s11998_s11 + $0x100] sm:$0xff]  ;;  %v6433_v30 = vcombine.high %v3140_v51, %v3144_v23 }
 0x6f0   :  { %12210 = vst [vmem:[#allocation40_spill] sm:$0xff] %v8489_v12  ;;  %3964 = vmatprep.subr.bf16.mxu1 %v6425_v38  ;;  %v8507_v12 = vpop.permute.xlu1 %1856  ;;  %v6431_v54 = vcombine.high %v3139_v44, %v3143_v59  ;;  %v6430_v25 = vcombine.low %v3139_v44, %v3143_v59  ;;  %v3151_v38 = vld [vmem:[%s11998_s11 + $0x160] sm:$0xff]  ;;  %v3152_v44 = vld [vmem:[%s11998_s11 + $0x168] sm:$0xff] }
 0x6f1   :  { %12213 = vst [vmem:[#allocation43_spill] sm:$0xff] %v8507_v12  ;;  %v3148_v12 = vld [vmem:[%s11998_s11 + $0x148] sm:$0xff] }
 0x6f2   :  { %3925 = vmatprep.subr.bf16.mxu0 %v6431_v54  ;;  %v6440_v23 = vcombine.low %v3148_v12, %v3152_v44 }
 0x6f3   :  { %3965 = vmatpush1.bf16.msra.mxu1 %v6424_v36  ;;  %v8505_v9 = vpop.permute.xlu0 %1915  ;;  %3926 = vmatpush1.bf16.msra.mxu0 %v6430_v25  ;;  %v3147_v36 = vld [vmem:[%s11998_s11 + $0x140] sm:$0xff]  ;;  %v6441_v25 = vcombine.high %v3148_v12, %v3152_v44 }
 0x6f4   :  { %12212 = vst [vmem:[#allocation42_spill] sm:$0xff] %v8505_v9  ;;  %3966 = vmatprep.subr.bf16.mxu1 %v6433_v30  ;;  %v6439_v59 = vcombine.high %v3147_v36, %v3151_v38  ;;  %v8535_v51 = vpop.permute.xlu1 %1596  ;;  %v6438_v54 = vcombine.low %v3147_v36, %v3151_v38  ;;  %v3155_v44 = vld [vmem:[%s11998_s11 + $0x180] sm:$0xff] }
 0x6f5   :  { %12215 = vst [vmem:[#allocation45_spill] sm:$0xff] %v8535_v51 }
 0x6f6   :  { %3927 = vmatprep.subr.bf16.mxu0 %v6439_v59  ;;  %v1293_v59 = vld [vmem:[%s11999_s10] sm:$0x3] }
 0x6f7   :  { %v8530_v7 = vpop.permute.xlu0 %1722  ;;  %3967 = vmatpush1.bf16.msra.mxu1 %v6432_v28  ;;  %3928 = vmatpush1.bf16.msra.mxu0 %v6438_v54  ;;  %v3159_v54 = vld [vmem:[%s11998_s11 + $0x1a0] sm:$0xff] }
 0x6f8   :  { %12214 = vst [vmem:[#allocation44_spill] sm:$0xff] %v8530_v7  ;;  %3968 = vmatprep.subr.bf16.mxu1 %v6441_v25  ;;  %v8539_v9 = vpop.permute.xlu1 %1793  ;;  %v6446_v25 = vcombine.low %v3155_v44, %v3159_v54 }
 0x6f9   :  { %12217 = vst [vmem:[#allocation47_spill] sm:$0xff] %v8539_v9  ;;  %v8579_v9 = vrot.slane %v1293_v59, %v8046_v32  ;;  %v8593_v32 = vrot.slane %v1293_v59, %v8049_v33 }
 0x6fb   :  { %3969 = vmatpush1.bf16.msra.mxu1 %v6440_v23  ;;  %v8537_v30 = vpop.permute.xlu0 %1982  ;;  %v3156_v23 = vld [vmem:[%s11998_s11 + $0x188] sm:$0xff]  ;;  %12226 = vst [vmem:[#allocation56_spill] sm:$0xff] %v8579_v9  ;;  %12228 = vst [vmem:[#allocation58_spill] sm:$0xff] %v8593_v32 }
 0x6fc   :  { %12216 = vst [vmem:[#allocation46_spill] sm:$0xff] %v8537_v30  ;;  %v8543_v28 = vpop.permute.xlu1 %2053 }
 0x6fd   :  { %12219 = vst [vmem:[#allocation49_spill] sm:$0xff] %v8543_v28  ;;  %v3160_v28 = vld [vmem:[%s11998_s11 + $0x1a8] sm:$0xff] }
 0x6ff   :  { %v8541_v7 = vpop.permute.xlu0 %1659 }
 0x700   :  { %12218 = vst [vmem:[#allocation48_spill] sm:$0xff] %v8541_v7  ;;  %v8547_v26 = vpop.permute.xlu1 %1860  ;;  %v6449_v7 = vcombine.high %v3156_v23, %v3160_v28 }
 0x701   :  { %12221 = vst [vmem:[#allocation51_spill] sm:$0xff] %v8547_v26  ;;  %v3167_v26 = vld [vmem:[%s11998_s11 + $0x1e0] sm:$0xff] }
 0x702   :  { %3970 = vmatprep.subr.bf16.mxu1 %v6449_v7  ;;  %v6465_v7 = vcombine.high %v3172_v10, %v3176_v17 }
 0x703   :  { %v8545_v39 = vpop.permute.xlu0 %1919 }
 0x704   :  { %12220 = vst [vmem:[#allocation50_spill] sm:$0xff] %v8545_v39  ;;  %v8551_v36 = vpop.permute.xlu1 %1600  ;;  %v3171_v39 = vld [vmem:[%s11998_s11 + $0x200] sm:$0xff] }
 0x705   :  { %12223 = vst [vmem:[#allocation53_spill] sm:$0xff] %v8551_v36  ;;  %v6447_v36 = vcombine.high %v3155_v44, %v3159_v54  ;;  %v3164_v44 = vld [vmem:[%s11998_s11 + $0x1c8] sm:$0xff] }
 0x706   :  { %v3168_v54 = vld [vmem:[%s11998_s11 + $0x1e8] sm:$0xff] }
 0x707   :  { %v8549_v51 = vpop.permute.xlu0 %1726  ;;  %3929 = vmatprep.subr.bf16.mxu0 %v6447_v36  ;;  %v6456_v27 = vcombine.low %v3164_v44, %v3168_v54 }
 0x708   :  { %12222 = vst [vmem:[#allocation52_spill] sm:$0xff] %v8549_v51  ;;  %v8555_v38 = vpop.permute.xlu1 %1797  ;;  %v6448_v51 = vcombine.low %v3156_v23, %v3160_v28  ;;  %v6457_v28 = vcombine.high %v3164_v44, %v3168_v54  ;;  %v3175_v23 = vld [vmem:[%s11998_s11 + $0x220] sm:$0xff]  ;;  %3930 = vmatpush1.bf16.msra.mxu0 %v6446_v25  ;;  %v6464_v25 = vcombine.low %v3172_v10, %v3176_v17 }
 0x709   :  { %12225 = vst [vmem:[#allocation55_spill] sm:$0xff] %v8555_v38  ;;  %v3163_v38 = vld [vmem:[%s11998_s11 + $0x1c0] sm:$0xff]  ;;  %v6463_v29 = vcombine.high %v3171_v39, %v3175_v23 }
 0x70a   :  { %v6454_v36 = vcombine.low %v3163_v38, %v3167_v26  ;;  %3971 = vmatpush1.bf16.msra.mxu1 %v6448_v51 }
 0x70b   :  { %v8553_v12 = vpop.permute.xlu0 %1986  ;;  %3972 = vmatprep.subr.bf16.mxu1 %v6457_v28 }
 0x70c   :  { %12224 = vst [vmem:[#allocation54_spill] sm:$0xff] %v8553_v12  ;;  %v6455_v12 = vcombine.high %v3163_v38, %v3167_v26 }
 0x70e   :  { %3931 = vmatprep.subr.bf16.mxu0 %v6455_v12  ;;  %3973 = vmatpush1.bf16.msra.mxu1 %v6456_v27 }
 0x70f   :  { %v8590_v30 = vpop.permute.xlu0 %1663  ;;  %3932 = vmatpush1.bf16.msra.mxu0 %v6454_v36  ;;  %3974 = vmatprep.subr.bf16.mxu1 %v6465_v7 }
 0x710   :  { %12227 = vst [vmem:[#allocation57_spill] sm:$0xff] %v8590_v30  ;;  %v8605_v30 = vpop.permute.xlu1 %2057  ;;  %3933 = vmatprep.subr.bf16.mxu0 %v6463_v29 }
 0x711   :  { %12229 = vst [vmem:[#allocation59_spill] sm:$0xff] %v8605_v30 }
 0x712   :  { %3975 = vmatpush1.bf16.msra.mxu1 %v6464_v25 }
 0x75d   :  { %v1419_v60 = vpop.f32.mrb[48].mxu1 }
 0x75e   :  { %v1421_v59 = vpop.f32.mrb[49].mxu1  ;;  %v1420_v16 = vadd.f32 %v1419_v60, %v8579_v9  ;;  %v6462_v60 = vcombine.low %v3171_v39, %v3175_v23 }
 0x75f   :  { %v1423_v33 = vpop.f32.mrb[50].mxu1  ;;  %v1422_v26 = vadd.f32 %v1421_v59, %v8593_v32 }
 0x760   :  { %v1424_v57 = vadd.f32 %v1423_v33, %v8579_v9  ;;  %v1425_v30 = vpop.f32.mrb[51].mxu1  ;;  %v8620_v33 = vpop.permute.xlu0 %1923  ;;  %3934 = vmatpush1.bf16.msra.mxu0 %v6462_v60 }
 0x761   :  { %v1426_v51 = vadd.f32 %v1425_v30, %v8593_v32  ;;  %12230 = vst [vmem:[#allocation60_spill] sm:$0xff] %v8620_v33  ;;  %v8624_v30 = vpop.permute.xlu1 %1864 }
 0x762   :  { %v1498_v12 = vpack.c.bf16 %v1424_v57, %v1420_v16  ;;  %12231 = vst [vmem:[#allocation61_spill] sm:$0xff] %v8624_v30 }
 0x763   :  { %v1499_v38 = vpack.c.bf16 %v1426_v51, %v1422_v26 }
 0x764   :  { %v8626_v44 = vunpack.c.l.bf16 %v1498_v12  ;;  %v8628_v57 = vunpack.c.h.bf16 %v1498_v12  ;;  %v8690_v60 = vpop.permute.xlu0 %1730 }
 0x765   :  { %v8632_v16 = vunpack.c.l.bf16 %v1499_v38  ;;  %v8634_v27 = vunpack.c.h.bf16 %v1499_v38  ;;  %v1429_v10 = vpop.f32.mrb[52].mxu1  ;;  %12232 = vst [vmem:[#allocation62_spill] sm:$0xff] %v8690_v60  ;;  %v8709_v36 = vpop.permute.xlu1 %1604 }
 0x766   :  { %v8639_v17 = vsel %vm2083_vm0, %v8626_v44, -3.4028235e+38  ;;  %v8644_v29 = vsel %vm2084_vm1, %v8628_v57, -3.4028235e+38  ;;  %v8649_v39 = vsel %vm2099_vm5, %v8626_v44, -3.4028235e+38  ;;  %v8652_v54 = vadd.f32 %v1429_v10, %v8579_v9 }
 0x767   :  { %v8657_v28 = vsel %vm2100_vm7, %v8628_v57, -3.4028235e+38  ;;  %v8662_v23 = vsel %vm2115_vm2, %v8626_v44, -3.4028235e+38  ;;  %v8667_v59 = vsel %vm2116_vm8, %v8628_v57, -3.4028235e+38 }
 0x768   :  { %v8676_v7 = vsel %vm2131_vm3, %v8626_v44, -3.4028235e+38  ;;  %v8681_v26 = vsel %vm2132_vm10, %v8628_v57, -3.4028235e+38  ;;  %v8686_v51 = vsel %vm2147_vm11, %v8626_v44, -3.4028235e+38  ;;  %v8796_v14 = vpop.permute.xlu0 %1990 }
 0x769   :  { %v8695_v38 = vsel %vm2148_vm4, %v8628_v57, -3.4028235e+38  ;;  %v8700_v25 = vsel %vm2163_vm6, %v8626_v44, -3.4028235e+38  ;;  %v8705_v10 = vsel %vm2164_vm12, %v8628_v57, -3.4028235e+38  ;;  %v8817_v37 = vpop.permute.xlu1 %1801 }
 0x76a   :  { %12233 = vst [vmem:[#allocation63_spill] sm:$0xff] %v8709_v36  ;;  %v8714_v30 = vsel %vm2179_vm9, %v8626_v44, -3.4028235e+38  ;;  %v8719_v60 = vsel %vm2180_vm13, %v8628_v57, -3.4028235e+38  ;;  %v1431_v58 = vpop.f32.mrb[53].mxu1 }
 0x76b   :  { %v8732_v55 = vsel %vm2083_vm0, %v8632_v16, -3.4028235e+38  ;;  %v8737_v8 = vsel %vm2084_vm1, %v8634_v27, -3.4028235e+38  ;;  %v1433_v33 = vpop.f32.mrb[54].mxu1  ;;  %vm2085_vm0 = vcmp.gt.f32.partialorder %v8279_v43, 0.0 }
 0x76c   :  { %v8742_v24 = vsel %vm2099_vm5, %v8632_v16, -3.4028235e+38  ;;  %v8747_v36 = vsel %vm2100_vm7, %v8634_v27, -3.4028235e+38  ;;  %v8752_v31 = vsel %vm2115_vm2, %v8632_v16, -3.4028235e+38  ;;  %v1434_v34 = vadd.f32 %v1433_v33, %v8579_v9 }
 0x76d   :  { %12234 = vst [vmem:[#allocation64_spill] sm:$0xff] %v8752_v31  ;;  %v8759_v12 = vsel %vm2116_vm8, %v8634_v27, -3.4028235e+38  ;;  %v8764_v49 = vsel %vm2131_vm3, %v8632_v16, -3.4028235e+38  ;;  %vm2101_vm1 = vcmp.gt.f32.partialorder %v8310_v1, 0.0 }
 0x76e   :  { %12235 = vst [vmem:[#allocation65_spill] sm:$0xff] %v8759_v12  ;;  %12236 = vst [vmem:[#allocation66_spill] sm:$0xff] %v8764_v49  ;;  %v8769_v52 = vsel %vm2132_vm10, %v8634_v27, -3.4028235e+38  ;;  %vm2086_vm2 = vcmp.gt.f32.partialorder %v8326_v3, 0.0  ;;  %vm2117_vm3 = vcmp.gt.f32.partialorder %v8288_v46, 0.0  ;;  %v1432_v12 = vadd.f32 %v1431_v58, %v8593_v32 }
 0x76f   :  { %12237 = vst [vmem:[#allocation67_spill] sm:$0xff] %v8769_v52  ;;  %v8779_v45 = vsel %vm2147_vm11, %v8632_v16, -3.4028235e+38  ;;  %v8784_v63 = vsel %vm2148_vm4, %v8634_v27, -3.4028235e+38  ;;  %vm2102_vm5 = vcmp.gt.f32.partialorder %v8301_v62, 0.0 }
 0x770   :  { %v8789_v2 = vsel %vm2163_vm6, %v8632_v16, -3.4028235e+38  ;;  %vm2118_vm7 = vcmp.gt.f32.partialorder %v8317_v48, 0.0  ;;  %12238 = vst [vmem:[#allocation68_spill] sm:$0xff] %v8796_v14  ;;  %v8801_v50 = vsel %vm2164_vm12, %v8634_v27, -3.4028235e+38 }
 0x771   :  { %v8806_v0 = vsel %vm2179_vm9, %v8632_v16, -3.4028235e+38  ;;  %v8811_v40 = vsel %vm2180_vm13, %v8634_v27, -3.4028235e+38  ;;  %vm2134_vm4 = vcmp.gt.f32.partialorder %v8339_v19, 0.0  ;;  %vm2133_vm6 = vcmp.gt.f32.partialorder %v8330_v18, 0.0 }
 0x772   :  { %12239 = vst [vmem:[#allocation69_spill] sm:$0xff] %v8811_v40  ;;  %12240 = vst [vmem:[#allocation70_spill] sm:$0xff] %v8817_v37  ;;  %v1435_v31 = vpop.f32.mrb[55].mxu1  ;;  %v8831_v37 = vsel %vm2195_vm14, %v8626_v44, -3.4028235e+38  ;;  %vm2181_vm8 = vcmp.gt.f32.partialorder %v8367_v56, 0.0 }
 0x773   :  { %v1436_v52 = vadd.f32 %v1435_v31, %v8593_v32  ;;  %v1439_v49 = vpop.f32.mrb[56].mxu1  ;;  %12241 = vst [vmem:[#allocation71_spill] sm:$0xff] %v8831_v37  ;;  %v8836_v15 = vsel %vm2196_vm15, %v8628_v57, -3.4028235e+38  ;;  %vm2149_vm9 = vcmp.gt.f32.partialorder %v8342_v20, 0.0  ;;  %vm2166_vm10 = vcmp.gt.f32.partialorder %v8393_v13, 0.0 }
 0x774   :  { %12242 = vst [vmem:[#allocation72_spill] sm:$0xff] %v8836_v15  ;;  %v1441_v58 = vpop.f32.mrb[57].mxu1  ;;  %v8845_v31 = vsel %vm2195_vm14, %v8632_v16, -3.4028235e+38  ;;  %v8850_v44 = vsel %vm2196_vm15, %v8634_v27, -3.4028235e+38  ;;  %v1500_v57 = vpack.c.bf16 %v1434_v34, %v8652_v54  ;;  %v1440_v41 = vadd.f32 %v1439_v49, %v8579_v9  ;;  %v8861_v27 = vpop.permute.xlu0 %1667 }
 0x775   :  { %12243 = vst [vmem:[#allocation73_spill] sm:$0xff] %v8845_v31  ;;  %12244 = vst [vmem:[#allocation74_spill] sm:$0xff] %v8850_v44  ;;  %v1501_v35 = vpack.c.bf16 %v1436_v52, %v1432_v12  ;;  %v1443_v14 = vpop.f32.mrb[58].mxu1  ;;  %vm12099_vm11 = vcmp.gt.f32.partialorder %v8401_v42, 0.0  ;;  %vm2165_vm12 = vcmp.gt.f32.partialorder %v8358_v22, 0.0  ;;  %vm2150_vm13 = vcmp.gt.f32.partialorder %v8364_v47, 0.0  ;;  %v8870_v52 = vpop.permute.xlu1 %2061 }
 0x776   :  { %v1444_v16 = vadd.f32 %v1443_v14, %v8579_v9  ;;  %v1445_v53 = vpop.f32.mrb[59].mxu1  ;;  %12245 = vst [vmem:[#allocation75_spill] sm:$0xff] %v8861_v27  ;;  %v8863_v33 = vunpack.c.l.bf16 %v1500_v57  ;;  %v8865_v54 = vunpack.c.h.bf16 %v1500_v57  ;;  %v8868_v12 = vadd.f32 %v1441_v58, %v8593_v32  ;;  %12248 = vst [vmem:[#allocation78_spill] sm:$0xff] %v8870_v52  ;;  %v12271_v62 = vld [vmem:[#allocation13_spill] sm:$0xff]  ;;  %v12283_v56 = vld [vmem:[#allocation67_spill] sm:$0xff] }
 0x777   :  { %v1449_v34 = vpop.f32.mrb[60].mxu1  ;;  %v8872_v40 = vunpack.c.l.bf16 %v1501_v35  ;;  %v8874_v49 = vunpack.c.h.bf16 %v1501_v35  ;;  %v8879_v44 = vadd.f32 %v1445_v53, %v8593_v32  ;;  %v12256_v15 = vmax.f32 %v8639_v17, %v8644_v29  ;;  %v12278_v3 = vld [vmem:[#allocation65_spill] sm:$0xff] }
 0x778   :  { %12246 = vst [vmem:[#allocation76_spill] sm:$0xff] %v8863_v33  ;;  %12247 = vst [vmem:[#allocation77_spill] sm:$0xff] %v8865_v54  ;;  %v8876_v14 = vpack.c.bf16 %v1444_v16, %v1440_v41  ;;  %v8881_v31 = vpop.f32.mrb[61].mxu1  ;;  %v2471_v57 = vsel %vm2085_vm0, %v8863_v33, -3.4028235e+38  ;;  %v8895_v41 = vadd.f32 %v1449_v34, %v8579_v9  ;;  %v12257_v9 = vmax.f32 %v8649_v39, %v8657_v28  ;;  %v8946_v39 = vpop.permute.xlu0 %1927 }
 0x779   :  { %12249 = vst [vmem:[#allocation79_spill] sm:$0xff] %v8872_v40  ;;  %12250 = vst [vmem:[#allocation80_spill] sm:$0xff] %v8874_v49  ;;  %v8889_v58 = vsel %vm2086_vm2, %v8865_v54, -3.4028235e+38  ;;  %v2503_v35 = vsel %vm2101_vm1, %v8863_v33, -3.4028235e+38  ;;  %v8913_v37 = vmax.f32 %v12256_v15, %v2471_v57  ;;  %v12259_v32 = vmax.f32 %v8662_v23, %v8667_v59  ;;  %v8985_v59 = vpop.permute.xlu1 %1868 }
 0x77a   :  { %12251 = vst [vmem:[#allocation81_spill] sm:$0xff] %v8879_v44  ;;  %12252 = vst [vmem:[#allocation82_spill] sm:$0xff] %v8881_v31  ;;  %v8900_v16 = vsel %vm2102_vm5, %v8865_v54, -3.4028235e+38  ;;  %v2535_v53 = vsel %vm2117_vm3, %v8863_v33, -3.4028235e+38  ;;  %v8929_v31 = vmax.f32 %v12257_v9, %v2503_v35  ;;  %v12262_v35 = vmax.f32 %v8700_v25, %v8705_v10 }
 0x77b   :  { %12253 = vst [vmem:[#allocation83_spill] sm:$0xff] %v8889_v58  ;;  %12254 = vst [vmem:[#allocation84_spill] sm:$0xff] %v8895_v41  ;;  %v8908_v52 = vsel %vm2118_vm7, %v8865_v54, -3.4028235e+38  ;;  %v2567_v34 = vsel %vm2133_vm6, %v8863_v33, -3.4028235e+38  ;;  %v8961_v44 = vmax.f32 %v12259_v32, %v2535_v53  ;;  %v12263_v32 = vmax.f32 %v8714_v30, %v8719_v60 }
 0x77c   :  { %12255 = vst [vmem:[#allocation85_spill] sm:$0xff] %v8900_v16  ;;  %v8921_v27 = vsel %vm2134_vm4, %v8865_v54, -3.4028235e+38  ;;  %v2599_v41 = vsel %vm2149_vm9, %v8863_v33, -3.4028235e+38  ;;  %12258 = vst [vmem:[#allocation86_spill] sm:$0xff] %v8946_v39  ;;  %v12260_v39 = vmax.f32 %v8676_v7, %v8681_v26  ;;  %v9060_v18 = vpop.permute.xlu0 %1734  ;;  %v12286_v22 = vmax.f32 %v8789_v2, %v8801_v50 }
 0x77d   :  { %v8934_v17 = vsel %vm2150_vm13, %v8865_v54, -3.4028235e+38  ;;  %v2631_v29 = vsel %vm2165_vm12, %v8863_v33, -3.4028235e+38  ;;  %v8942_v15 = vsel %vm2166_vm10, %v8865_v54, -3.4028235e+38 }
 0x77e   :  { %v2663_v9 = vsel %vm2181_vm8, %v8863_v33, -3.4028235e+38  ;;  %v8954_v28 = vsel %vm12099_vm11, %v8865_v54, -3.4028235e+38  ;;  %v8963_v57 = vpop.f32.mrb[62].mxu1  ;;  %v8968_v58 = vmax.f32 %v12260_v39, %v2567_v34  ;;  %v12261_v33 = vmax.f32 %v8686_v51, %v8695_v38  ;;  %12264 = vst [vmem:[#allocation87_spill] sm:$0xff] %v8985_v59  ;;  %v9092_v38 = vpop.permute.xlu1 %1608 }
 0x77f   :  { %v8978_v16 = vmax.f32 %v12262_v35, %v2631_v29  ;;  %v8983_v23 = vmax.f32 %v12263_v32, %v2663_v9  ;;  %v8987_v7 = vpop.f32.mrb[63].mxu1  ;;  %v2472_v51 = vsel %vm2085_vm0, %v8872_v40, -3.4028235e+38  ;;  %v9000_v30 = vsel %vm2086_vm2, %v8874_v49, -3.4028235e+38  ;;  %v12265_v10 = vld [vmem:[#allocation7_spill] sm:$0xff] }
 0x780   :  { %v8973_v54 = vmax.f32 %v12261_v33, %v2599_v41  ;;  %v2504_v60 = vsel %vm2101_vm1, %v8872_v40, -3.4028235e+38  ;;  %vm2119_vm15 = vcmp.gt.f32.partialorder %v8355_v6, 0.0  ;;  %vm2104_vm11 = vcmp.gt.f32.partialorder %v8389_v11, 0.0  ;;  %v9016_v1 = vpop.f32.mrb[64].mxu1  ;;  %v12266_v33 = vld [vmem:[#allocation9_spill] sm:$0xff] }
 0x781   :  { %vm2120_vm14 = vcmp.gt.f32.partialorder %v8397_v61, 0.0  ;;  %vm2135_vm0 = vcmp.gt.f32.partialorder %v12265_v10, 0.0  ;;  %v12267_v41 = vld [vmem:[#allocation11_spill] sm:$0xff]  ;;  %v9024_v53 = vsel %vm2102_vm5, %v8874_v49, -3.4028235e+38  ;;  %v12268_v39 = vmax.f32 %v8732_v55, %v8737_v8  ;;  %v12269_v35 = vld [vmem:[#allocation18_spill] sm:$0xff] }
 0x782   :  { %v2536_v34 = vsel %vm2117_vm3, %v8872_v40, -3.4028235e+38  ;;  %v9032_v29 = vsel %vm2118_vm7, %v8874_v49, -3.4028235e+38  ;;  %vm2167_vm1 = vcmp.gt.f32.partialorder %v12269_v35, 0.0  ;;  %v12270_v32 = vld [vmem:[#allocation26_spill] sm:$0xff]  ;;  %v12272_v55 = vmax.f32 %v8742_v24, %v8747_v36 }
 0x783   :  { %v9037_v9 = vmax.f32 %v12268_v39, %v2472_v51  ;;  %vm2168_vm2 = vcmp.gt.f32.partialorder %v12270_v32, 0.0  ;;  %vm2152_vm5 = vcmp.gt.f32.partialorder %v12271_v62, 0.0  ;;  %v2568_v46 = vsel %vm2133_vm6, %v8872_v40, -3.4028235e+38  ;;  %v12273_v39 = vld [vmem:[#allocation22_spill] sm:$0xff]  ;;  %12275 = vst [vmem:[#allocation7_spill] sm:$0xff] %v9060_v18 }
 0x784   :  { %v9048_v48 = vsel %vm2134_vm4, %v8874_v49, -3.4028235e+38  ;;  %v2600_v8 = vsel %vm2149_vm9, %v8872_v40, -3.4028235e+38  ;;  %v9056_v51 = vmax.f32 %v12272_v55, %v2504_v60  ;;  %vm2183_vm3 = vcmp.gt.f32.partialorder %v12273_v39, 0.0  ;;  %v12274_v25 = vld [vmem:[#allocation30_spill] sm:$0xff] }
 0x785   :  { %vm2184_vm7 = vcmp.gt.f32.partialorder %v12274_v25, 0.0  ;;  %v9065_v19 = vsel %vm2150_vm13, %v8874_v49, -3.4028235e+38  ;;  %v2632_v20 = vsel %vm2165_vm12, %v8872_v40, -3.4028235e+38  ;;  %vm12276_vm4 = vcmp.gt.f32.partialorder %v8401_v42, 0.0 }
 0x786   :  { %v9073_v24 = vsel %vm2166_vm10, %v8874_v49, -3.4028235e+38  ;;  %v2664_v60 = vsel %vm2181_vm8, %v8872_v40, -3.4028235e+38  ;;  %v9083_v47 = vsel %vm12276_vm4, %v8874_v49, -3.4028235e+38  ;;  %v12285_v42 = vmax.f32 %v8779_v45, %v8784_v63 }
 0x787   :  { %v12277_v55 = vld [vmem:[#allocation64_spill] sm:$0xff]  ;;  %12280 = vst [vmem:[#allocation9_spill] sm:$0xff] %v9092_v38  ;;  %v9094_v36 = vpop.f32.mrb[65].mxu1  ;;  %v12282_v26 = vld [vmem:[#allocation66_spill] sm:$0xff]  ;;  %v9124_v45 = vunpack.c.h.bf16 %v8876_v14  ;;  %v12292_v63 = vld [vmem:[#allocation81_spill] sm:$0xff]  ;;  %vm12295_vm6 = vcmp.gt.f32.partialorder %v8333_v5, 0.0 }
 0x788   :  { %v12279_v13 = vmax.f32 %v12277_v55, %v12278_v3  ;;  %12281 = vst [vmem:[#allocation11_spill] sm:$0xff] %v9094_v36  ;;  %v12284_v59 = vmax.f32 %v12282_v26, %v12283_v56  ;;  %v9104_v49 = vmax.f32 %v12285_v42, %v2600_v8  ;;  %v9109_v3 = vmax.f32 %v12286_v22, %v2632_v20  ;;  %v9116_v38 = vpop.f32.mrb[66].mxu1  ;;  %v9153_v42 = vpop.permute.xlu0 %1994  ;;  %v12302_v20 = vld [vmem:[#allocation83_spill] sm:$0xff]  ;;  %v12306_v18 = vld [vmem:[#allocation85_spill] sm:$0xff]  ;;  %vm12315_vm13 = vmmov %vm12295_vm6 }
 0x789   :  { %12289 = vst [vmem:[#allocation18_spill] sm:$0xff] %v9116_v38  ;;  %v9121_v26 = vunpack.c.l.bf16 %v8876_v14  ;;  %12291 = vst [vmem:[#allocation13_spill] sm:$0xff] %v9124_v45  ;;  %v1503_v2 = vpack.c.bf16 %v12292_v63, %v8868_v12  ;;  %v9128_v50 = vpop.f32.mrb[67].mxu1  ;;  %vm12296_vm8 = vcmp.gt.f32.partialorder %v8374_v4, 0.0  ;;  %vm12298_vm9 = vcmp.gt.f32.partialorder %v8352_v21, 0.0  ;;  %v12326_v61 = vld [vmem:[#allocation14_spill] sm:$0xff] }
 0x78a   :  { %v9090_v43 = vmax.f32 %v12279_v13, %v2536_v34  ;;  %v9099_v40 = vmax.f32 %v12284_v59, %v2568_v46  ;;  %v12287_v34 = vld [vmem:[#allocation69_spill] sm:$0xff]  ;;  %12293 = vst [vmem:[#allocation22_spill] sm:$0xff] %v9128_v50  ;;  %v9146_v14 = vsel %vm12296_vm8, %v9124_v45, -3.4028235e+38  ;;  %12300 = vst [vmem:[#allocation66_spill] sm:$0xff] %v9153_v42  ;;  %v12303_v8 = vmax.f32 %v8913_v37, %v12302_v20  ;;  %v9189_v37 = vpop.permute.xlu1 %1805  ;;  %v12333_v5 = vld [vmem:[#allocation23_spill] sm:$0xff] }
 0x78b   :  { %v12288_v55 = vmax.f32 %v8806_v0, %v12287_v34  ;;  %12290 = vst [vmem:[#allocation26_spill] sm:$0xff] %v9121_v26  ;;  %v2475_v12 = vsel %vm12295_vm6, %v9121_v26, -3.4028235e+38  ;;  %12297 = vst [vmem:[#allocation64_spill] sm:$0xff] %v9146_v14  ;;  %v2507_v22 = vsel %vm12298_vm9, %v9121_v26, -3.4028235e+38  ;;  %v9151_v56 = vunpack.c.l.bf16 %v1503_v2 }
 0x78c   :  { %v9158_v34 = vsel %vm2104_vm11, %v9124_v45, -3.4028235e+38  ;;  %v9166_v63 = vsel %vm2120_vm14, %v9124_v45, -3.4028235e+38  ;;  %v9171_v46 = vmax.f32 %v12303_v8, %v2475_v12  ;;  %v2571_v0 = vsel %vm2135_vm0, %v9121_v26, -3.4028235e+38  ;;  %vm12316_vm4 = vmmov %vm12298_vm9 }
 0x78d   :  { %v9114_v13 = vmax.f32 %v12288_v55, %v2664_v60  ;;  %v9138_v60 = vpop.f32.mrb[68].mxu1  ;;  %12299 = vst [vmem:[#allocation65_spill] sm:$0xff] %v9151_v56  ;;  %12301 = vst [vmem:[#allocation67_spill] sm:$0xff] %v9158_v34  ;;  %v2539_v55 = vsel %vm2119_vm15, %v9121_v26, -3.4028235e+38  ;;  %vm12304_vm10 = vcmp.gt.f32.partialorder %v12267_v41, 0.0  ;;  %v12334_v32 = vmax.f32 %v9090_v43, %v9032_v29 }
 0x78e   :  { %12294 = vst [vmem:[#allocation30_spill] sm:$0xff] %v9138_v60  ;;  %v9179_v59 = vsel %vm12304_vm10, %v9124_v45, -3.4028235e+38  ;;  %vm12305_vm12 = vcmp.gt.f32.partialorder %v12266_v33, 0.0  ;;  %v12307_v60 = vmax.f32 %v8929_v31, %v12306_v18  ;;  %12308 = vst [vmem:[#allocation69_spill] sm:$0xff] %v9189_v37  ;;  %v12309_v37 = vmax.f32 %v8961_v44, %v8908_v52  ;;  %v9221_v36 = vpop.f32.mrb[69].mxu1 }
 0x78f   :  { %v2603_v42 = vsel %vm12305_vm12, %v9121_v26, -3.4028235e+38  ;;  %v9194_v8 = vsel %vm2152_vm5, %v9124_v45, -3.4028235e+38  ;;  %v2635_v20 = vsel %vm2167_vm1, %v9121_v26, -3.4028235e+38  ;;  %v12310_v31 = vmax.f32 %v8968_v58, %v8921_v27  ;;  %vm12319_vm6 = vmmov %vm12296_vm8 }
 0x790   :  { %v9187_v50 = vmax.f32 %v12307_v60, %v2507_v22  ;;  %v9202_v12 = vsel %vm2168_vm2, %v9124_v45, -3.4028235e+38  ;;  %v2667_v18 = vsel %vm2183_vm3, %v9121_v26, -3.4028235e+38  ;;  %v9212_v60 = vsel %vm2184_vm7, %v9124_v45, -3.4028235e+38  ;;  %vm12327_vm9 = vmmov %vm12305_vm12 }
 0x791   :  { %v9219_v38 = vmax.f32 %v12309_v37, %v2539_v55  ;;  %v9226_v14 = vmax.f32 %v12310_v31, %v2571_v0  ;;  %v12311_v26 = vmax.f32 %v8973_v54, %v8934_v17  ;;  %v12312_v22 = vmax.f32 %v8978_v16, %v8942_v15  ;;  %v9243_v55 = vpop.f32.mrb[70].mxu1  ;;  %v9257_v15 = vpop.permute.xlu0 %1671  ;;  %v12339_v43 = vld [vmem:[#allocation34_spill] sm:$0xff] }
 0x792   :  { %v12313_v44 = vmax.f32 %v8983_v23, %v8954_v28  ;;  %v9247_v58 = vunpack.c.h.bf16 %v1503_v2  ;;  %v2476_v54 = vsel %vm12315_vm13, %v9151_v56, -3.4028235e+38  ;;  %v2508_v16 = vsel %vm12316_vm4, %v9151_v56, -3.4028235e+38  ;;  %v9255_v17 = vpop.f32.mrb[71].mxu1  ;;  %12317 = vst [vmem:[#allocation83_spill] sm:$0xff] %v9257_v15  ;;  %v9287_v31 = vpop.permute.xlu1 %2065 }
 0x793   :  { %v9231_v45 = vmax.f32 %v12311_v26, %v2603_v42  ;;  %v9236_v34 = vmax.f32 %v12312_v22, %v2635_v20  ;;  %v9267_v2 = vpop.f32.mrb[72].mxu1  ;;  %v2540_v42 = vsel %vm2119_vm15, %v9151_v56, -3.4028235e+38  ;;  %v12320_v37 = vmax.f32 %v9037_v9, %v9000_v30  ;;  %12321 = vst [vmem:[#allocation88_spill] sm:$0xff] %v9287_v31  ;;  %v12325_v22 = vld [vmem:[#allocation10_spill] sm:$0xff] }
 0x794   :  { %v9241_v52 = vmax.f32 %v12313_v44, %v2667_v18  ;;  %12314 = vst [vmem:[#allocation81_spill] sm:$0xff] %v9247_v58  ;;  %12318 = vst [vmem:[#allocation85_spill] sm:$0xff] %v9267_v2  ;;  %v9272_v21 = vsel %vm12319_vm6, %v9247_v58, -3.4028235e+38  ;;  %v9277_v0 = vsel %vm2104_vm11, %v9247_v58, -3.4028235e+38  ;;  %v12323_v30 = vmax.f32 %v9056_v51, %v9024_v53 }
 0x795   :  { %v9285_v20 = vmax.f32 %v12320_v37, %v2476_v54  ;;  %v9292_v4 = vsel %vm2120_vm14, %v9247_v58, -3.4028235e+38  ;;  %v2572_v11 = vsel %vm2135_vm0, %v9151_v56, -3.4028235e+38  ;;  %vm12322_vm11 = vmmov %vm12304_vm10  ;;  %v12324_v18 = vld [vmem:[#allocation16_spill] sm:$0xff]  ;;  %vm2089_vm8 = vcmp.gt.f32.partialorder %v12325_v22, 0.0 }
 0x796   :  { %v9300_v6 = vsel %vm12322_vm11, %v9247_v58, -3.4028235e+38  ;;  %v9305_v9 = vmax.f32 %v12323_v30, %v2508_v16  ;;  %vm2105_vm15 = vcmp.gt.f32.partialorder %v12324_v18, 0.0  ;;  %vm2090_vm14 = vcmp.gt.f32.partialorder %v12326_v61, 0.0  ;;  %v12328_v44 = vld [vmem:[#allocation20_spill] sm:$0xff]  ;;  %v12331_v30 = vld [vmem:[#allocation15_spill] sm:$0xff] }
 0x797   :  { %v2604_v10 = vsel %vm12327_vm9, %v9151_v56, -3.4028235e+38  ;;  %v9316_v41 = vsel %vm2152_vm5, %v9247_v58, -3.4028235e+38  ;;  %v2636_v53 = vsel %vm2167_vm1, %v9151_v56, -3.4028235e+38  ;;  %v9347_v26 = vmax.f32 %v12334_v32, %v2540_v42 }
 0x798   :  { %vm2121_vm0 = vcmp.gt.f32.partialorder %v12328_v44, 0.0  ;;  %v12329_v54 = vld [vmem:[#allocation24_spill] sm:$0xff]  ;;  %v9329_v33 = vsel %vm2168_vm2, %v9247_v58, -3.4028235e+38  ;;  %v2668_v62 = vsel %vm2183_vm3, %v9151_v56, -3.4028235e+38  ;;  %v12335_v39 = vmax.f32 %v9099_v40, %v9048_v48  ;;  %v9369_v40 = vpop.permute.xlu0 %1931 }
 0x799   :  { %vm2106_vm10 = vcmp.gt.f32.partialorder %v12329_v54, 0.0  ;;  %v12330_v16 = vld [vmem:[#allocation28_spill] sm:$0xff]  ;;  %v9337_v35 = vsel %vm2184_vm7, %v9247_v58, -3.4028235e+38  ;;  %vm2137_vm1 = vcmp.gt.f32.partialorder %v12331_v30, 0.0  ;;  %v12332_v51 = vld [vmem:[#allocation19_spill] sm:$0xff]  ;;  %v12336_v23 = vmax.f32 %v9104_v49, %v9065_v19 }
 0x79a   :  { %vm2122_vm12 = vcmp.gt.f32.partialorder %v12330_v16, 0.0  ;;  %vm2153_vm5 = vcmp.gt.f32.partialorder %v12332_v51, 0.0  ;;  %vm2138_vm13 = vcmp.gt.f32.partialorder %v12333_v5, 0.0  ;;  %v9352_v25 = vmax.f32 %v12335_v39, %v2572_v11  ;;  %v9364_v58 = vpop.f32.mrb[73].mxu1  ;;  %v12340_v29 = vld [vmem:[#allocation42_spill] sm:$0xff]  ;;  %v12341_v42 = vld [vmem:[#allocation27_spill] sm:$0xff]  ;;  %v9394_v39 = vpop.permute.xlu1 %1872 }
 0x79b   :  { %v9357_v37 = vmax.f32 %v12336_v23, %v2604_v10  ;;  %v12337_v28 = vmax.f32 %v9109_v3, %v9073_v24  ;;  %12338 = vst [vmem:[#allocation16_spill] sm:$0xff] %v9364_v58  ;;  %vm2169_vm2 = vcmp.gt.f32.partialorder %v12339_v43, 0.0  ;;  %vm2170_vm3 = vcmp.gt.f32.partialorder %v12340_v29, 0.0  ;;  %12342 = vst [vmem:[#allocation10_spill] sm:$0xff] %v9369_v40  ;;  %v12344_v19 = vld [vmem:[#allocation58_spill] sm:$0xff]  ;;  %v12346_v3 = vld [vmem:[#allocation56_spill] sm:$0xff] }
 0x79c   :  { %vm2154_vm7 = vcmp.gt.f32.partialorder %v12341_v42, 0.0  ;;  %v12343_v49 = vmax.f32 %v9114_v13, %v9083_v47  ;;  %v12345_v23 = vld [vmem:[#allocation82_spill] sm:$0xff]  ;;  %v1456_v11 = vadd.f32 %v8987_v7, %v12344_v19  ;;  %v9382_v10 = vpop.f32.mrb[74].mxu1  ;;  %12350 = vst [vmem:[#allocation20_spill] sm:$0xff] %v9394_v39  ;;  %v1460_v47 = vadd.f32 %v9016_v1, %v12346_v3  ;;  %v12393_v54 = vld [vmem:[#allocation43_spill] sm:$0xff] }
 0x79d   :  { %v9362_v27 = vmax.f32 %v12337_v28, %v2636_v53  ;;  %v1452_v24 = vadd.f32 %v12345_v23, %v12344_v19  ;;  %v1454_v28 = vadd.f32 %v8963_v57, %v12346_v3  ;;  %12347 = vst [vmem:[#allocation14_spill] sm:$0xff] %v9382_v10  ;;  %v12348_v53 = vld [vmem:[#allocation38_spill] sm:$0xff]  ;;  %v9396_v7 = vpop.f32.mrb[75].mxu1  ;;  %v12352_v23 = vld [vmem:[#allocation84_spill] sm:$0xff]  ;;  %v12390_v61 = vmax.f32 %v9285_v20, %v9272_v21 }
 0x79e   :  { %v9374_v48 = vmax.f32 %v12343_v49, %v2668_v62  ;;  %vm2185_vm4 = vcmp.gt.f32.partialorder %v12348_v53, 0.0  ;;  %v12349_v32 = vld [vmem:[#allocation46_spill] sm:$0xff]  ;;  %12351 = vst [vmem:[#allocation24_spill] sm:$0xff] %v9396_v7  ;;  %v9403_v13 = vpop.f32.mrb[76].mxu1  ;;  %v12354_v62 = vld [vmem:[#allocation11_spill] sm:$0xff]  ;;  %v12394_v20 = vmax.f32 %v9305_v9, %v9277_v0  ;;  %v12399_v29 = vmax.f32 %v9347_v26, %v9292_v4 }
 0x79f   :  { %vm12125_vm6 = vcmp.gt.f32.partialorder %v12349_v32, 0.0  ;;  %v1504_v40 = vpack.c.bf16 %v1454_v28, %v12352_v23  ;;  %v1505_v56 = vpack.c.bf16 %v1456_v11, %v1452_v24  ;;  %12353 = vst [vmem:[#allocation28_spill] sm:$0xff] %v9403_v13  ;;  %v1462_v31 = vadd.f32 %v12354_v62, %v12344_v19  ;;  %v12355_v57 = vld [vmem:[#allocation18_spill] sm:$0xff]  ;;  %v9415_v28 = vpop.f32.mrb[77].mxu1  ;;  %v9441_v13 = vpop.permute.xlu0 %1738 }
 0x7a0   :  { %v1464_v58 = vadd.f32 %v12355_v57, %v12346_v3  ;;  %v12356_v39 = vld [vmem:[#allocation22_spill] sm:$0xff]  ;;  %12358 = vst [vmem:[#allocation15_spill] sm:$0xff] %v9415_v28  ;;  %v9425_v62 = vadd.f32 %v9221_v36, %v12344_v19  ;;  %v9427_v57 = vpop.f32.mrb[78].mxu1  ;;  %v9437_v28 = vadd.f32 %v9243_v55, %v12346_v3  ;;  %12365 = vst [vmem:[#allocation38_spill] sm:$0xff] %v9441_v13 }
 0x7a1   :  { %v1466_v7 = vadd.f32 %v12356_v39, %v12344_v19  ;;  %v12357_v15 = vld [vmem:[#allocation30_spill] sm:$0xff]  ;;  %v9417_v24 = vunpack.c.l.bf16 %v1504_v40  ;;  %v9419_v1 = vunpack.c.h.bf16 %v1504_v40  ;;  %v9421_v11 = vunpack.c.l.bf16 %v1505_v56  ;;  %12362 = vst [vmem:[#allocation42_spill] sm:$0xff] %v9427_v57  ;;  %v9439_v40 = vpop.f32.mrb[79].mxu1 }
 0x7a2   :  { %v9413_v49 = vadd.f32 %v12357_v15, %v12346_v3  ;;  %12361 = vst [vmem:[#allocation34_spill] sm:$0xff] %v9425_v62  ;;  %v9429_v23 = vunpack.c.h.bf16 %v1505_v56  ;;  %v9431_v39 = vpack.c.bf16 %v1464_v58, %v1460_v47  ;;  %12363 = vst [vmem:[#allocation27_spill] sm:$0xff] %v9437_v28  ;;  %v9456_v55 = vadd.f32 %v9255_v17, %v12344_v19  ;;  %v9476_v17 = vpop.permute.xlu1 %1612  ;;  %v12372_v3 = vld [vmem:[#allocation67_spill] sm:$0xff] }
 0x7a3   :  { %12359 = vst [vmem:[#allocation19_spill] sm:$0xff] %v9417_v24  ;;  %12360 = vst [vmem:[#allocation23_spill] sm:$0xff] %v9419_v1  ;;  %v9433_v15 = vpack.c.bf16 %v1466_v7, %v1462_v31  ;;  %v2479_v36 = vsel %vm2089_vm8, %v9417_v24, -3.4028235e+38  ;;  %v9449_v56 = vsel %vm2090_vm14, %v9419_v1, -3.4028235e+38  ;;  %v12400_v0 = vmax.f32 %v9352_v25, %v9300_v6 }
 0x7a4   :  { %12364 = vst [vmem:[#allocation82_spill] sm:$0xff] %v9439_v40  ;;  %12366 = vst [vmem:[#allocation46_spill] sm:$0xff] %v9449_v56  ;;  %v2511_v58 = vsel %vm2105_vm15, %v9417_v24, -3.4028235e+38  ;;  %v9461_v31 = vsel %vm2106_vm10, %v9419_v1, -3.4028235e+38  ;;  %v12402_v43 = vmax.f32 %v9362_v27, %v9329_v33  ;;  %v12403_v26 = vmax.f32 %v9374_v48, %v9337_v35 }
 0x7a5   :  { %12367 = vst [vmem:[#allocation84_spill] sm:$0xff] %v9456_v55  ;;  %v2543_v47 = vsel %vm2121_vm0, %v9417_v24, -3.4028235e+38  ;;  %v9469_v7 = vsel %vm2122_vm12, %v9419_v1, -3.4028235e+38  ;;  %v12368_v40 = vld [vmem:[#allocation64_spill] sm:$0xff]  ;;  %v12375_v55 = vmax.f32 %v9226_v14, %v9179_v59  ;;  %v9672_v25 = vunpack.c.l.bf16 %v9431_v39 }
 0x7a6   :  { %v12369_v57 = vmax.f32 %v9171_v46, %v12368_v40  ;;  %12371 = vst [vmem:[#allocation18_spill] sm:$0xff] %v9476_v17  ;;  %v2575_v19 = vsel %vm2137_vm1, %v9417_v24, -3.4028235e+38  ;;  %v9484_v10 = vsel %vm2138_vm13, %v9419_v1, -3.4028235e+38  ;;  %v12373_v46 = vmax.f32 %v9187_v50, %v12372_v3  ;;  %v12380_v59 = vld [vmem:[#allocation21_spill] sm:$0xff]  ;;  %v9573_v18 = vpop.permute.xlu1 %1809 }
 0x7a7   :  { %v2607_v2 = vsel %vm2153_vm5, %v9417_v24, -3.4028235e+38  ;;  %v9497_v40 = vsel %vm2154_vm7, %v9419_v1, -3.4028235e+38  ;;  %v9505_v17 = vsel %vm2170_vm3, %v9419_v1, -3.4028235e+38  ;;  %v9527_v56 = vmax.f32 %v12375_v55, %v2575_v19  ;;  %v9547_v19 = vpop.permute.xlu0 %1998 }
 0x7a8   :  { %v9474_v13 = vmax.f32 %v12369_v57, %v2479_v36  ;;  %v9492_v57 = vmax.f32 %v12373_v46, %v2511_v58  ;;  %v2639_v36 = vsel %vm2169_vm2, %v9417_v24, -3.4028235e+38  ;;  %v2671_v50 = vsel %vm2185_vm4, %v9417_v24, -3.4028235e+38  ;;  %v12381_v14 = vld [vmem:[#allocation29_spill] sm:$0xff]  ;;  %12382 = vst [vmem:[#allocation22_spill] sm:$0xff] %v9547_v19 }
 0x7a9   :  { %v9515_v3 = vsel %vm12125_vm6, %v9419_v1, -3.4028235e+38  ;;  %v12374_v46 = vmax.f32 %v9219_v38, %v9166_v63  ;;  %v12376_v24 = vmax.f32 %v9231_v45, %v9194_v8  ;;  %v12377_v1 = vmax.f32 %v9236_v34, %v9202_v12  ;;  %12386 = vst [vmem:[#allocation30_spill] sm:$0xff] %v9573_v18  ;;  %v12387_v55 = vld [vmem:[#allocation31_spill] sm:$0xff]  ;;  %v12392_v45 = vld [vmem:[#allocation60_spill] sm:$0xff]  ;;  %v12425_v18 = vld [vmem:[#allocation62_spill] sm:$0xff] }
 0x7aa   :  { %12370 = vst [vmem:[#allocation11_spill] sm:$0xff] %v9474_v13  ;;  %v12378_v38 = vmax.f32 %v9241_v52, %v9212_v60  ;;  %v2480_v34 = vsel %vm2089_vm8, %v9421_v11, -3.4028235e+38  ;;  %v9557_v8 = vsel %vm2090_vm14, %v9429_v23, -3.4028235e+38  ;;  %v12383_v60 = vld [vmem:[#allocation36_spill] sm:$0xff]  ;;  %v9680_v27 = vpop.permute.xlu1 %2069 }
 0x7ab   :  { %v9522_v62 = vmax.f32 %v12374_v46, %v2543_v47  ;;  %v9532_v13 = vmax.f32 %v12376_v24, %v2607_v2  ;;  %v9537_v28 = vmax.f32 %v12377_v1, %v2639_v36  ;;  %v12379_v47 = vld [vmem:[#allocation32_spill] sm:$0xff]  ;;  %v2512_v12 = vsel %vm2105_vm15, %v9421_v11, -3.4028235e+38  ;;  %v12388_v36 = vld [vmem:[#allocation35_spill] sm:$0xff]  ;;  %v12391_v24 = vld [vmem:[#allocation50_spill] sm:$0xff] }
 0x7ac   :  { %v9542_v63 = vmax.f32 %v12378_v38, %v2671_v50  ;;  %vm2123_vm11 = vcmp.gt.f32.partialorder %v12383_v60, 0.0  ;;  %v12384_v52 = vld [vmem:[#allocation40_spill] sm:$0xff]  ;;  %vm2139_vm15 = vcmp.gt.f32.partialorder %v12387_v55, 0.0  ;;  %v12389_v50 = vld [vmem:[#allocation39_spill] sm:$0xff]  ;;  %v9581_v46 = vsel %vm2106_vm10, %v9429_v23, -3.4028235e+38 }
 0x7ad   :  { %vm2108_vm6 = vcmp.gt.f32.partialorder %v12384_v52, 0.0  ;;  %v12385_v2 = vld [vmem:[#allocation44_spill] sm:$0xff]  ;;  %v2544_v38 = vsel %vm2121_vm0, %v9421_v11, -3.4028235e+38  ;;  %v9589_v1 = vsel %vm2122_vm12, %v9429_v23, -3.4028235e+38  ;;  %v9594_v22 = vmax.f32 %v12390_v61, %v2480_v34 }
 0x7ae   :  { %vm2124_vm9 = vcmp.gt.f32.partialorder %v12385_v2, 0.0  ;;  %vm2171_vm8 = vcmp.gt.f32.partialorder %v12391_v24, 0.0  ;;  %vm12135_vm14 = vcmp.gt.f32.partialorder %v12392_v45, 0.0  ;;  %vm2156_vm10 = vcmp.gt.f32.partialorder %v12393_v54, 0.0  ;;  %v12395_v61 = vld [vmem:[#allocation54_spill] sm:$0xff]  ;;  %v12396_v58 = vld [vmem:[#allocation68_spill] sm:$0xff]  ;;  %v9773_v45 = vpop.permute.xlu1 %1876 }
 0x7af   :  { %v2576_v44 = vsel %vm2137_vm1, %v9421_v11, -3.4028235e+38  ;;  %v9605_v16 = vsel %vm2138_vm13, %v9429_v23, -3.4028235e+38  ;;  %v2608_v21 = vsel %vm2153_vm5, %v9421_v11, -3.4028235e+38  ;;  %v9613_v34 = vmax.f32 %v12394_v20, %v2512_v12  ;;  %v9647_v20 = vpop.permute.xlu0 %1675 }
 0x7b0   :  { %vm12134_vm0 = vcmp.gt.f32.partialorder %v12395_v61, 0.0  ;;  %vm12133_vm12 = vcmp.gt.f32.partialorder %v12396_v58, 0.0  ;;  %v9620_v30 = vsel %vm2154_vm7, %v9429_v23, -3.4028235e+38  ;;  %v2640_v5 = vsel %vm2169_vm2, %v9421_v11, -3.4028235e+38 }
 0x7b1   :  { %v9628_v51 = vsel %vm2170_vm3, %v9429_v23, -3.4028235e+38  ;;  %v2672_v9 = vsel %vm2185_vm4, %v9421_v11, -3.4028235e+38  ;;  %vm12397_vm1 = vcmp.gt.f32.partialorder %v12349_v32, 0.0  ;;  %v9645_v12 = vmax.f32 %v12399_v29, %v2544_v38  ;;  %12423 = vst [vmem:[#allocation40_spill] sm:$0xff] %v9773_v45 }
 0x7b2   :  { %v9638_v42 = vsel %vm12397_vm1, %v9429_v23, -3.4028235e+38  ;;  %v9652_v53 = vmax.f32 %v12400_v0, %v2576_v44  ;;  %v12401_v32 = vmax.f32 %v9357_v37, %v9316_v41  ;;  %v9667_v4 = vmax.f32 %v12403_v26, %v2672_v9  ;;  %v12410_v9 = vld [vmem:[#allocation11_spill] sm:$0xff]  ;;  %v12426_v61 = vld [vmem:[#allocation45_spill] sm:$0xff]  ;;  %v12440_v52 = vld [vmem:[#allocation8_spill] sm:$0xff] }
 0x7b3   :  { %12398 = vst [vmem:[#allocation64_spill] sm:$0xff] %v9638_v42  ;;  %v9662_v42 = vmax.f32 %v12402_v43, %v2640_v5  ;;  %v9675_v41 = vunpack.c.h.bf16 %v9431_v39  ;;  %v9678_v37 = vunpack.c.l.bf16 %v9433_v15  ;;  %v9689_v38 = vunpack.c.h.bf16 %v9433_v15  ;;  %v12433_v45 = vld [vmem:[#allocation47_spill] sm:$0xff] }
 0x7b4   :  { %v9657_v19 = vmax.f32 %v12401_v32, %v2608_v21  ;;  %12404 = vst [vmem:[#allocation67_spill] sm:$0xff] %v9667_v4  ;;  %v2876_v33 = vmax.f32 %v9652_v53, %v9605_v16  ;;  %vm12406_vm5 = vcmp.gt.f32.partialorder %v12380_v59, 0.0  ;;  %vm12407_vm13 = vcmp.gt.f32.partialorder %v12381_v14, 0.0  ;;  %v12409_v21 = vld [vmem:[#allocation27_spill] sm:$0xff] }
 0x7b5   :  { %v2960_v48 = vmax.f32 %v9662_v42, %v9628_v51  ;;  %12405 = vst [vmem:[#allocation32_spill] sm:$0xff] %v9689_v38  ;;  %v2483_v39 = vsel %vm12406_vm5, %v9672_v25, -3.4028235e+38  ;;  %v9697_v44 = vsel %vm12407_vm13, %v9675_v41, -3.4028235e+38  ;;  %vm12408_vm2 = vcmp.gt.f32.partialorder %v12379_v47, 0.0 }
 0x7b6   :  { %v2515_v16 = vsel %vm12408_vm2, %v9672_v25, -3.4028235e+38  ;;  %v1508_v5 = vpack.c.bf16 %v12409_v21, %v9413_v49  ;;  %v9707_v15 = vsel %vm2108_vm6, %v9675_v41, -3.4028235e+38  ;;  %v2547_v51 = vsel %vm2123_vm11, %v9672_v25, -3.4028235e+38  ;;  %vm12437_vm2 = vmmov %vm12407_vm13 }
 0x7b7   :  { %v9715_v0 = vsel %vm2124_vm9, %v9675_v41, -3.4028235e+38  ;;  %v12411_v42 = vld [vmem:[#allocation46_spill] sm:$0xff]  ;;  %v2579_v49 = vsel %vm2139_vm15, %v9672_v25, -3.4028235e+38  ;;  %vm12413_vm3 = vcmp.gt.f32.partialorder %v12389_v50, 0.0  ;;  %v12415_v26 = vmax.f32 %v9492_v57, %v9461_v31 }
 0x7b8   :  { %v12412_v43 = vmax.f32 %v12410_v9, %v12411_v42  ;;  %v9728_v53 = vsel %vm12413_vm3, %v9675_v41, -3.4028235e+38  ;;  %vm12414_vm7 = vcmp.gt.f32.partialorder %v12388_v36, 0.0  ;;  %v9743_v9 = vsel %vm2156_vm10, %v9675_v41, -3.4028235e+38  ;;  %v12418_v57 = vld [vmem:[#allocation48_spill] sm:$0xff] }
 0x7b9   :  { %v2611_v32 = vsel %vm12414_vm7, %v9672_v25, -3.4028235e+38  ;;  %v9736_v21 = vmax.f32 %v12415_v26, %v2515_v16  ;;  %v2643_v42 = vsel %vm2171_vm8, %v9672_v25, -3.4028235e+38  ;;  %vm2109_vm4 = vcmp.gt.f32.partialorder %v12418_v57, 0.0  ;;  %v12419_v16 = vld [vmem:[#allocation52_spill] sm:$0xff] }
 0x7ba   :  { %v9720_v29 = vmax.f32 %v12412_v43, %v2483_v39  ;;  %v9738_v39 = vpop.permute.xlu0 %1935  ;;  %v9751_v43 = vsel %vm12135_vm14, %v9675_v41, -3.4028235e+38  ;;  %vm2125_vm1 = vcmp.gt.f32.partialorder %v12419_v16, 0.0  ;;  %v12420_v26 = vld [vmem:[#allocation37_spill] sm:$0xff]  ;;  %v2675_v35 = vsel %vm12134_vm0, %v9672_v25, -3.4028235e+38 }
 0x7bb   :  { %12416 = vst [vmem:[#allocation21_spill] sm:$0xff] %v9738_v39  ;;  %12417 = vst [vmem:[#allocation29_spill] sm:$0xff] %v9751_v43  ;;  %vm2093_vm5 = vcmp.gt.f32.partialorder %v12420_v26, 0.0  ;;  %v9764_v6 = vsel %vm12133_vm12, %v9675_v41, -3.4028235e+38  ;;  %v2773_v4 = vmax.f32 %v9736_v21, %v9707_v15  ;;  %v12424_v39 = vld [vmem:[#allocation57_spill] sm:$0xff]  ;;  %v12427_v58 = vmax.f32 %v9527_v56, %v9484_v10 }
 0x7bc   :  { %v2731_v31 = vmax.f32 %v9720_v29, %v9697_v44  ;;  %12421 = vst [vmem:[#allocation36_spill] sm:$0xff] %v9764_v6  ;;  %v12422_v44 = vmax.f32 %v9522_v62, %v9469_v7  ;;  %vm2094_vm3 = vcmp.gt.f32.partialorder %v12426_v61, 0.0  ;;  %v12428_v15 = vmax.f32 %v9532_v13, %v9497_v40  ;;  %v12434_v10 = vld [vmem:[#allocation51_spill] sm:$0xff] }
 0x7bd   :  { %v9781_v6 = vmax.f32 %v12427_v58, %v2579_v49  ;;  %v12429_v62 = vmax.f32 %v9537_v28, %v9505_v17  ;;  %vm2141_vm7 = vcmp.gt.f32.partialorder %v12433_v45, 0.0  ;;  %vm12138_vm12 = vcmp.gt.f32.partialorder %v12434_v10, 0.0  ;;  %v12435_v56 = vld [vmem:[#allocation55_spill] sm:$0xff] }
 0x7be   :  { %v9771_v29 = vmax.f32 %v12422_v44, %v2547_v51  ;;  %v9786_v21 = vmax.f32 %v12428_v15, %v2611_v32  ;;  %v12431_v51 = vmax.f32 %v9542_v63, %v9515_v3  ;;  %vm12139_vm0 = vcmp.gt.f32.partialorder %v12435_v56, 0.0  ;;  %v9840_v49 = vpop.permute.xlu0 %1742  ;;  %v12467_v63 = vld [vmem:[#allocation7_spill] sm:$0xff] }
 0x7bf   :  { %v9791_v7 = vmax.f32 %v12429_v62, %v2643_v42  ;;  %vm12436_vm14 = vcmp.gt.f32.partialorder %v12380_v59, 0.0  ;;  %v9809_v17 = vsel %vm12437_vm2, %v9689_v38, -3.4028235e+38  ;;  %vm12438_vm13 = vcmp.gt.f32.partialorder %v12379_v47, 0.0  ;;  %v9867_v42 = vpop.permute.xlu1 %1813  ;;  %v12455_v62 = vld [vmem:[#allocation12_spill] sm:$0xff] }
 0x7c0   :  { %v9796_v44 = vmax.f32 %v12431_v51, %v2675_v35  ;;  %v2815_v13 = vmax.f32 %v9771_v29, %v9715_v0  ;;  %v2484_v28 = vsel %vm12436_vm14, %v9678_v37, -3.4028235e+38  ;;  %v2516_v40 = vsel %vm12438_vm13, %v9678_v37, -3.4028235e+38  ;;  %12448 = vst [vmem:[#allocation43_spill] sm:$0xff] %v9867_v42  ;;  %v12456_v51 = vld [vmem:[#allocation17_spill] sm:$0xff] }
 0x7c1   :  { %12430 = vst [vmem:[#allocation44_spill] sm:$0xff] %v9791_v7  ;;  %v2857_v3 = vmax.f32 %v9781_v6, %v9728_v53  ;;  %v2899_v58 = vmax.f32 %v9786_v21, %v9743_v9  ;;  %v9823_v59 = vsel %vm2108_vm6, %v9689_v38, -3.4028235e+38  ;;  %v2548_v14 = vsel %vm2123_vm11, %v9678_v37, -3.4028235e+38  ;;  %v12454_v21 = vld [vmem:[#allocation84_spill] sm:$0xff] }
 0x7c2   :  { %12432 = vst [vmem:[#allocation31_spill] sm:$0xff] %v9796_v44  ;;  %v9831_v47 = vsel %vm2124_vm9, %v9689_v38, -3.4028235e+38  ;;  %v2580_v6 = vsel %vm2139_vm15, %v9678_v37, -3.4028235e+38  ;;  %v12439_v35 = vmax.f32 %v9594_v22, %v9557_v8  ;;  %vm12140_vm6 = vcmp.gt.f32.partialorder %v12440_v52, 0.0 }
 0x7c3   :  { %vm12441_vm11 = vcmp.gt.f32.partialorder %v12389_v50, 0.0  ;;  %vm12443_vm9 = vcmp.gt.f32.partialorder %v12388_v36, 0.0  ;;  %v9853_v55 = vsel %vm2156_vm10, %v9689_v38, -3.4028235e+38  ;;  %v12445_v8 = vmax.f32 %v9613_v34, %v9581_v46 }
 0x7c4   :  { %v2751_v0 = vmax.f32 %v12439_v35, %v2484_v28  ;;  %v9845_v60 = vsel %vm12441_vm11, %v9689_v38, -3.4028235e+38  ;;  %v2612_v2 = vsel %vm12443_vm9, %v9678_v37, -3.4028235e+38  ;;  %12444 = vst [vmem:[#allocation39_spill] sm:$0xff] %v9853_v55  ;;  %v12446_v32 = vmax.f32 %v9645_v12, %v9589_v1  ;;  %v12457_v28 = vld [vmem:[#allocation25_spill] sm:$0xff]  ;;  %v9913_v35 = vpop.permute.xlu0 %2002 }
 0x7c5   :  { %12442 = vst [vmem:[#allocation35_spill] sm:$0xff] %v9845_v60  ;;  %v2793_v22 = vmax.f32 %v12445_v8, %v2516_v40  ;;  %v2644_v53 = vsel %vm2171_vm8, %v9678_v37, -3.4028235e+38  ;;  %v9865_v9 = vmax.f32 %v2876_v33, %v2580_v6  ;;  %v12450_v46 = vmax.f32 %v9657_v19, %v9620_v30  ;;  %v12453_v33 = vld [vmem:[#allocation34_spill] sm:$0xff]  ;;  %v12461_v6 = vld [vmem:[#allocation41_spill] sm:$0xff]  ;;  %12462 = vst [vmem:[#allocation48_spill] sm:$0xff] %v9913_v35 }
 0x7c6   :  { %v2752_v50 = vmax.f32 %v2751_v0, %v9809_v17  ;;  %v2835_v36 = vmax.f32 %v12446_v32, %v2548_v14  ;;  %v9869_v54 = vmax.f32 %v2960_v48, %v2644_v53  ;;  %v9877_v24 = vunpack.c.l.bf16 %v1508_v5  ;;  %v12458_v17 = vld [vmem:[#allocation33_spill] sm:$0xff]  ;;  %v12463_v53 = vld [vmem:[#allocation75_spill] sm:$0xff]  ;;  %v12512_v38 = vld [vmem:[#allocation80_spill] sm:$0xff] }
 0x7c7   :  { %12447 = vst [vmem:[#allocation50_spill] sm:$0xff] %v9865_v9  ;;  %v2794_v29 = vmax.f32 %v2793_v22, %v9823_v59  ;;  %v9875_v34 = vmax.f32 %v12450_v46, %v2612_v2  ;;  %v9882_v12 = vunpack.c.h.bf16 %v1508_v5  ;;  %v1509_v48 = vpack.c.bf16 %v12454_v21, %v12453_v33  ;;  %v12465_v46 = vld [vmem:[#allocation56_spill] sm:$0xff]  ;;  %v12466_v33 = vld [vmem:[#allocation85_spill] sm:$0xff]  ;;  %v12494_v9 = vld [vmem:[#allocation58_spill] sm:$0xff] }
 0x7c8   :  { %12449 = vst [vmem:[#allocation27_spill] sm:$0xff] %v9869_v54  ;;  %12452 = vst [vmem:[#allocation46_spill] sm:$0xff] %v9877_v24  ;;  %v2836_v15 = vmax.f32 %v2835_v36, %v9831_v47  ;;  %vm2198_vm15 = vcmp.gt.f32.partialorder %v12455_v62, 0.0  ;;  %vm2199_vm8 = vcmp.gt.f32.partialorder %v12456_v51, 0.0  ;;  %vm2200_vm14 = vcmp.gt.f32.partialorder %v12457_v28, 0.0  ;;  %v12490_v55 = vld [vmem:[#allocation61_spill] sm:$0xff] }
 0x7c9   :  { %12451 = vst [vmem:[#allocation11_spill] sm:$0xff] %v9875_v34  ;;  %v2487_v19 = vsel %vm2093_vm5, %v9877_v24, -3.4028235e+38  ;;  %v2519_v30 = vsel %vm2109_vm4, %v9877_v24, -3.4028235e+38  ;;  %vm2201_vm10 = vcmp.gt.f32.partialorder %v12458_v17, 0.0  ;;  %v1480_v21 = vadd.f32 %v12466_v33, %v12465_v46 }
 0x7ca   :  { %v2551_v5 = vsel %vm2125_vm1, %v9877_v24, -3.4028235e+38  ;;  %v2489_v40 = vsel %vm2094_vm3, %v9882_v12, -3.4028235e+38  ;;  %vm12459_vm13 = vcmp.gt.f32.partialorder %v12424_v39, 0.0  ;;  %vm12460_vm2 = vcmp.gt.f32.partialorder %v12425_v18, 0.0 }
 0x7cb   :  { %v9905_v59 = vsel %vm12459_vm13, %v9882_v12, -3.4028235e+38  ;;  %v9910_v14 = vsel %vm12460_vm2, %v9882_v12, -3.4028235e+38  ;;  %v2732_v47 = vmax.f32 %v2731_v31, %v2487_v19  ;;  %vm12148_vm11 = vcmp.gt.f32.partialorder %v12461_v6, 0.0  ;;  %v12464_v31 = vld [vmem:[#allocation49_spill] sm:$0xff]  ;;  %v9930_v19 = vpop.permute.xlu1 %2073 }
 0x7cc   :  { %v2583_v0 = vsel %vm2141_vm7, %v9877_v24, -3.4028235e+38  ;;  %v9921_v2 = vsel %vm12139_vm0, %v9882_v12, -3.4028235e+38  ;;  %v2615_v8 = vsel %vm12138_vm12, %v9877_v24, -3.4028235e+38  ;;  %v2774_v22 = vmax.f32 %v2773_v4, %v2519_v30 }
 0x7cd   :  { %vm2111_vm9 = vcmp.gt.f32.partialorder %v12463_v53, 0.0  ;;  %vm12144_vm13 = vcmp.gt.f32.partialorder %v12464_v31, 0.0  ;;  %v2733_v32 = vmax.f32 %v2732_v47, %v2489_v40  ;;  %v2816_v36 = vmax.f32 %v2815_v13, %v2551_v5  ;;  %v12471_v13 = vld [vmem:[#allocation14_spill] sm:$0xff]  ;;  %v12472_v40 = vld [vmem:[#allocation76_spill] sm:$0xff]  ;;  %v12473_v33 = vld [vmem:[#allocation83_spill] sm:$0xff] }
 0x7ce   :  { %vm12147_vm2 = vcmp.gt.f32.partialorder %v12467_v63, 0.0  ;;  %v2775_v1 = vmax.f32 %v2774_v22, %v9905_v59  ;;  %v2858_v44 = vmax.f32 %v2857_v3, %v2583_v0  ;;  %v9934_v43 = vmax.f32 %v2899_v58, %v2615_v8  ;;  %v12474_v34 = vld [vmem:[#allocation38_spill] sm:$0xff]  ;;  %v9975_v0 = vpop.permute.xlu0 %1679 }
 0x7cf   :  { %v9936_v7 = vunpack.c.l.bf16 %v1509_v48  ;;  %v2817_v4 = vmax.f32 %v2816_v36, %v9910_v14  ;;  %v9939_v30 = vunpack.c.h.bf16 %v1509_v48  ;;  %v1484_v5 = vadd.f32 %v12471_v13, %v12465_v46  ;;  %v12481_v22 = vld [vmem:[#allocation26_spill] sm:$0xff]  ;;  %v12482_v13 = vld [vmem:[#allocation13_spill] sm:$0xff] }
 0x7d0   :  { %12468 = vst [vmem:[#allocation52_spill] sm:$0xff] %v9934_v43  ;;  %v2695_v47 = vsel %vm12140_vm6, %v12472_v40, -3.4028235e+38  ;;  %vm12154_vm12 = vcmp.gt.f32.partialorder %v12473_v33, 0.0  ;;  %vm12156_vm0 = vcmp.gt.f32.partialorder %v12474_v34, 0.0  ;;  %v2859_v3 = vmax.f32 %v2858_v44, %v9921_v2  ;;  %v12484_v40 = vld [vmem:[#allocation19_spill] sm:$0xff] }
 0x7d1   :  { %12469 = vst [vmem:[#allocation37_spill] sm:$0xff] %v9936_v7  ;;  %12470 = vst [vmem:[#allocation57_spill] sm:$0xff] %v9939_v30  ;;  %v2488_v58 = vsel %vm2093_vm5, %v9936_v7, -3.4028235e+38  ;;  %v2520_v48 = vsel %vm2109_vm4, %v9936_v7, -3.4028235e+38 }
 0x7d2   :  { %v2552_v59 = vsel %vm2125_vm1, %v9936_v7, -3.4028235e+38  ;;  %v9961_v14 = vsel %vm2094_vm3, %v9939_v30, -3.4028235e+38  ;;  %vm12475_vm6 = vcmp.gt.f32.partialorder %v12424_v39, 0.0  ;;  %vm12476_vm5 = vcmp.gt.f32.partialorder %v12425_v18, 0.0  ;;  %v10046_v54 = vpop.permute.xlu0 %1939 }
 0x7d3   :  { %v9966_v44 = vsel %vm12475_vm6, %v9939_v30, -3.4028235e+38  ;;  %v9971_v26 = vsel %vm12476_vm5, %v9939_v30, -3.4028235e+38  ;;  %v9973_v57 = vmax.f32 %v2752_v50, %v2488_v58  ;;  %v9980_v61 = vsel %vm2141_vm7, %v9936_v7, -3.4028235e+38 }
 0x7d4   :  { %12477 = vst [vmem:[#allocation62_spill] sm:$0xff] %v9971_v26  ;;  %12478 = vst [vmem:[#allocation45_spill] sm:$0xff] %v9980_v61  ;;  %v9982_v16 = vmax.f32 %v2794_v29, %v2520_v48  ;;  %v9984_v2 = vmax.f32 %v2836_v15, %v2552_v59  ;;  %v1510_v39 = vpack.c.bf16 %v1484_v5, %v1480_v21  ;;  %v12480_v18 = vld [vmem:[#allocation77_spill] sm:$0xff]  ;;  %v2699_v36 = vsel %vm2199_vm8, %v12481_v22, -3.4028235e+38  ;;  %v9999_v29 = vpop.permute.xlu1 %2010  ;;  %v12486_v59 = vld [vmem:[#allocation23_spill] sm:$0xff] }
 0x7d5   :  { %v2697_v50 = vsel %vm2198_vm15, %v12480_v18, -3.4028235e+38  ;;  %v9997_v45 = vsel %vm2200_vm14, %v12482_v13, -3.4028235e+38  ;;  %12483 = vst [vmem:[#allocation8_spill] sm:$0xff] %v9999_v29  ;;  %v12485_v48 = vld [vmem:[#allocation53_spill] sm:$0xff]  ;;  %v12518_v28 = vmax.f32 %v9973_v57, %v9961_v14 }
 0x7d6   :  { %12479 = vst [vmem:[#allocation47_spill] sm:$0xff] %v9984_v2  ;;  %v10003_v21 = vunpack.c.l.bf16 %v1510_v39  ;;  %v10005_v5 = vunpack.c.h.bf16 %v1510_v39  ;;  %v10010_v58 = vsel %vm2201_vm10, %v12484_v40, -3.4028235e+38  ;;  %vm2095_vm4 = vcmp.gt.f32.partialorder %v12485_v48, 0.0  ;;  %v12487_v13 = vld [vmem:[#allocation71_spill] sm:$0xff]  ;;  %v12488_v39 = vld [vmem:[#allocation72_spill] sm:$0xff] }
 0x7d7   :  { %v10016_v18 = vsel %vm12148_vm11, %v12486_v59, -3.4028235e+38  ;;  %v10021_v22 = vsel %vm12144_vm13, %v9672_v25, -3.4028235e+38  ;;  %v12489_v15 = vmax.f32 %v12487_v13, %v12488_v39  ;;  %vm2158_vm1 = vcmp.gt.f32.partialorder %v12490_v55, 0.0  ;;  %v12491_v40 = vld [vmem:[#allocation63_spill] sm:$0xff] }
 0x7d8   :  { %vm12162_vm3 = vcmp.gt.f32.partialorder %v12491_v40, 0.0  ;;  %v12492_v43 = vld [vmem:[#allocation70_spill] sm:$0xff]  ;;  %v2491_v59 = vsel %vm2095_vm4, %v10003_v21, -3.4028235e+38  ;;  %v2523_v60 = vsel %vm2111_vm9, %v10003_v21, -3.4028235e+38 }
 0x7d9   :  { %v3018_v8 = vmax.f32 %v12489_v15, %v2695_v47  ;;  %vm12151_vm7 = vcmp.gt.f32.partialorder %v12492_v43, 0.0  ;;  %v12493_v25 = vld [vmem:[#allocation86_spill] sm:$0xff]  ;;  %v12495_v61 = vld [vmem:[#allocation16_spill] sm:$0xff]  ;;  %v2555_v47 = vsel %vm12147_vm2, %v10003_v21, -3.4028235e+38  ;;  %v10041_v15 = vmax.f32 %v2733_v32, %v2491_v59  ;;  %v12497_v26 = vld [vmem:[#allocation59_spill] sm:$0xff] }
 0x7da   :  { %vm2173_vm6 = vcmp.gt.f32.partialorder %v12493_v25, 0.0  ;;  %v1482_v13 = vadd.f32 %v12495_v61, %v12494_v9  ;;  %v12496_v39 = vld [vmem:[#allocation24_spill] sm:$0xff]  ;;  %12498 = vst [vmem:[#allocation34_spill] sm:$0xff] %v10046_v54  ;;  %v12499_v29 = vld [vmem:[#allocation69_spill] sm:$0xff]  ;;  %v2493_v35 = vsel %vm12162_vm3, %v10005_v5, -3.4028235e+38  ;;  %v10055_v10 = vmax.f32 %v2775_v1, %v2523_v60 }
 0x7db   :  { %v1486_v2 = vadd.f32 %v12496_v39, %v12494_v9  ;;  %vm2144_vm13 = vcmp.gt.f32.partialorder %v12499_v29, 0.0  ;;  %v2587_v61 = vsel %vm12151_vm7, %v10003_v21, -3.4028235e+38  ;;  %v10057_v32 = vmax.f32 %v2817_v4, %v2555_v47  ;;  %v12501_v59 = vld [vmem:[#allocation78_spill] sm:$0xff]  ;;  %v12502_v39 = vld [vmem:[#allocation9_spill] sm:$0xff]  ;;  %v10073_v4 = vpop.permute.xlu1 %2077  ;;  %v12505_v47 = vld [vmem:[#allocation88_spill] sm:$0xff] }
 0x7dc   :  { %vm2113_vm2 = vcmp.gt.f32.partialorder %v9647_v20, 0.0  ;;  %vm2205_vm11 = vcmp.gt.f32.partialorder %v12501_v59, 0.0  ;;  %vm2097_vm5 = vcmp.gt.f32.partialorder %v12502_v39, 0.0  ;;  %v2525_v54 = vsel %vm12154_vm12, %v10005_v5, -3.4028235e+38  ;;  %v10083_v34 = vld [vmem:[%s11998_s11 + $0x240] sm:$0xff] }
 0x7dd   :  { %12500 = vst [vmem:[#allocation84_spill] sm:$0xff] %v10057_v32  ;;  %v10068_v56 = vsel %vm12156_vm0, %v10005_v5, -3.4028235e+38  ;;  %v2735_v60 = vmax.f32 %v10041_v15, %v2493_v35  ;;  %v10071_v1 = vmax.f32 %v2859_v3, %v2587_v61  ;;  %vm2206_vm7 = vcmp.gt.f32.partialorder %v12505_v47, 0.0  ;;  %v10088_v35 = vld [vmem:[%s11998_s11 + $0x260] sm:$0xff]  ;;  %v12507_v61 = vld [vmem:[#allocation15_spill] sm:$0xff] }
 0x7de   :  { %12503 = vst [vmem:[#allocation12_spill] sm:$0xff] %v10068_v56  ;;  %v2777_v43 = vmax.f32 %v10055_v10, %v2525_v54  ;;  %v3019_v3 = vmax.f32 %v3018_v8, %v2697_v50  ;;  %v1511_v15 = vpack.c.bf16 %v1486_v2, %v1482_v13  ;;  %v12506_v10 = vld [vmem:[#allocation28_spill] sm:$0xff]  ;;  %v1492_v63 = vadd.f32 %v12507_v61, %v12494_v9  ;;  %v12509_v32 = vld [vmem:[#allocation82_spill] sm:$0xff]  ;;  %v12510_v30 = vld [vmem:[#allocation79_spill] sm:$0xff] }
 0x7df   :  { %12504 = vst [vmem:[#allocation17_spill] sm:$0xff] %v10071_v1  ;;  %v1490_v54 = vadd.f32 %v12506_v10, %v12465_v46  ;;  %v12508_v1 = vld [vmem:[#allocation42_spill] sm:$0xff]  ;;  %v1496_v42 = vadd.f32 %v12509_v32, %v12494_v9  ;;  %vm12511_vm3 = vcmp.gt.f32.partialorder %v12440_v52, 0.0  ;;  %v2698_v2 = vsel %vm2198_vm15, %v12512_v38, -3.4028235e+38  ;;  %v12513_v13 = vld [vmem:[#allocation65_spill] sm:$0xff]  ;;  %v10115_v52 = vpop.permute.xlu0 %1746 }
 0x7e0   :  { %v1494_v56 = vadd.f32 %v12508_v1, %v12465_v46  ;;  %v2696_v7 = vsel %vm12511_vm3, %v12510_v30, -3.4028235e+38  ;;  %vm2129_vm12 = vcmp.gt.f32.partialorder %v9840_v49, 0.0  ;;  %v3020_v8 = vmax.f32 %v3019_v3, %v2699_v36  ;;  %v12514_v62 = vld [vmem:[#allocation18_spill] sm:$0xff]  ;;  %v12515_v36 = vld [vmem:[#allocation81_spill] sm:$0xff]  ;;  %v12553_v20 = vld [vmem:[#allocation55_spill] sm:$0xff] }
 0x7e1   :  { %v10106_v50 = vunpack.c.l.bf16 %v1511_v15  ;;  %vm2209_vm0 = vcmp.gt.f32.partialorder %v10073_v4, 0.0  ;;  %v2700_v46 = vsel %vm2199_vm8, %v12513_v13, -3.4028235e+38  ;;  %vm2114_vm3 = vcmp.gt.f32.partialorder %v9975_v0, 0.0  ;;  %v10435_v39 = vld [vmem:[%s11998_s11 + $0x3c0] sm:$0xff]  ;;  %v10497_v0 = vld [vmem:[%s11998_s11 + $0x3e8] sm:$0xff] }
 0x7e2   :  { %vm2098_vm15 = vcmp.gt.f32.partialorder %v12514_v62, 0.0  ;;  %v1512_v38 = vpack.c.bf16 %v1494_v56, %v1490_v54  ;;  %v1513_v30 = vpack.c.bf16 %v1496_v42, %v1492_v63  ;;  %v10121_v32 = vsel %vm2200_vm14, %v12515_v36, -3.4028235e+38  ;;  %v10140_v42 = vpop.permute.xlu1 %2081 }
 0x7e3   :  { %v10126_v51 = vsel %vm2201_vm10, %v9421_v11, -3.4028235e+38  ;;  %v10131_v1 = vsel %vm2158_vm1, %v9882_v12, -3.4028235e+38  ;;  %v3021_v3 = vmax.f32 %v3020_v8, %v9997_v45  ;;  %v2492_v56 = vsel %vm2095_vm4, %v10106_v50, -3.4028235e+38 }
 0x7e4   :  { %12516 = vst [vmem:[#allocation25_spill] sm:$0xff] %v10131_v1  ;;  %v2524_v63 = vsel %vm2111_vm9, %v10106_v50, -3.4028235e+38  ;;  %v10145_v11 = vsel %vm2173_vm6, %v9877_v24, -3.4028235e+38  ;;  %v10150_v17 = vmax.f32 %v12518_v28, %v2492_v56  ;;  %v12520_v45 = vmax.f32 %v9982_v16, %v9966_v44  ;;  %v12524_v8 = vld [vmem:[#allocation73_spill] sm:$0xff] }
 0x7e5   :  { %12517 = vst [vmem:[#allocation33_spill] sm:$0xff] %v10145_v11  ;;  %v10157_v10 = vunpack.c.l.bf16 %v1512_v38  ;;  %v10162_v53 = vsel %vm2144_vm13, %v10005_v5, -3.4028235e+38  ;;  %vm12523_vm8 = vcmp.gt.f32.partialorder %v12497_v26, 0.0  ;;  %v3022_v14 = vmax.f32 %v3021_v3, %v10010_v58  ;;  %v3184_v28 = vld [vmem:[%s11998_s11 + $0x268] sm:$0xff]  ;;  %v10273_v11 = vld [vmem:[%s11998_s11 + $0x2c0] sm:$0xff] }
 0x7e6   :  { %12519 = vst [vmem:[#allocation41_spill] sm:$0xff] %v10150_v17  ;;  %v10155_v48 = vmax.f32 %v12520_v45, %v2524_v63  ;;  %12522 = vst [vmem:[#allocation49_spill] sm:$0xff] %v10162_v53  ;;  %v2709_v54 = vsel %vm12523_vm8, %v9675_v41, -3.4028235e+38  ;;  %v10168_v57 = vunpack.c.h.bf16 %v1511_v15  ;;  %v2711_v44 = vsel %vm2205_vm11, %v9877_v24, -3.4028235e+38 }
 0x7e7   :  { %v2495_v16 = vsel %vm2097_vm5, %v10157_v10, -3.4028235e+38  ;;  %v2527_v61 = vsel %vm2113_vm2, %v10157_v10, -3.4028235e+38  ;;  %vm2210_vm14 = vcmp.gt.f32.partialorder %v10140_v42, 0.0  ;;  %v12525_v41 = vld [vmem:[#allocation74_spill] sm:$0xff]  ;;  %v3023_v36 = vmax.f32 %v3022_v14, %v10016_v18 }
 0x7e8   :  { %12521 = vst [vmem:[#allocation75_spill] sm:$0xff] %v10155_v48  ;;  %v12526_v13 = vmax.f32 %v12524_v8, %v12525_v41  ;;  %v10186_v15 = vsel %vm2206_vm7, %v9882_v12, -3.4028235e+38  ;;  %v10189_v3 = vunpack.c.h.bf16 %v1512_v38  ;;  %v10191_v56 = vmax.f32 %v2735_v60, %v2495_v16  ;;  %v3180_v63 = vld [vmem:[%s11998_s11 + $0x248] sm:$0xff]  ;;  %v3187_v38 = vld [vmem:[%s11998_s11 + $0x280] sm:$0xff] }
 0x7e9   :  { %vm12527_vm10 = vcmp.gt.f32.partialorder %v9680_v27, 0.0  ;;  %v10204_v8 = vmax.f32 %v2777_v43, %v2527_v61  ;;  %vm12529_vm9 = vcmp.gt.f32.partialorder %v12461_v6, 0.0  ;;  %vm12530_vm4 = vcmp.gt.f32.partialorder %v12464_v31, 0.0  ;;  %v3192_v41 = vld [vmem:[%s11998_s11 + $0x2a8] sm:$0xff]  ;;  %v10278_v1 = vld [vmem:[%s11998_s11 + $0x2e0] sm:$0xff] }
 0x7ea   :  { %v3039_v58 = vmax.f32 %v12526_v13, %v2696_v7  ;;  %v10199_v7 = vpop.permute.xlu0 %2006  ;;  %v2715_v45 = vsel %vm12527_vm10, %v10003_v21, -3.4028235e+38  ;;  %v10209_v18 = vsel %vm12529_vm9, %v9429_v23, -3.4028235e+38  ;;  %v10214_v60 = vsel %vm12530_vm4, %v9678_v37, -3.4028235e+38 }
 0x7eb   :  { %12528 = vst [vmem:[#allocation56_spill] sm:$0xff] %v10204_v8  ;;  %vm12531_vm8 = vcmp.gt.f32.partialorder %v9930_v19, 0.0  ;;  %v3024_v43 = vmax.f32 %v3023_v36, %v10021_v22  ;;  %vm12532_vm10 = vcmp.gt.f32.partialorder %v12491_v40, 0.0  ;;  %vm12534_vm9 = vcmp.gt.f32.partialorder %v12473_v33, 0.0  ;;  %v3191_v40 = vld [vmem:[%s11998_s11 + $0x2a0] sm:$0xff]  ;;  %v3188_v33 = vld [vmem:[%s11998_s11 + $0x288] sm:$0xff] }
 0x7ec   :  { %v10222_v14 = vsel %vm12531_vm8, %v10005_v5, -3.4028235e+38  ;;  %v10228_v23 = vsel %vm12532_vm10, %v10168_v57, -3.4028235e+38  ;;  %v10233_v6 = vsel %vm12534_vm9, %v10168_v57, -3.4028235e+38  ;;  %v10240_v16 = vunpack.c.l.bf16 %v1513_v30 }
 0x7ed   :  { %12533 = vst [vmem:[#allocation85_spill] sm:$0xff] %v10228_v23  ;;  %12535 = vst [vmem:[#allocation14_spill] sm:$0xff] %v10233_v6  ;;  %v10238_v31 = vsel %vm2129_vm12, %v10157_v10, -3.4028235e+38  ;;  %v10242_v61 = vunpack.c.h.bf16 %v1513_v30  ;;  %v3040_v22 = vmax.f32 %v3039_v58, %v2698_v2  ;;  %v3025_v13 = vmax.f32 %v3024_v43, %v2709_v54  ;;  %v10314_v23 = vld [vmem:[%s11998_s11 + $0x300] sm:$0xff] }
 0x7ee   :  { %12536 = vst [vmem:[#allocation76_spill] sm:$0xff] %v10238_v31  ;;  %v10256_v36 = vsel %vm2098_vm15, %v10189_v3, -3.4028235e+38  ;;  %v10261_v2 = vsel %vm2114_vm3, %v10189_v3, -3.4028235e+38  ;;  %v6471_v30 = vcombine.high %v10083_v34, %v10088_v35  ;;  %v6472_v54 = vcombine.low %v3180_v63, %v3184_v28  ;;  %v12538_v31 = vld [vmem:[#allocation32_spill] sm:$0xff]  ;;  %v10295_v6 = vpop.permute.xlu0 %1943 }
 0x7ef   :  { %12537 = vst [vmem:[#allocation83_spill] sm:$0xff] %v10261_v2  ;;  %v10268_v58 = vsel %vm2209_vm0, %v10157_v10, -3.4028235e+38  ;;  %v3041_v9 = vmax.f32 %v3040_v22, %v2700_v46  ;;  %v6473_v43 = vcombine.high %v3180_v63, %v3184_v28  ;;  %v3026_v53 = vmax.f32 %v3025_v13, %v2711_v44  ;;  %v10288_v63 = vld [vmem:[%s11998_s11 + $0x2c8] sm:$0xff]  ;;  %v12540_v44 = vld [vmem:[#allocation37_spill] sm:$0xff]  ;;  %v10360_v19 = vld [vmem:[%s11998_s11 + $0x360] sm:$0xff] }
 0x7f0   :  { %vm12539_vm4 = vcmp.gt.f32.partialorder %v12497_v26, 0.0  ;;  %3935 = vmatprep.subr.bf16.mxu0 %v6471_v30  ;;  %v6479_v46 = vcombine.high %v3187_v38, %v3191_v40  ;;  %v6481_v22 = vcombine.high %v3188_v33, %v3192_v41  ;;  %v10293_v28 = vld [vmem:[%s11998_s11 + $0x2e8] sm:$0xff]  ;;  %v10300_v26 = vsel %vm2205_vm11, %v12540_v44, -3.4028235e+38  ;;  %v12541_v13 = vld [vmem:[#allocation57_spill] sm:$0xff] }
 0x7f1   :  { %v10283_v48 = vsel %vm12539_vm4, %v12538_v31, -3.4028235e+38  ;;  %v10305_v30 = vsel %vm2206_vm7, %v12541_v13, -3.4028235e+38  ;;  %v3042_v8 = vmax.f32 %v3041_v9, %v10121_v32  ;;  %3976 = vmatprep.subr.bf16.mxu1 %v6473_v43  ;;  %v12542_v2 = vcombine.low %v10083_v34, %v10088_v35  ;;  %v10327_v35 = vld [vmem:[%s11998_s11 + $0x320] sm:$0xff]  ;;  %v10332_v32 = vld [vmem:[%s11998_s11 + $0x308] sm:$0xff]  ;;  %vm12544_vm7 = vmmov %vm12531_vm8 }
 0x7f2   :  { %v6478_v17 = vcombine.low %v3187_v38, %v3191_v40  ;;  %v3027_v59 = vmax.f32 %v3026_v53, %v10186_v15  ;;  %vm12543_vm11 = vcmp.gt.f32.partialorder %v9680_v27, 0.0  ;;  %3977 = vmatpush1.bf16.msra.mxu1 %v6472_v54  ;;  %v6480_v9 = vcombine.low %v3188_v33, %v3192_v41  ;;  %v10337_v27 = vld [vmem:[%s11998_s11 + $0x328] sm:$0xff]  ;;  %v10355_v33 = vld [vmem:[%s11998_s11 + $0x340] sm:$0xff] }
 0x7f3   :  { %3936 = vmatpush1.bf16.msra.mxu0 %v12542_v2  ;;  %v10320_v47 = vsel %vm12543_vm11, %v10106_v50, -3.4028235e+38  ;;  %v6487_v34 = vcombine.high %v10273_v11, %v10278_v1  ;;  %v10342_v53 = vsel %vm12544_vm7, %v10168_v57, -3.4028235e+38  ;;  %v10347_v15 = vsel %vm2209_vm0, %v10240_v16, -3.4028235e+38  ;;  %3978 = vmatprep.subr.bf16.mxu1 %v6481_v22 }
 0x7f4   :  { %3937 = vmatprep.subr.bf16.mxu0 %v6479_v46  ;;  %v3043_v38 = vmax.f32 %v3042_v8, %v10126_v51  ;;  %v6489_v40 = vcombine.high %v10288_v63, %v10293_v28  ;;  %vm2130_vm8 = vcmp.gt.f32.partialorder %v10115_v52, 0.0  ;;  %v3028_v4 = vmax.f32 %v3027_v59, %v2715_v45  ;;  %v10376_v2 = vld [vmem:[%s11998_s11 + $0x348] sm:$0xff]  ;;  %v12545_v54 = vld [vmem:[#allocation30_spill] sm:$0xff] }
 0x7f5   :  { %v2721_v51 = vsel %vm2210_vm14, %v10189_v3, -3.4028235e+38  ;;  %v10369_v8 = vsel %vm2210_vm14, %v10242_v61, -3.4028235e+38  ;;  %v6486_v41 = vcombine.low %v10273_v11, %v10278_v1  ;;  %v10381_v45 = vld [vmem:[%s11998_s11 + $0x368] sm:$0xff]  ;;  %vm2145_vm0 = vcmp.gt.f32.partialorder %v12545_v54, 0.0 }
 0x7f6   :  { %v3044_v43 = vmax.f32 %v3043_v38, %v10209_v18  ;;  %v6488_v42 = vcombine.low %v10288_v63, %v10293_v28  ;;  %v6494_v1 = vcombine.low %v10314_v23, %v10327_v35  ;;  %v6495_v11 = vcombine.high %v10314_v23, %v10327_v35  ;;  %v10394_v46 = vld [vmem:[%s11998_s11 + $0x380] sm:$0xff]  ;;  %3979 = vmatpush1.bf16.msra.mxu1 %v6480_v9  ;;  %v10410_v28 = vld [vmem:[%s11998_s11 + $0x388] sm:$0xff] }
 0x7f7   :  { %3938 = vmatpush1.bf16.msra.mxu0 %v6478_v17  ;;  %v10399_v22 = vld [vmem:[%s11998_s11 + $0x3a0] sm:$0xff]  ;;  %v12546_v17 = vld [vmem:[#allocation43_spill] sm:$0xff]  ;;  %v3029_v18 = vmax.f32 %v3028_v4, %v10222_v14  ;;  %v6496_v63 = vcombine.low %v10332_v32, %v10337_v27  ;;  %v6497_v23 = vcombine.high %v10332_v32, %v10337_v27  ;;  %v10420_v14 = vsel %vm2097_vm5, %v10240_v16, -3.4028235e+38  ;;  %3980 = vmatprep.subr.bf16.mxu1 %v6489_v40  ;;  %v12549_v32 = vld [vmem:[#allocation20_spill] sm:$0xff] }
 0x7f8   :  { %vm2146_vm14 = vcmp.gt.f32.partialorder %v12546_v17, 0.0  ;;  %3939 = vmatprep.subr.bf16.mxu0 %v6487_v34  ;;  %v10415_v59 = vld [vmem:[%s11998_s11 + $0x3a8] sm:$0xff]  ;;  %12547 = vst [vmem:[#allocation77_spill] sm:$0xff] %v10420_v14  ;;  %v10423_v34 = vpop.permute.xlu0 %1880  ;;  %v3045_v35 = vmax.f32 %v3044_v43, %v10214_v60  ;;  %v6503_v27 = vcombine.high %v10355_v33, %v10360_v19  ;;  %v10440_v4 = vld [vmem:[%s11998_s11 + $0x3e0] sm:$0xff]  ;;  %v6505_v40 = vcombine.high %v10376_v2, %v10381_v45  ;;  %v12550_v43 = vld [vmem:[#allocation40_spill] sm:$0xff] }
 0x7f9   :  { %v12548_v9 = vld [vmem:[#allocation87_spill] sm:$0xff]  ;;  %v3030_v60 = vmax.f32 %v3029_v18, %v10268_v58  ;;  %vm2160_vm5 = vcmp.gt.f32.partialorder %v12549_v32, 0.0  ;;  %v10458_v18 = vsel %vm2098_vm15, %v10242_v61, -3.4028235e+38  ;;  %vm2162_vm9 = vcmp.gt.f32.partialorder %v10423_v34, 0.0  ;;  %v12573_v17 = vld [vmem:[#allocation48_spill] sm:$0xff] }
 0x7fa   :  { %vm2159_vm10 = vcmp.gt.f32.partialorder %v12548_v9, 0.0  ;;  %v3046_v14 = vmax.f32 %v3045_v35, %v10283_v48  ;;  %vm2161_vm4 = vcmp.gt.f32.partialorder %v12550_v43, 0.0  ;;  %3981 = vmatpush1.bf16.msra.mxu1 %v6488_v42  ;;  %v10469_v35 = vsel %vm2113_vm2, %v10240_v16, -3.4028235e+38 }
 0x7fb   :  { %3940 = vmatpush1.bf16.msra.mxu0 %v6486_v41  ;;  %v3031_v38 = vmax.f32 %v3030_v60, %v2721_v51  ;;  %3982 = vmatprep.subr.bf16.mxu1 %v6497_v23  ;;  %v10475_v51 = vld [vmem:[%s11998_s11 + $0x3c8] sm:$0xff]  ;;  %v10480_v42 = vsel %vm2114_vm3, %v10242_v61, -3.4028235e+38  ;;  %vm12554_vm2 = vcmp.gt.f32.partialorder %v12553_v20, 0.0  ;;  %v12556_v23 = vld [vmem:[#allocation10_spill] sm:$0xff]  ;;  %v10511_v24 = vmax.f32 %v10191_v56, %v10256_v36 }
 0x7fc   :  { %3941 = vmatprep.subr.bf16.mxu0 %v6495_v11  ;;  %v3047_v62 = vmax.f32 %v3046_v14, %v10300_v26  ;;  %v12551_v11 = vld [vmem:[#allocation7_spill] sm:$0xff]  ;;  %v10490_v26 = vsel %vm12554_vm2, %v12541_v13, -3.4028235e+38  ;;  %vm2174_vm11 = vcmp.gt.f32.partialorder %v12556_v23, 0.0  ;;  %v12557_v14 = vld [vmem:[#allocation21_spill] sm:$0xff]  ;;  %v12558_v41 = vld [vmem:[#allocation38_spill] sm:$0xff]  ;;  %v10513_v58 = vpop.permute.xlu0 %1947  ;;  %v6521_v9 = vcombine.high %v10475_v51, %v10497_v0 }
 0x7fd   :  { %vm12552_vm15 = vcmp.gt.f32.partialorder %v12551_v11, 0.0  ;;  %12555 = vst [vmem:[#allocation26_spill] sm:$0xff] %v10490_v26  ;;  %vm2175_vm7 = vcmp.gt.f32.partialorder %v12557_v14, 0.0  ;;  %v3032_v48 = vrot.slane %v3031_v38, 4  ;;  %vm12559_vm3 = vcmp.gt.f32.partialorder %v12558_v41, 0.0  ;;  %v12565_v36 = vld [vmem:[#allocation66_spill] sm:$0xff] }
 0x7fe   :  { %v10485_v60 = vsel %vm12552_vm15, %v10106_v50, -3.4028235e+38  ;;  %v10502_v11 = vsel %vm12559_vm3, %v10168_v57, -3.4028235e+38  ;;  %v10507_v20 = vsel %vm2129_vm12, %v10240_v16, -3.4028235e+38  ;;  %v3048_v26 = vmax.f32 %v3047_v62, %v10305_v30  ;;  %3983 = vmatpush1.bf16.msra.mxu1 %v6496_v63 }
 0x7ff   :  { %12560 = vst [vmem:[#allocation13_spill] sm:$0xff] %v10502_v11  ;;  %12561 = vst [vmem:[#allocation19_spill] sm:$0xff] %v10507_v20  ;;  %3942 = vmatpush1.bf16.msra.mxu0 %v6494_v1  ;;  %v10519_v41 = vsel %vm2130_vm8, %v10189_v3, -3.4028235e+38  ;;  %v10524_v49 = vsel %vm2130_vm8, %v10242_v61, -3.4028235e+38  ;;  %v3033_v30 = vmax.f32 %v3031_v38, %v3032_v48  ;;  %3984 = vmatprep.subr.bf16.mxu1 %v6505_v40 }
 0x800   :  { %v12562_v20 = vld [vmem:[#allocation51_spill] sm:$0xff]  ;;  %vm2189_vm15 = vcmp.gt.f32.partialorder %v12565_v36, 0.0  ;;  %v12566_v11 = vld [vmem:[#allocation34_spill] sm:$0xff]  ;;  %3943 = vmatprep.subr.bf16.mxu0 %v6503_v27  ;;  %v10541_v52 = vsel %vm2144_vm13, %v10168_v57, -3.4028235e+38  ;;  %vm2177_vm8 = vcmp.gt.f32.partialorder %v10295_v6, 0.0  ;;  %v3049_v63 = vmax.f32 %v3048_v26, %v10320_v47 }
 0x801   :  { %vm12563_vm12 = vcmp.gt.f32.partialorder %v12562_v20, 0.0  ;;  %vm2176_vm2 = vcmp.gt.f32.partialorder %v12566_v11, 0.0  ;;  %v12567_v1 = vld [vmem:[#allocation70_spill] sm:$0xff]  ;;  %v10546_v20 = vsel %vm2145_vm0, %v10157_v10, -3.4028235e+38  ;;  %vm2178_vm13 = vcmp.gt.f32.partialorder %v10513_v58, 0.0 }
 0x802   :  { %v10529_v56 = vsel %vm12563_vm12, %v12540_v44, -3.4028235e+38  ;;  %vm12568_vm3 = vcmp.gt.f32.partialorder %v12567_v1, 0.0  ;;  %v10553_v27 = vsel %vm2145_vm0, %v10240_v16, -3.4028235e+38  ;;  %v3034_v48 = vrot.slane %v3033_v30, 2 }
 0x803   :  { %12564 = vst [vmem:[#allocation53_spill] sm:$0xff] %v10529_v56  ;;  %v10536_v62 = vsel %vm12568_vm3, %v10106_v50, -3.4028235e+38  ;;  %12569 = vst [vmem:[#allocation23_spill] sm:$0xff] %v10553_v27  ;;  %v10558_v29 = vsel %vm2146_vm14, %v10189_v3, -3.4028235e+38  ;;  %v6520_v47 = vcombine.low %v10475_v51, %v10497_v0  ;;  %v3050_v1 = vmax.f32 %v3049_v63, %v10342_v53 }
 0x804   :  { %v10563_v38 = vsel %vm2146_vm14, %v10242_v61, -3.4028235e+38  ;;  %v10571_v54 = vsel %vm2158_vm1, %v12541_v13, -3.4028235e+38  ;;  %v10576_v40 = vsel %vm2159_vm10, %v10003_v21, -3.4028235e+38 }
 0x805   :  { %12570 = vst [vmem:[#allocation71_spill] sm:$0xff] %v10563_v38  ;;  %12571 = vst [vmem:[#allocation72_spill] sm:$0xff] %v10571_v54  ;;  %v12572_v26 = vld [vmem:[#allocation22_spill] sm:$0xff]  ;;  %vm2191_vm14 = vcmp.gt.f32.partialorder %v12573_v17, 0.0  ;;  %v12574_v38 = vcombine.low %v10355_v33, %v10360_v19  ;;  %v10587_v55 = vsel %vm2159_vm10, %v10106_v50, -3.4028235e+38  ;;  %v12578_v33 = vcombine.low %v10376_v2, %v10381_v45 }
 0x806   :  { %vm2190_vm0 = vcmp.gt.f32.partialorder %v12572_v26, 0.0  ;;  %v12575_v54 = vld [vmem:[#allocation60_spill] sm:$0xff]  ;;  %v2648_v56 = vsel %vm2173_vm6, %v12540_v44, -3.4028235e+38  ;;  %vm2192_vm12 = vcmp.gt.f32.partialorder %v10199_v7, 0.0  ;;  %v12579_v19 = vcombine.high %v10394_v46, %v10399_v22  ;;  %v12585_v23 = vld [vmem:[#allocation54_spill] sm:$0xff] }
 0x807   :  { %3944 = vmatpush1.bf16.msra.mxu0 %v12574_v38  ;;  %vm12576_vm1 = vcmp.gt.f32.partialorder %v12575_v54, 0.0  ;;  %v12577_v53 = vld [vmem:[#allocation8_spill] sm:$0xff]  ;;  %3985 = vmatpush1.bf16.msra.mxu1 %v12578_v33  ;;  %v10608_v25 = vsel %vm2160_vm5, %v10005_v5, -3.4028235e+38  ;;  %v10613_v63 = vsel %vm2160_vm5, %v10168_v57, -3.4028235e+38  ;;  %v3051_v45 = vmax.f32 %v3050_v1, %v10347_v15 }
 0x808   :  { %v2646_v27 = vsel %vm12576_vm1, %v12538_v31, -3.4028235e+38  ;;  %vm2193_vm3 = vcmp.gt.f32.partialorder %v12577_v53, 0.0  ;;  %3945 = vmatprep.subr.bf16.mxu0 %v12579_v19  ;;  %v12580_v38 = vld [vmem:[#allocation27_spill] sm:$0xff]  ;;  %v12581_v54 = vcombine.high %v10410_v28, %v10415_v59  ;;  %v10623_v51 = vsel %vm2161_vm4, %v10157_v10, -3.4028235e+38  ;;  %v10643_v19 = vpop.permute.xlu0 %2014 }
 0x809   :  { %v2962_v2 = vmax.f32 %v12580_v38, %v2646_v27  ;;  %v10628_v0 = vsel %vm2161_vm4, %v10240_v16, -3.4028235e+38  ;;  %v10633_v32 = vsel %vm2162_vm9, %v10189_v3, -3.4028235e+38  ;;  %v10635_v15 = vmax.f32 %v3033_v30, %v3034_v48  ;;  %v12591_v26 = vld [vmem:[#allocation85_spill] sm:$0xff] }
 0x80a   :  { %3986 = vmatprep.subr.bf16.mxu1 %v12581_v54  ;;  %v10640_v27 = vsel %vm2162_vm9, %v10242_v61, -3.4028235e+38  ;;  %v2738_v33 = vrot.slane %v10511_v24, 4  ;;  %v3052_v43 = vmax.f32 %v3051_v45, %v10369_v8  ;;  %v12582_v38 = vcombine.low %v10394_v46, %v10399_v22  ;;  %v12587_v45 = vld [vmem:[#allocation68_spill] sm:$0xff] }
 0x80b   :  { %v2963_v1 = vmax.f32 %v2962_v2, %v2648_v56  ;;  %v10652_v30 = vsel %vm2174_vm11, %v9882_v12, -3.4028235e+38  ;;  %v2650_v34 = vsel %vm2174_vm11, %v12541_v13, -3.4028235e+38  ;;  %v2652_v56 = vsel %vm2175_vm7, %v10106_v50, -3.4028235e+38 }
 0x80c   :  { %3946 = vmatpush1.bf16.msra.mxu0 %v12582_v38  ;;  %v12583_v8 = vcombine.low %v10410_v28, %v10415_v59  ;;  %v12584_v46 = vcombine.high %v10435_v39, %v10440_v4  ;;  %v10669_v48 = vsel %vm2175_vm7, %v10003_v21, -3.4028235e+38  ;;  %vm12586_vm6 = vcmp.gt.f32.partialorder %v12585_v23, 0.0 }
 0x80d   :  { %v2964_v22 = vmax.f32 %v2963_v1, %v2650_v34  ;;  %v2676_v2 = vsel %vm12586_vm6, %v9678_v37, -3.4028235e+38  ;;  %vm12588_vm10 = vcmp.gt.f32.partialorder %v12587_v45, 0.0  ;;  %v3053_v28 = vrot.slane %v3052_v43, 4 }
 0x80e   :  { %3987 = vmatpush1.bf16.msra.mxu1 %v12583_v8  ;;  %3947 = vmatprep.subr.bf16.mxu0 %v12584_v46  ;;  %v2678_v54 = vsel %vm12588_vm10, %v12538_v31, -3.4028235e+38  ;;  %v10680_v59 = vsel %vm2176_vm2, %v10005_v5, -3.4028235e+38  ;;  %v2680_v14 = vsel %vm2189_vm15, %v12540_v44, -3.4028235e+38  ;;  %v12589_v34 = vcombine.low %v10435_v39, %v10440_v4 }
 0x80f   :  { %3988 = vmatprep.subr.bf16.mxu1 %v6521_v9  ;;  %v3003_v1 = vmax.f32 %v2678_v54, %v2676_v2  ;;  %vm2194_vm5 = vcmp.gt.f32.partialorder %v10643_v19, 0.0  ;;  %v2965_v38 = vmax.f32 %v2964_v22, %v2652_v56  ;;  %v2654_v37 = vsel %vm2176_vm2, %v10168_v57, -3.4028235e+38  ;;  %v12590_v56 = vld [vmem:[#allocation46_spill] sm:$0xff]  ;;  %v12593_v54 = vld [vmem:[#allocation83_spill] sm:$0xff] }
 0x810   :  { %v10692_v31 = vsel %vm2177_vm8, %v10157_v10, -3.4028235e+38  ;;  %v2656_v9 = vsel %vm2177_vm8, %v10240_v16, -3.4028235e+38  ;;  %3948 = vmatpush1.bf16.msra.mxu0 %v12589_v34  ;;  %v10703_v44 = vsel %vm2178_vm13, %v10189_v3, -3.4028235e+38  ;;  %v3054_v22 = vmax.f32 %v3052_v43, %v3053_v28 }
 0x811   :  { %v2658_v11 = vsel %vm2178_vm13, %v10242_v61, -3.4028235e+38  ;;  %v10711_v8 = vsel %vm2189_vm15, %v12590_v56, -3.4028235e+38  ;;  %v3004_v6 = vmax.f32 %v3003_v1, %v2680_v14  ;;  %v2966_v46 = vmax.f32 %v2965_v38, %v2654_v37  ;;  %v12594_v1 = vld [vmem:[#allocation56_spill] sm:$0xff]  ;;  %v12596_v28 = vld [vmem:[#allocation75_spill] sm:$0xff] }
 0x812   :  { %3989 = vmatpush1.bf16.msra.mxu1 %v6520_v47  ;;  %v10716_v39 = vsel %vm2190_vm0, %v9882_v12, -3.4028235e+38  ;;  %v2682_v4 = vsel %vm2190_vm0, %v12541_v13, -3.4028235e+38  ;;  %v2684_v58 = vsel %vm2191_vm14, %v10106_v50, -3.4028235e+38  ;;  %v2739_v2 = vmax.f32 %v10511_v24, %v2738_v33 }
 0x813   :  { %v3005_v36 = vmax.f32 %v3004_v6, %v2682_v4  ;;  %v10727_v47 = vsel %vm2191_vm14, %v10003_v21, -3.4028235e+38  ;;  %v2686_v12 = vsel %vm2192_vm12, %v10168_v57, -3.4028235e+38  ;;  %v2967_v23 = vmax.f32 %v2966_v46, %v2656_v9  ;;  %v12592_v13 = vld [vmem:[#allocation41_spill] sm:$0xff]  ;;  %v12595_v21 = vld [vmem:[#allocation14_spill] sm:$0xff] }
 0x814   :  { %v2756_v45 = vmax.f32 %v12592_v13, %v12591_v26  ;;  %v2779_v50 = vmax.f32 %v12594_v1, %v12593_v54  ;;  %v2688_v17 = vsel %vm2193_vm3, %v10240_v16, -3.4028235e+38  ;;  %v2798_v14 = vmax.f32 %v12596_v28, %v12595_v21  ;;  %v12597_v38 = vld [vmem:[#allocation76_spill] sm:$0xff]  ;;  %v12601_v56 = vld [vmem:[#allocation77_spill] sm:$0xff]  ;;  %v12602_v13 = vld [vmem:[#allocation62_spill] sm:$0xff] }
 0x815   :  { %v3006_v43 = vmax.f32 %v3005_v36, %v2684_v58  ;;  %v12598_v37 = vld [vmem:[#allocation84_spill] sm:$0xff]  ;;  %v10746_v24 = vmax.f32 %v2967_v23, %v2658_v11  ;;  %v2740_v33 = vrot.slane %v2739_v2, 2  ;;  %v10752_v4 = vsel %vm2192_vm12, %v10005_v5, -3.4028235e+38  ;;  %v12605_v21 = vld [vmem:[#allocation17_spill] sm:$0xff] }
 0x816   :  { %v12599_v57 = vld [vmem:[#allocation12_spill] sm:$0xff]  ;;  %v2757_v6 = vmax.f32 %v2756_v45, %v12601_v56  ;;  %v2780_v46 = vrot.slane %v2779_v50, 4  ;;  %v2799_v58 = vmax.f32 %v2798_v14, %v10469_v35  ;;  %v10759_v26 = vsel %vm2193_vm3, %v10157_v10, -3.4028235e+38  ;;  %v12603_v45 = vld [vmem:[#allocation47_spill] sm:$0xff] }
 0x817   :  { %v12600_v9 = vmax.f32 %v12598_v37, %v12599_v57  ;;  %v3007_v16 = vmax.f32 %v3006_v43, %v2686_v12  ;;  %v2838_v54 = vmax.f32 %v12603_v45, %v12602_v13  ;;  %v10769_v5 = vsel %vm2194_vm5, %v10242_v61, -3.4028235e+38  ;;  %v12606_v37 = vld [vmem:[#allocation13_spill] sm:$0xff]  ;;  %v12613_v45 = vld [vmem:[#allocation52_spill] sm:$0xff] }
 0x818   :  { %v2758_v11 = vmax.f32 %v2757_v6, %v10458_v18  ;;  %v2781_v23 = vmax.f32 %v2779_v50, %v2780_v46  ;;  %v2800_v7 = vmax.f32 %v2799_v58, %v10480_v42  ;;  %v3055_v14 = vrot.slane %v3054_v22, 2  ;;  %v12611_v58 = vld [vmem:[#allocation19_spill] sm:$0xff]  ;;  %v12612_v13 = vld [vmem:[#allocation25_spill] sm:$0xff] }
 0x819   :  { %v2820_v34 = vmax.f32 %v12600_v9, %v12597_v38  ;;  %v10764_v1 = vmax.f32 %v3007_v16, %v2688_v17  ;;  %v2839_v12 = vmax.f32 %v2838_v54, %v10485_v60  ;;  %v12604_v17 = vld [vmem:[#allocation49_spill] sm:$0xff]  ;;  %v12609_v60 = vld [vmem:[#allocation35_spill] sm:$0xff]  ;;  %v2901_v54 = vmax.f32 %v12613_v45, %v12612_v13  ;;  %v12623_v13 = vld [vmem:[#allocation72_spill] sm:$0xff] }
 0x81a   :  { %v2759_v53 = vrot.slane %v2758_v11, 4  ;;  %v2782_v10 = vrot.slane %v2781_v23, 2  ;;  %v2801_v50 = vrot.slane %v2800_v7, 4  ;;  %v2861_v28 = vmax.f32 %v12605_v21, %v12604_v17 }
 0x81b   :  { %v2821_v36 = vmax.f32 %v2820_v34, %v10519_v41  ;;  %v2741_v41 = vmax.f32 %v2739_v2, %v2740_v33  ;;  %v3009_v18 = vmax.f32 %v10764_v1, %v10769_v5  ;;  %v2840_v57 = vmax.f32 %v2839_v12, %v12606_v37  ;;  %v12607_v34 = vld [vmem:[#allocation45_spill] sm:$0xff]  ;;  %v12608_v33 = vld [vmem:[#allocation50_spill] sm:$0xff] }
 0x81c   :  { %v2760_v38 = vmax.f32 %v2758_v11, %v2759_v53  ;;  %v2783_v61 = vmax.f32 %v2781_v23, %v2782_v10  ;;  %v2802_v42 = vmax.f32 %v2800_v7, %v2801_v50  ;;  %v2862_v2 = vmax.f32 %v2861_v28, %v10546_v20  ;;  %v12614_v7 = vld [vmem:[#allocation26_spill] sm:$0xff] }
 0x81d   :  { %v2822_v35 = vrot.slane %v2821_v36, 4  ;;  %v12610_v56 = vmax.f32 %v12608_v33, %v12609_v60  ;;  %v2742_v46 = vrot.slane %v2741_v41, 1  ;;  %v10791_v20 = vsel %vm2194_vm5, %v10189_v3, -3.4028235e+38  ;;  %v12616_v33 = vld [vmem:[#allocation11_spill] sm:$0xff] }
 0x81e   :  { %v2761_v16 = vrot.slane %v2760_v38, 2  ;;  %v2784_v11 = vrot.slane %v2783_v61, 1  ;;  %v2803_v23 = vrot.slane %v2802_v42, 2  ;;  %v2902_v50 = vmax.f32 %v2901_v54, %v10576_v40 }
 0x81f   :  { %v2823_v43 = vmax.f32 %v2821_v36, %v2822_v35  ;;  %v2879_v6 = vmax.f32 %v12610_v56, %v12607_v34  ;;  %v2841_v36 = vmax.f32 %v2840_v57, %v12611_v58  ;;  %v2863_v35 = vmax.f32 %v2862_v2, %v10558_v29  ;;  %v12615_v34 = vld [vmem:[#allocation39_spill] sm:$0xff] }
 0x820   :  { %v10795_v17 = vmax.f32 %v3054_v22, %v3055_v14  ;;  %v2762_v21 = vmax.f32 %v2760_v38, %v2761_v16  ;;  %v2743_v57 = vmax.f32 %v2741_v41, %v2742_v46  ;;  %v2903_v2 = vmax.f32 %v2902_v50, %v10608_v25  ;;  %v12617_v14 = vld [vmem:[#allocation53_spill] sm:$0xff]  ;;  %v12618_v41 = vld [vmem:[#allocation23_spill] sm:$0xff]  ;;  %v12620_v25 = vld [vmem:[#allocation44_spill] sm:$0xff] }
 0x821   :  { %v2824_v9 = vrot.slane %v2823_v43, 2  ;;  %v2880_v53 = vmax.f32 %v2879_v6, %v12614_v7  ;;  %v2842_v12 = vmax.f32 %v2841_v36, %v10524_v49  ;;  %v2864_v28 = vrot.slane %v2863_v35, 4  ;;  %v12619_v46 = vld [vmem:[#allocation33_spill] sm:$0xff]  ;;  %v12626_v7 = vld [vmem:[#allocation31_spill] sm:$0xff] }
 0x822   :  { %v2920_v19 = vmax.f32 %v12616_v33, %v12615_v34  ;;  %v2785_v3 = vmax.f32 %v2783_v61, %v2784_v11  ;;  %v2804_v60 = vmax.f32 %v2802_v42, %v2803_v23  ;;  %v2904_v22 = vmax.f32 %v2903_v2, %v10623_v51  ;;  %v12621_v16 = vld [vmem:[#allocation29_spill] sm:$0xff]  ;;  %v12624_v51 = vld [vmem:[#allocation71_spill] sm:$0xff] }
 0x823   :  { %v2825_v10 = vmax.f32 %v2823_v43, %v2824_v9  ;;  %v2881_v37 = vmax.f32 %v2880_v53, %v10536_v62  ;;  %v2843_v29 = vrot.slane %v2842_v12, 4  ;;  %v2865_v43 = vmax.f32 %v2863_v35, %v2864_v28  ;;  %v12625_v35 = vld [vmem:[#allocation36_spill] sm:$0xff] }
 0x824   :  { %v2921_v38 = vmax.f32 %v2920_v19, %v12617_v14  ;;  %v2763_v56 = vrot.slane %v2762_v21, 1  ;;  %v12622_v58 = vmax.f32 %v12620_v25, %v12621_v16  ;;  %v2905_v42 = vmax.f32 %v2904_v22, %v10633_v32 }
 0x825   :  { %v2882_v49 = vmax.f32 %v2881_v37, %v10541_v52  ;;  %v2826_v9 = vrot.slane %v2825_v10, 1  ;;  %v2844_v40 = vmax.f32 %v2842_v12, %v2843_v29  ;;  %v2866_v62 = vrot.slane %v2865_v43, 2 }
 0x826   :  { %v2942_v36 = vmax.f32 %v12622_v58, %v12619_v46  ;;  %v2922_v52 = vmax.f32 %v2921_v38, %v12623_v13  ;;  %v2969_v45 = vrot.slane %v10746_v24, 4  ;;  %v2805_v54 = vrot.slane %v2804_v60, 1 }
 0x827   :  { %v2883_v6 = vmax.f32 %v2882_v49, %v12618_v41  ;;  %v2845_v61 = vrot.slane %v2844_v40, 2  ;;  %v2983_v53 = vmax.f32 %v12626_v7, %v12625_v35  ;;  %v2867_v12 = vmax.f32 %v2865_v43, %v2866_v62 }
 0x828   :  { %v2943_v23 = vmax.f32 %v2942_v36, %v10652_v30  ;;  %v2906_v50 = vrot.slane %v2905_v42, 4  ;;  %v2923_v28 = vmax.f32 %v2922_v52, %v10587_v55  ;;  %v2970_v37 = vmax.f32 %v10746_v24, %v2969_v45 }
 0x829   :  { %v2884_v11 = vmax.f32 %v2883_v6, %v12624_v51  ;;  %v2827_v29 = vmax.f32 %v2825_v10, %v2826_v9  ;;  %v2984_v34 = vmax.f32 %v2983_v53, %v10711_v8  ;;  %v2764_v33 = vmax.f32 %v2762_v21, %v2763_v56  ;;  %v3060_v9 = vpop.xlane.xlu0 %3059  ;;  %v12628_v56 = vld [vmem:[#allocation67_spill] sm:$0xff]  ;;  %v3109_v51 = vld [vmem:[%s11998_s11 + $0x10] sm:$0xff]  ;;  %v3110_v53 = vld [vmem:[%s11998_s11 + $0x18] sm:$0xff] }
 0x82a   :  { %v2944_v2 = vmax.f32 %v2943_v23, %v10669_v48  ;;  %v2846_v19 = vmax.f32 %v2844_v40, %v2845_v61  ;;  %v2907_v49 = vmax.f32 %v2905_v42, %v2906_v50  ;;  %v2924_v30 = vmax.f32 %v2923_v28, %v10613_v63  ;;  %v12627_v40 = vld [vmem:[#allocation64_spill] sm:$0xff] }
 0x82b   :  { %v2885_v32 = vrot.slane %v2884_v11, 4  ;;  %v2806_v22 = vmax.f32 %v2804_v60, %v2805_v54  ;;  %v2985_v38 = vmax.f32 %v2984_v34, %v10716_v39  ;;  %v2868_v55 = vrot.slane %v2867_v12, 1 }
 0x82c   :  { %v2945_v43 = vmax.f32 %v2944_v2, %v10680_v59  ;;  %v2908_v62 = vrot.slane %v2907_v49, 2  ;;  %v2925_v24 = vmax.f32 %v2924_v30, %v10628_v0  ;;  %v2971_v10 = vrot.slane %v2970_v37, 2 }
 0x82d   :  { %v2886_v14 = vmax.f32 %v2884_v11, %v2885_v32  ;;  %v2986_v21 = vmax.f32 %v2985_v38, %v10727_v47  ;;  %v3002_v63 = vmax.f32 %v12628_v56, %v12627_v40  ;;  %v2847_v60 = vrot.slane %v2846_v19, 1  ;;  %v3113_v11 = vld [vmem:[%s11998_s11 + $0x30] sm:$0xff] }
 0x82e   :  { %v2946_v8 = vmax.f32 %v2945_v43, %v10692_v31  ;;  %v2909_v41 = vmax.f32 %v2907_v49, %v2908_v62  ;;  %v2926_v59 = vmax.f32 %v2925_v24, %v10640_v27  ;;  %vm3080_vm9 = vcmask 1041409  }
 0x82f   :  { %v2887_v48 = vrot.slane %v2886_v14, 2  ;;  %v2987_v0 = vmax.f32 %v2986_v21, %v10752_v4  ;;  %v3010_v46 = vmax.f32 %v3009_v18, %v3002_v63  ;;  %vm3061_vm4 = vcmp.gt.f32.partialorder %v3060_v9, 0.0 }
 0x830   :  { %v2947_v6 = vmax.f32 %v2946_v8, %v10703_v44  ;;  %v2869_v31 = vmax.f32 %v2867_v12, %v2868_v55  ;;  %v2910_v47 = vrot.slane %v2909_v41, 1  ;;  %v2927_v25 = vrot.slane %v2926_v59, 4  ;;  %vm10858_vm8 = vmpackc.low %vm3061_vm4, %vm3061_vm4 }
 0x831   :  { %v2888_v39 = vmax.f32 %v2886_v14, %v2887_v48  ;;  %v3081_v16 = vsel %vm3080_vm9, %v2785_v3, %v2743_v57  ;;  %v2972_v36 = vmax.f32 %v2970_v37, %v2971_v10  ;;  %v2988_v27 = vmax.f32 %v2987_v0, %v10759_v26 }
 0x832   :  { %v2948_v58 = vrot.slane %v2947_v6, 4  ;;  %v3011_v61 = vrot.slane %v3010_v46, 4  ;;  %v2928_v13 = vmax.f32 %v2926_v59, %v2927_v25  ;;  %vm3082_vm11 = vcmask 1042434   ;;  %v3117_v59 = vld [vmem:[%s11998_s11 + $0x50] sm:$0xff] }
 0x833   :  { %v2889_v42 = vrot.slane %v2888_v39, 1  ;;  %vm3084_vm7 = vcmask 1043459   ;;  %v2848_v44 = vmax.f32 %v2846_v19, %v2847_v60  ;;  %v2989_v1 = vmax.f32 %v2988_v27, %v10791_v20  ;;  %v3130_v27 = vld [vmem:[%s11998_s11 + $0xb8] sm:$0xff] }
 0x834   :  { %v2949_v4 = vmax.f32 %v2947_v6, %v2948_v58  ;;  %v3012_v5 = vmax.f32 %v3010_v46, %v3011_v61  ;;  %v2911_v18 = vmax.f32 %v2909_v41, %v2910_v47  ;;  %v2929_v52 = vrot.slane %v2928_v13, 2  ;;  %v3122_v6 = vld [vmem:[%s11998_s11 + $0x78] sm:$0xff]  ;;  %v3125_v58 = vld [vmem:[%s11998_s11 + $0x90] sm:$0xff] }
 0x835   :  { %v3083_v45 = vsel %vm3082_vm11, %v2827_v29, %v3081_v16  ;;  %vm3086_vm15 = vcmask 1044484   ;;  %v2990_v3 = vrot.slane %v2989_v1, 4  ;;  %v2890_v20 = vmax.f32 %v2888_v39, %v2889_v42  ;;  %v3114_v29 = vld [vmem:[%s11998_s11 + $0x38] sm:$0xff]  ;;  %v3121_v39 = vld [vmem:[%s11998_s11 + $0x70] sm:$0xff] }
 0x836   :  { %v2950_v57 = vrot.slane %v2949_v4, 2  ;;  %v3013_v54 = vrot.slane %v3012_v5, 2  ;;  %v3085_v26 = vsel %vm3084_vm7, %v2869_v31, %v3083_v45  ;;  %v2930_v23 = vmax.f32 %v2928_v13, %v2929_v52  ;;  %v3138_v52 = vld [vmem:[%s11998_s11 + $0xf8] sm:$0xff] }
 0x837   :  { %v2973_v35 = vrot.slane %v2972_v36, 1  ;;  %v3087_v7 = vsel %vm3086_vm15, %v2911_v18, %v3085_v26  ;;  %v2991_v50 = vmax.f32 %v2989_v1, %v2990_v3  ;;  %v3094_v37 = vsel %vm3080_vm9, %v2806_v22, %v2764_v33  ;;  %v3133_v1 = vld [vmem:[%s11998_s11 + $0xd0] sm:$0xff]  ;;  %v3134_v18 = vld [vmem:[%s11998_s11 + $0xd8] sm:$0xff] }
 0x838   :  { %v2951_v12 = vmax.f32 %v2949_v4, %v2950_v57  ;;  %v3014_v28 = vmax.f32 %v3012_v5, %v3013_v54  ;;  %v3057_v32 = vrot.slane %v10795_v17, 1  ;;  %v2931_v2 = vrot.slane %v2930_v23, 1  ;;  %v3137_v5 = vld [vmem:[%s11998_s11 + $0xf0] sm:$0xff]  ;;  %v7329_v33 = vld [vmem:[%s12000_s13 + $0x4c] ss:$16 sps:$4 sm:$0xff]  }
 0x839   :  { %v3095_v34 = vsel %vm3082_vm11, %v2848_v44, %v3094_v37  ;;  %v6403_v19 = vcombine.high %v3109_v51, %v3113_v11  ;;  %v2992_v30 = vrot.slane %v2991_v50, 2  ;;  %vm3088_vm2 = vcmask 1045509   ;;  %v3141_v26 = vld [vmem:[%s11998_s11 + $0x110] sm:$0xff]  ;;  %v3154_v37 = vld [vmem:[%s11998_s11 + $0x178] sm:$0xff] }
 0x83a   :  { %v2952_v49 = vrot.slane %v2951_v12, 1  ;;  %v3015_v14 = vrot.slane %v3014_v28, 1  ;;  %v3096_v43 = vsel %vm3084_vm7, %v2890_v20, %v3095_v34  ;;  %v2932_v38 = vmax.f32 %v2930_v23, %v2931_v2  ;;  %v3146_v20 = vld [vmem:[%s11998_s11 + $0x138] sm:$0xff] }
 0x83b   :  { %3999 = vmatprep.subr.bf16.mxu0 %v6403_v19  ;;  %v6405_v55 = vcombine.high %v3110_v53, %v3114_v29  ;;  %v2974_v62 = vmax.f32 %v2972_v36, %v2973_v35  ;;  %v2993_v24 = vmax.f32 %v2991_v50, %v2992_v30  ;;  %vm3090_vm13 = vcmask 1046534   ;;  %v3126_v36 = vld [vmem:[%s11998_s11 + $0x98] sm:$0xff]  ;;  %v3153_v50 = vld [vmem:[%s11998_s11 + $0x170] sm:$0xff] }
 0x83c   :  { %v2953_v22 = vmax.f32 %v2951_v12, %v2952_v49  ;;  %v3036_v10 = vrot.slane %v10635_v15, 1  ;;  %v3016_v48 = vmax.f32 %v3014_v28, %v3015_v14  ;;  %vm3092_vm0 = vcmask 1047559   ;;  %v3149_v12 = vld [vmem:[%s11998_s11 + $0x150] sm:$0xff]  ;;  %v3150_v28 = vld [vmem:[%s11998_s11 + $0x158] sm:$0xff] }
 0x83d   :  { %v3097_v8 = vsel %vm3086_vm15, %v2932_v38, %v3096_v43  ;;  %4040 = vmatprep.subr.bf16.mxu1 %v6405_v55  ;;  %v3058_v21 = vmax.f32 %v10795_v17, %v3057_v32  ;;  %v2994_v40 = vrot.slane %v2993_v24, 1  ;;  %v3118_v17 = vld [vmem:[%s11998_s11 + $0x58] sm:$0xff]  ;;  %v6402_v25 = vcombine.low %v3109_v51, %v3113_v11  ;;  %v3145_v51 = vld [vmem:[%s11998_s11 + $0x130] sm:$0xff] }
 0x83e   :  { %v3089_v9 = vsel %vm3088_vm2, %v2953_v22, %v3087_v7  ;;  %v3098_v56 = vsel %vm3088_vm2, %v2974_v62, %v3097_v8  ;;  %v3037_v0 = vmax.f32 %v10635_v15, %v3036_v10  ;;  %v6404_v16 = vcombine.low %v3110_v53, %v3114_v29  ;;  %v3129_v15 = vld [vmem:[%s11998_s11 + $0xb0] sm:$0xff]  ;;  %v3142_v11 = vld [vmem:[%s11998_s11 + $0x118] sm:$0xff] }
 0x83f   :  { %v3099_v63 = vsel %vm3090_vm13, %v3016_v48, %v3098_v56  ;;  %v2995_v60 = vmax.f32 %v2993_v24, %v2994_v40  ;;  %v6411_v42 = vcombine.high %v3117_v59, %v3121_v39  ;;  %v6413_v13 = vcombine.high %v3118_v17, %v3122_v6  ;;  %v3157_v19 = vld [vmem:[%s11998_s11 + $0x190] sm:$0xff]  ;;  %v3158_v30 = vld [vmem:[%s11998_s11 + $0x198] sm:$0xff] }
 0x840   :  { %v3100_v41 = vsel %vm3092_vm0, %v3058_v21, %v3099_v63  ;;  %v6410_v44 = vcombine.low %v3117_v59, %v3121_v39  ;;  %v6412_v4 = vcombine.low %v3118_v17, %v3122_v6  ;;  %v6419_v45 = vcombine.high %v3125_v58, %v3129_v15  ;;  %v3161_v49 = vld [vmem:[%s11998_s11 + $0x1b0] sm:$0xff]  ;;  %v3162_v14 = vld [vmem:[%s11998_s11 + $0x1b8] sm:$0xff] }
 0x841   :  { %v6527_v46 = vpack.c.bf16 %v3100_v41, %v3100_v41  ;;  %v3091_v31 = vsel %vm3090_vm13, %v2995_v60, %v3089_v9  ;;  %v6421_v57 = vcombine.high %v3126_v36, %v3130_v27  ;;  %v6418_v3 = vcombine.low %v3125_v58, %v3129_v15  ;;  %v3165_v62 = vld [vmem:[%s11998_s11 + $0x1d0] sm:$0xff]  ;;  %v3166_v10 = vld [vmem:[%s11998_s11 + $0x1d8] sm:$0xff] }
 0x842   :  { %v3093_v47 = vsel %vm3092_vm0, %v3037_v0, %v3091_v31  ;;  %v6420_v54 = vcombine.low %v3126_v36, %v3130_v27  ;;  %v6427_v23 = vcombine.high %v3133_v1, %v3137_v5  ;;  %v6429_v35 = vcombine.high %v3134_v18, %v3138_v52  ;;  %v3169_v24 = vld [vmem:[%s11998_s11 + $0x1f0] sm:$0xff]  ;;  %v3170_v48 = vld [vmem:[%s11998_s11 + $0x1f8] sm:$0xff] }
 0x843   :  { %6528 = vmatprep.mubr.msk.bf16.mxu0 %vm10858_vm8, %v6527_v46  ;;  %6534 = vmatprep.mubr.msk.bf16.mxu1 %vm10858_vm8, %v6527_v46  ;;  %v10900_v61 = vpack.c.bf16 %v3093_v47, %v3093_v47  ;;  %v6426_v7 = vcombine.low %v3133_v1, %v3137_v5  ;;  %v6428_v53 = vcombine.low %v3134_v18, %v3138_v52  ;;  %v3173_v56 = vld [vmem:[%s11998_s11 + $0x210] sm:$0xff]  ;;  %v3174_v60 = vld [vmem:[%s11998_s11 + $0x218] sm:$0xff] }
 0x844   :  { %v6435_v29 = vcombine.high %v3141_v26, %v3145_v51  ;;  %v6437_v32 = vcombine.high %v3142_v11, %v3146_v20  ;;  %v6434_v2 = vcombine.low %v3141_v26, %v3145_v51  ;;  %v6436_v34 = vcombine.low %v3142_v11, %v3146_v20  ;;  %v3177_v63 = vld [vmem:[%s11998_s11 + $0x230] sm:$0xff]  ;;  %v3178_v41 = vld [vmem:[%s11998_s11 + $0x238] sm:$0xff] }
 0x845   :  { %6531 = vmatmul.mubr.msk.bf16.vlgmr.msra.gmra.mrb[64].mxu0 %vm10858_vm8, %v10900_v61  ;;  %6537 = vmatmul.mubr.msk.bf16.vlgmr.msra.gmra.mrb[80].mxu1 %vm10858_vm8, %v10900_v61  ;;  %v6443_v43 = vcombine.high %v3149_v12, %v3153_v50  ;;  %v6445_v38 = vcombine.high %v3150_v28, %v3154_v37  ;;  %v6442_v55 = vcombine.low %v3149_v12, %v3153_v50  ;;  %v3181_v0 = vld [vmem:[%s11998_s11 + $0x250] sm:$0xff]  ;;  %v3182_v31 = vld [vmem:[%s11998_s11 + $0x258] sm:$0xff] }
 0x846   :  { %4000 = vmatpush1.bf16.msra.mxu0 %v6402_v25  ;;  %4041 = vmatpush1.bf16.msra.mxu1 %v6404_v16  ;;  %v6444_v22 = vcombine.low %v3150_v28, %v3154_v37  ;;  %v6451_v8 = vcombine.high %v3157_v19, %v3161_v49  ;;  %v6453_v21 = vcombine.high %v3158_v30, %v3162_v14  ;;  %v3186_v47 = vld [vmem:[%s11998_s11 + $0x278] sm:$0xff]  ;;  %v3189_v36 = vld [vmem:[%s11998_s11 + $0x290] sm:$0xff] }
 0x847   :  { %6540 = vmatprep.mubr.msk.bf16.mxu0 %vm10858_vm8, %v6527_v46  ;;  %6546 = vmatprep.mubr.msk.bf16.mxu1 %vm10858_vm8, %v6527_v46  ;;  %v6450_v40 = vcombine.low %v3157_v19, %v3161_v49  ;;  %v6452_v9 = vcombine.low %v3158_v30, %v3162_v14  ;;  %v6459_v59 = vcombine.high %v3165_v62, %v3169_v24  ;;  %v3185_v46 = vld [vmem:[%s11998_s11 + $0x270] sm:$0xff] }
 0x848   :  { %4001 = vmatprep.subr.bf16.mxu0 %v6411_v42  ;;  %4042 = vmatprep.subr.bf16.mxu1 %v6413_v13  ;;  %v6461_v39 = vcombine.high %v3166_v10, %v3170_v48  ;;  %v6458_v17 = vcombine.low %v3165_v62, %v3169_v24  ;;  %v6460_v6 = vcombine.low %v3166_v10, %v3170_v48  ;;  %v3193_v27 = vld [vmem:[%s11998_s11 + $0x2b0] sm:$0xff]  ;;  %v3190_v42 = vld [vmem:[%s11998_s11 + $0x298] sm:$0xff] }
 0x849   :  { %v6467_v25 = vcombine.high %v3173_v56, %v3177_v63  ;;  %v6469_v16 = vcombine.high %v3174_v60, %v3178_v41  ;;  %v6466_v58 = vcombine.low %v3173_v56, %v3177_v63  ;;  %v6468_v15 = vcombine.low %v3174_v60, %v3178_v41  ;;  %v3194_v13 = vld [vmem:[%s11998_s11 + $0x2b8] sm:$0xff]  ;;  %v3197_v18 = vld [vmem:[%s11998_s11 + $0x2d0] sm:$0xff] }
 0x84a   :  { %4002 = vmatpush1.bf16.msra.mxu0 %v6410_v44  ;;  %4043 = vmatpush1.bf16.msra.mxu1 %v6412_v4  ;;  %v6475_v44 = vcombine.high %v3181_v0, %v3185_v46  ;;  %v6477_v4 = vcombine.high %v3182_v31, %v3186_v47  ;;  %v6474_v1 = vcombine.low %v3181_v0, %v3185_v46  ;;  %v3201_v52 = vld [vmem:[%s11998_s11 + $0x2f0] sm:$0xff]  ;;  %v7315_v46 = vld [vmem:[%s12000_s13 + $0x8] ss:$16 sps:$4 sm:$0xff]  }
 0x84b   :  { %4003 = vmatprep.subr.bf16.mxu0 %v6419_v45  ;;  %4044 = vmatprep.subr.bf16.mxu1 %v6421_v57  ;;  %v6476_v5 = vcombine.low %v3182_v31, %v3186_v47  ;;  %v3198_v45 = vld [vmem:[%s11998_s11 + $0x2d8] sm:$0xff]  ;;  %v6482_v26 = vcombine.low %v3189_v36, %v3193_v27  ;;  %v6484_v51 = vcombine.low %v3190_v42, %v3194_v13  ;;  %v3205_v11 = vld [vmem:[%s11998_s11 + $0x310] sm:$0xff] }
 0x84c   :  { %v3202_v57 = vld [vmem:[%s11998_s11 + $0x2f8] sm:$0xff]  ;;  %v3209_v20 = vld [vmem:[%s11998_s11 + $0x330] sm:$0xff]  ;;  %v6490_v12 = vcombine.low %v3197_v18, %v3201_v52 }
 0x84d   :  { %v6492_v50 = vcombine.low %v3198_v45, %v3202_v57  ;;  %v3213_v28 = vld [vmem:[%s11998_s11 + $0x350] sm:$0xff]  ;;  %v6498_v19 = vcombine.low %v3205_v11, %v3209_v20  ;;  %v7323_v47 = vld [vmem:[%s12000_s13 + $0x2c] ss:$16 sps:$4 sm:$0xff]  }
 0x84e   :  { %4004 = vmatpush1.bf16.msra.mxu0 %v6418_v3  ;;  %4045 = vmatpush1.bf16.msra.mxu1 %v6420_v54  ;;  %v6483_v3 = vcombine.high %v3189_v36, %v3193_v27  ;;  %v6485_v54 = vcombine.high %v3190_v42, %v3194_v13  ;;  %v3217_v37 = vld [vmem:[%s11998_s11 + $0x370] sm:$0xff]  ;;  %v7335_v27 = vld [vmem:[%s12000_s13 + $0x6c] ss:$16 sps:$4 sm:$0xff]   ;;  %v7333_v13 = vld [vmem:[%s12000_s13 + $0x68] ss:$16 sps:$4 sm:$0xff]  }
 0x84f   :  { %4005 = vmatprep.subr.bf16.mxu0 %v6427_v23  ;;  %4046 = vmatprep.subr.bf16.mxu1 %v6429_v35  ;;  %v3206_v23 = vld [vmem:[%s11998_s11 + $0x318] sm:$0xff]  ;;  %v3221_v30 = vld [vmem:[%s11998_s11 + $0x390] sm:$0xff]  ;;  %v6506_v62 = vcombine.low %v3213_v28, %v3217_v37 }
 0x850   :  { %v3210_v35 = vld [vmem:[%s11998_s11 + $0x338] sm:$0xff]  ;;  %v3225_v14 = vld [vmem:[%s11998_s11 + $0x3b0] sm:$0xff] }
 0x851   :  { %v6500_v49 = vcombine.low %v3206_v23, %v3210_v35  ;;  %v3229_v10 = vld [vmem:[%s11998_s11 + $0x3d0] sm:$0xff]  ;;  %v6514_v56 = vcombine.low %v3221_v30, %v3225_v14 }
 0x852   :  { %4006 = vmatpush1.bf16.msra.mxu0 %v6426_v7  ;;  %4047 = vmatpush1.bf16.msra.mxu1 %v6428_v53  ;;  %v6491_v7 = vcombine.high %v3197_v18, %v3201_v52  ;;  %v6493_v53 = vcombine.high %v3198_v45, %v3202_v57  ;;  %v3233_v48 = vld [vmem:[%s11998_s11 + $0x3f0] sm:$0xff]  ;;  %v7347_v52 = vld [vmem:[%s12000_s13 + $0xac] ss:$16 sps:$4 sm:$0xff]   ;;  %v7345_v57 = vld [vmem:[%s12000_s13 + $0xa8] ss:$16 sps:$4 sm:$0xff]  }
 0x853   :  { %4007 = vmatprep.subr.bf16.mxu0 %v6435_v29  ;;  %4048 = vmatprep.subr.bf16.mxu1 %v6437_v32  ;;  %v3214_v29 = vld [vmem:[%s11998_s11 + $0x358] sm:$0xff]  ;;  %v6523_v60 = vcombine.high %v3229_v10, %v3233_v48  ;;  %v7312_v0 = vld [vmem:[%s12000_s13] ss:$16 sps:$4 sm:$0xff]   ;;  %v7320_v31 = vld [vmem:[%s12000_s13 + $0x24] ss:$16 sps:$4 sm:$0xff]  }
 0x854   :  { %v3218_v32 = vld [vmem:[%s11998_s11 + $0x378] sm:$0xff]  ;;  %v7332_v36 = vld [vmem:[%s12000_s13 + $0x64] ss:$16 sps:$4 sm:$0xff]   ;;  %v7330_v42 = vld [vmem:[%s12000_s13 + $0x60] ss:$16 sps:$4 sm:$0xff]  }
 0x855   :  { %v6508_v24 = vcombine.low %v3214_v29, %v3218_v32  ;;  %v7344_v18 = vld [vmem:[%s12000_s13 + $0xa4] ss:$16 sps:$4 sm:$0xff]   ;;  %v7342_v45 = vld [vmem:[%s12000_s13 + $0xa0] ss:$16 sps:$4 sm:$0xff]  }
 0x856   :  { %4008 = vmatpush1.bf16.msra.mxu0 %v6434_v2  ;;  %4049 = vmatpush1.bf16.msra.mxu1 %v6436_v34  ;;  %v6499_v2 = vcombine.high %v3205_v11, %v3209_v20  ;;  %v6501_v34 = vcombine.high %v3206_v23, %v3210_v35  ;;  %v7356_v11 = vld [vmem:[%s12000_s13 + $0xe4] ss:$16 sps:$4 sm:$0xff]   ;;  %v7359_v20 = vld [vmem:[%s12000_s13 + $0xec] ss:$16 sps:$4 sm:$0xff]   ;;  %v7354_v23 = vld [vmem:[%s12000_s13 + $0xe0] ss:$16 sps:$4 sm:$0xff]  }
 0x857   :  { %4009 = vmatprep.subr.bf16.mxu0 %v6443_v43  ;;  %4050 = vmatprep.subr.bf16.mxu1 %v6445_v38  ;;  %v3222_v43 = vld [vmem:[%s11998_s11 + $0x398] sm:$0xff] }
 0x858   :  { %v3226_v38 = vld [vmem:[%s11998_s11 + $0x3b8] sm:$0xff] }
 0x859   :  { %v6516_v63 = vcombine.low %v3222_v43, %v3226_v38  ;;  %v7357_v35 = vld [vmem:[%s12000_s13 + $0xe8] ss:$16 sps:$4 sm:$0xff]  }
 0x85a   :  { %4010 = vmatpush1.bf16.msra.mxu0 %v6442_v55  ;;  %4051 = vmatpush1.bf16.msra.mxu1 %v6444_v22  ;;  %v6507_v55 = vcombine.high %v3213_v28, %v3217_v37  ;;  %v6509_v22 = vcombine.high %v3214_v29, %v3218_v32  ;;  %v7368_v28 = vld [vmem:[%s12000_s13 + $0x124] ss:$16 sps:$4 sm:$0xff]   ;;  %v7371_v37 = vld [vmem:[%s12000_s13 + $0x12c] ss:$16 sps:$4 sm:$0xff]   ;;  %v7366_v29 = vld [vmem:[%s12000_s13 + $0x120] ss:$16 sps:$4 sm:$0xff]  }
 0x85b   :  { %4011 = vmatprep.subr.bf16.mxu0 %v6451_v8  ;;  %4052 = vmatprep.subr.bf16.mxu1 %v6453_v21  ;;  %v3230_v8 = vld [vmem:[%s11998_s11 + $0x3d8] sm:$0xff] }
 0x85c   :  { %v3234_v21 = vld [vmem:[%s11998_s11 + $0x3f8] sm:$0xff] }
 0x85d   :  { %v6525_v41 = vcombine.high %v3230_v8, %v3234_v21  ;;  %v7369_v32 = vld [vmem:[%s12000_s13 + $0x128] ss:$16 sps:$4 sm:$0xff]  }
 0x85e   :  { %4012 = vmatpush1.bf16.msra.mxu0 %v6450_v40  ;;  %4053 = vmatpush1.bf16.msra.mxu1 %v6452_v9  ;;  %v6515_v40 = vcombine.high %v3221_v30, %v3225_v14  ;;  %v6517_v9 = vcombine.high %v3222_v43, %v3226_v38  ;;  %v7380_v30 = vld [vmem:[%s12000_s13 + $0x164] ss:$16 sps:$4 sm:$0xff]   ;;  %v7383_v14 = vld [vmem:[%s12000_s13 + $0x16c] ss:$16 sps:$4 sm:$0xff]   ;;  %v7378_v43 = vld [vmem:[%s12000_s13 + $0x160] ss:$16 sps:$4 sm:$0xff]  }
 0x85f   :  { %4013 = vmatprep.subr.bf16.mxu0 %v6459_v59  ;;  %4054 = vmatprep.subr.bf16.mxu1 %v6461_v39  ;;  %v6522_v59 = vcombine.low %v3229_v10, %v3233_v48  ;;  %v6524_v39 = vcombine.low %v3230_v8, %v3234_v21  ;;  %v7381_v38 = vld [vmem:[%s12000_s13 + $0x168] ss:$16 sps:$4 sm:$0xff]   ;;  %v7392_v10 = vld [vmem:[%s12000_s13 + $0x1a4] ss:$16 sps:$4 sm:$0xff]   ;;  %v7395_v48 = vld [vmem:[%s12000_s13 + $0x1ac] ss:$16 sps:$4 sm:$0xff]  }
 0x860   :  { %v7390_v8 = vld [vmem:[%s12000_s13 + $0x1a0] ss:$16 sps:$4 sm:$0xff]   ;;  %v7393_v21 = vld [vmem:[%s12000_s13 + $0x1a8] ss:$16 sps:$4 sm:$0xff]  }
 0x862   :  { %4014 = vmatpush1.bf16.msra.mxu0 %v6458_v17  ;;  %4055 = vmatpush1.bf16.msra.mxu1 %v6460_v6  ;;  %v7314_v17 = vld [vmem:[%s12000_s13 + $0x4] ss:$16 sps:$4 sm:$0xff]   ;;  %v7317_v6 = vld [vmem:[%s12000_s13 + $0xc] ss:$16 sps:$4 sm:$0xff]  }
 0x863   :  { %4015 = vmatprep.subr.bf16.mxu0 %v6467_v25  ;;  %4056 = vmatprep.subr.bf16.mxu1 %v6469_v16  ;;  %v7318_v25 = vld [vmem:[%s12000_s13 + $0x20] ss:$16 sps:$4 sm:$0xff]   ;;  %v7321_v16 = vld [vmem:[%s12000_s13 + $0x28] ss:$16 sps:$4 sm:$0xff]  }
 0x866   :  { %4016 = vmatpush1.bf16.msra.mxu0 %v6466_v58  ;;  %4057 = vmatpush1.bf16.msra.mxu1 %v6468_v15  ;;  %v7326_v58 = vld [vmem:[%s12000_s13 + $0x44] ss:$16 sps:$4 sm:$0xff]   ;;  %v7327_v15 = vld [vmem:[%s12000_s13 + $0x48] ss:$16 sps:$4 sm:$0xff]  }
 0x867   :  { %4017 = vmatprep.subr.bf16.mxu0 %v6475_v44  ;;  %4058 = vmatprep.subr.bf16.mxu1 %v6477_v4  ;;  %v7338_v44 = vld [vmem:[%s12000_s13 + $0x84] ss:$16 sps:$4 sm:$0xff]   ;;  %v7341_v4 = vld [vmem:[%s12000_s13 + $0x8c] ss:$16 sps:$4 sm:$0xff]  }
 0x86a   :  { %4018 = vmatpush1.bf16.msra.mxu0 %v6474_v1  ;;  %4059 = vmatpush1.bf16.msra.mxu1 %v6476_v5  ;;  %v7336_v1 = vld [vmem:[%s12000_s13 + $0x80] ss:$16 sps:$4 sm:$0xff]   ;;  %v7339_v5 = vld [vmem:[%s12000_s13 + $0x88] ss:$16 sps:$4 sm:$0xff]  }
 0x86b   :  { %4019 = vmatprep.subr.bf16.mxu0 %v6483_v3  ;;  %4060 = vmatprep.subr.bf16.mxu1 %v6485_v54  ;;  %v7350_v3 = vld [vmem:[%s12000_s13 + $0xc4] ss:$16 sps:$4 sm:$0xff]   ;;  %v7353_v54 = vld [vmem:[%s12000_s13 + $0xcc] ss:$16 sps:$4 sm:$0xff]  }
 0x86e   :  { %4020 = vmatpush1.bf16.msra.mxu0 %v6482_v26  ;;  %4061 = vmatpush1.bf16.msra.mxu1 %v6484_v51  ;;  %v7348_v26 = vld [vmem:[%s12000_s13 + $0xc0] ss:$16 sps:$4 sm:$0xff]   ;;  %v7351_v51 = vld [vmem:[%s12000_s13 + $0xc8] ss:$16 sps:$4 sm:$0xff]  }
 0x86f   :  { %4021 = vmatprep.subr.bf16.mxu0 %v6491_v7  ;;  %4062 = vmatprep.subr.bf16.mxu1 %v6493_v53  ;;  %v7362_v7 = vld [vmem:[%s12000_s13 + $0x104] ss:$16 sps:$4 sm:$0xff]   ;;  %v7365_v53 = vld [vmem:[%s12000_s13 + $0x10c] ss:$16 sps:$4 sm:$0xff]  }
 0x872   :  { %4022 = vmatpush1.bf16.msra.mxu0 %v6490_v12  ;;  %4063 = vmatpush1.bf16.msra.mxu1 %v6492_v50  ;;  %v7360_v12 = vld [vmem:[%s12000_s13 + $0x100] ss:$16 sps:$4 sm:$0xff]   ;;  %v7363_v50 = vld [vmem:[%s12000_s13 + $0x108] ss:$16 sps:$4 sm:$0xff]  }
 0x873   :  { %4023 = vmatprep.subr.bf16.mxu0 %v6499_v2  ;;  %4064 = vmatprep.subr.bf16.mxu1 %v6501_v34  ;;  %v7374_v2 = vld [vmem:[%s12000_s13 + $0x144] ss:$16 sps:$4 sm:$0xff]   ;;  %v7377_v34 = vld [vmem:[%s12000_s13 + $0x14c] ss:$16 sps:$4 sm:$0xff]  }
 0x876   :  { %4024 = vmatpush1.bf16.msra.mxu0 %v6498_v19  ;;  %4065 = vmatpush1.bf16.msra.mxu1 %v6500_v49  ;;  %v7372_v19 = vld [vmem:[%s12000_s13 + $0x140] ss:$16 sps:$4 sm:$0xff]   ;;  %v7375_v49 = vld [vmem:[%s12000_s13 + $0x148] ss:$16 sps:$4 sm:$0xff]  }
 0x877   :  { %4025 = vmatprep.subr.bf16.mxu0 %v6507_v55  ;;  %4066 = vmatprep.subr.bf16.mxu1 %v6509_v22  ;;  %v7386_v55 = vld [vmem:[%s12000_s13 + $0x184] ss:$16 sps:$4 sm:$0xff]   ;;  %v7389_v22 = vld [vmem:[%s12000_s13 + $0x18c] ss:$16 sps:$4 sm:$0xff]  }
 0x87a   :  { %4026 = vmatpush1.bf16.msra.mxu0 %v6506_v62  ;;  %4067 = vmatpush1.bf16.msra.mxu1 %v6508_v24  ;;  %v7384_v62 = vld [vmem:[%s12000_s13 + $0x180] ss:$16 sps:$4 sm:$0xff]   ;;  %v7387_v24 = vld [vmem:[%s12000_s13 + $0x188] ss:$16 sps:$4 sm:$0xff]  }
 0x87b   :  { %4027 = vmatprep.subr.bf16.mxu0 %v6515_v40  ;;  %4068 = vmatprep.subr.bf16.mxu1 %v6517_v9  ;;  %v7398_v40 = vld [vmem:[%s12000_s13 + $0x1c4] ss:$16 sps:$4 sm:$0xff]   ;;  %v7401_v9 = vld [vmem:[%s12000_s13 + $0x1cc] ss:$16 sps:$4 sm:$0xff]  }
 0x87e   :  { %4028 = vmatpush1.bf16.msra.mxu0 %v6514_v56  ;;  %4069 = vmatpush1.bf16.msra.mxu1 %v6516_v63  ;;  %v7396_v56 = vld [vmem:[%s12000_s13 + $0x1c0] ss:$16 sps:$4 sm:$0xff]   ;;  %v7399_v63 = vld [vmem:[%s12000_s13 + $0x1c8] ss:$16 sps:$4 sm:$0xff]  }
 0x87f   :  { %4029 = vmatprep.subr.bf16.mxu0 %v6523_v60  ;;  %4070 = vmatprep.subr.bf16.mxu1 %v6525_v41  ;;  %v7404_v60 = vld [vmem:[%s12000_s13 + $0x1e4] ss:$16 sps:$4 sm:$0xff]   ;;  %v7407_v41 = vld [vmem:[%s12000_s13 + $0x1ec] ss:$16 sps:$4 sm:$0xff]  }
 0x882   :  { %4030 = vmatpush1.bf16.msra.mxu0 %v6522_v59  ;;  %4071 = vmatpush1.bf16.msra.mxu1 %v6524_v39  ;;  %v7402_v59 = vld [vmem:[%s12000_s13 + $0x1e0] ss:$16 sps:$4 sm:$0xff]   ;;  %v7405_v39 = vld [vmem:[%s12000_s13 + $0x1e8] ss:$16 sps:$4 sm:$0xff]  }
 0x883   :  { %5655 = vmatprep.subr.bf16.mxu0 %v7314_v17  ;;  %5819 = vmatprep.subr.bf16.mxu1 %v7317_v6  ;;  %v7410_v17 = vld [vmem:[%s12000_s13 + $0x204] ss:$16 sps:$4 sm:$0xff]   ;;  %v7413_v6 = vld [vmem:[%s12000_s13 + $0x20c] ss:$16 sps:$4 sm:$0xff]  }
 0x885   :  { %6543 = vmatmul.mubr.msk.bf16.vlgmr.msra.gmra.mrb[68].mxu0 %vm10858_vm8, %v10900_v61  ;;  %6549 = vmatmul.mubr.msk.bf16.vlgmr.msra.gmra.mrb[84].mxu1 %vm10858_vm8, %v10900_v61  ;;  %v7324_v61 = vld [vmem:[%s12000_s13 + $0x40] ss:$16 sps:$4 sm:$0xff]  }
 0x886   :  { %5656 = vmatpush1.bf16.msra.mxu0 %v7312_v0  ;;  %5820 = vmatpush1.bf16.msra.mxu1 %v7315_v46  ;;  %v11275_v0 = vld [vmem:[%s12001_s12] sm:$0xff]  ;;  %v12631_v46 = vld [vmem:[#allocation3_spill] sm:$0xff] }
 0x887   :  { %5657 = vmatprep.subr.bf16.mxu0 %v7320_v31  ;;  %5821 = vmatprep.subr.bf16.mxu1 %v7323_v47  ;;  %v3240_v31 = vrot.slane %v11275_v0, %v12631_v46  ;;  %v12632_v47 = vld [vmem:[#allocation4_spill] sm:$0xff] }
 0x88a   :  { %5658 = vmatpush1.bf16.msra.mxu0 %v7318_v25  ;;  %5822 = vmatpush1.bf16.msra.mxu1 %v7321_v16  ;;  %v3244_v25 = vrot.slane %v11275_v0, %v12632_v47  ;;  %v12633_v16 = vld [vmem:[#allocation6_spill] sm:$0xff] }
 0x88b   :  { %5659 = vmatprep.subr.bf16.mxu0 %v7326_v58  ;;  %5823 = vmatprep.subr.bf16.mxu1 %v7329_v33  ;;  %v3252_v58 = vrot.slane %v11275_v0, %v12633_v16 }
 0x88e   :  { %5660 = vmatpush1.bf16.msra.mxu0 %v7324_v61  ;;  %5824 = vmatpush1.bf16.msra.mxu1 %v7327_v15 }
 0x88f   :  { %5661 = vmatprep.subr.bf16.mxu0 %v7332_v36  ;;  %5825 = vmatprep.subr.bf16.mxu1 %v7335_v27 }
 0x892   :  { %5662 = vmatpush1.bf16.msra.mxu0 %v7330_v42  ;;  %5826 = vmatpush1.bf16.msra.mxu1 %v7333_v13 }
 0x893   :  { %5663 = vmatprep.subr.bf16.mxu0 %v7338_v44  ;;  %5827 = vmatprep.subr.bf16.mxu1 %v7341_v4 }
 0x896   :  { %5664 = vmatpush1.bf16.msra.mxu0 %v7336_v1  ;;  %5828 = vmatpush1.bf16.msra.mxu1 %v7339_v5 }
 0x897   :  { %5665 = vmatprep.subr.bf16.mxu0 %v7344_v18  ;;  %5829 = vmatprep.subr.bf16.mxu1 %v7347_v52 }
 0x89a   :  { %5666 = vmatpush1.bf16.msra.mxu0 %v7342_v45  ;;  %5830 = vmatpush1.bf16.msra.mxu1 %v7345_v57 }
 0x89b   :  { %5667 = vmatprep.subr.bf16.mxu0 %v7350_v3  ;;  %5831 = vmatprep.subr.bf16.mxu1 %v7353_v54  ;;  %v7408_v3 = vld [vmem:[%s12000_s13 + $0x200] ss:$16 sps:$4 sm:$0xff]   ;;  %v7411_v54 = vld [vmem:[%s12000_s13 + $0x208] ss:$16 sps:$4 sm:$0xff]  }
 0x89e   :  { %5668 = vmatpush1.bf16.msra.mxu0 %v7348_v26  ;;  %5832 = vmatpush1.bf16.msra.mxu1 %v7351_v51  ;;  %v7416_v51 = vld [vmem:[%s12000_s13 + $0x224] ss:$16 sps:$4 sm:$0xff]  }
 0x89f   :  { %5669 = vmatprep.subr.bf16.mxu0 %v7356_v11  ;;  %5833 = vmatprep.subr.bf16.mxu1 %v7359_v20  ;;  %v7419_v11 = vld [vmem:[%s12000_s13 + $0x22c] ss:$16 sps:$4 sm:$0xff]  }
 0x8a2   :  { %5670 = vmatpush1.bf16.msra.mxu0 %v7354_v23  ;;  %5834 = vmatpush1.bf16.msra.mxu1 %v7357_v35  ;;  %v7414_v23 = vld [vmem:[%s12000_s13 + $0x220] ss:$16 sps:$4 sm:$0xff]   ;;  %v7417_v35 = vld [vmem:[%s12000_s13 + $0x228] ss:$16 sps:$4 sm:$0xff]  }
 0x8a3   :  { %5671 = vmatprep.subr.bf16.mxu0 %v7362_v7  ;;  %5835 = vmatprep.subr.bf16.mxu1 %v7365_v53  ;;  %v7422_v7 = vld [vmem:[%s12000_s13 + $0x244] ss:$16 sps:$4 sm:$0xff]   ;;  %v7425_v53 = vld [vmem:[%s12000_s13 + $0x24c] ss:$16 sps:$4 sm:$0xff]  }
 0x8a6   :  { %5672 = vmatpush1.bf16.msra.mxu0 %v7360_v12  ;;  %5836 = vmatpush1.bf16.msra.mxu1 %v7363_v50  ;;  %v7420_v12 = vld [vmem:[%s12000_s13 + $0x240] ss:$16 sps:$4 sm:$0xff]   ;;  %v7423_v50 = vld [vmem:[%s12000_s13 + $0x248] ss:$16 sps:$4 sm:$0xff]  }
 0x8a7   :  { %5673 = vmatprep.subr.bf16.mxu0 %v7368_v28  ;;  %5837 = vmatprep.subr.bf16.mxu1 %v7371_v37  ;;  %v7428_v28 = vld [vmem:[%s12000_s13 + $0x264] ss:$16 sps:$4 sm:$0xff]   ;;  %v7431_v37 = vld [vmem:[%s12000_s13 + $0x26c] ss:$16 sps:$4 sm:$0xff]  }
 0x8aa   :  { %5674 = vmatpush1.bf16.msra.mxu0 %v7366_v29  ;;  %5838 = vmatpush1.bf16.msra.mxu1 %v7369_v32  ;;  %v7426_v29 = vld [vmem:[%s12000_s13 + $0x260] ss:$16 sps:$4 sm:$0xff]   ;;  %v7429_v32 = vld [vmem:[%s12000_s13 + $0x268] ss:$16 sps:$4 sm:$0xff]  }
 0x8ab   :  { %5675 = vmatprep.subr.bf16.mxu0 %v7374_v2  ;;  %5839 = vmatprep.subr.bf16.mxu1 %v7377_v34  ;;  %v7434_v2 = vld [vmem:[%s12000_s13 + $0x284] ss:$16 sps:$4 sm:$0xff]   ;;  %v7437_v34 = vld [vmem:[%s12000_s13 + $0x28c] ss:$16 sps:$4 sm:$0xff]  }
 0x8ae   :  { %5676 = vmatpush1.bf16.msra.mxu0 %v7372_v19  ;;  %5840 = vmatpush1.bf16.msra.mxu1 %v7375_v49  ;;  %v7432_v19 = vld [vmem:[%s12000_s13 + $0x280] ss:$16 sps:$4 sm:$0xff]   ;;  %v7435_v49 = vld [vmem:[%s12000_s13 + $0x288] ss:$16 sps:$4 sm:$0xff]  }
 0x8af   :  { %5677 = vmatprep.subr.bf16.mxu0 %v7380_v30  ;;  %5841 = vmatprep.subr.bf16.mxu1 %v7383_v14  ;;  %v7440_v30 = vld [vmem:[%s12000_s13 + $0x2a4] ss:$16 sps:$4 sm:$0xff]   ;;  %v7443_v14 = vld [vmem:[%s12000_s13 + $0x2ac] ss:$16 sps:$4 sm:$0xff]  }
 0x8b2   :  { %5678 = vmatpush1.bf16.msra.mxu0 %v7378_v43  ;;  %5842 = vmatpush1.bf16.msra.mxu1 %v7381_v38  ;;  %v7438_v43 = vld [vmem:[%s12000_s13 + $0x2a0] ss:$16 sps:$4 sm:$0xff]   ;;  %v7441_v38 = vld [vmem:[%s12000_s13 + $0x2a8] ss:$16 sps:$4 sm:$0xff]  }
 0x8b3   :  { %5679 = vmatprep.subr.bf16.mxu0 %v7386_v55  ;;  %5843 = vmatprep.subr.bf16.mxu1 %v7389_v22  ;;  %v7446_v55 = vld [vmem:[%s12000_s13 + $0x2c4] ss:$16 sps:$4 sm:$0xff]   ;;  %v7449_v22 = vld [vmem:[%s12000_s13 + $0x2cc] ss:$16 sps:$4 sm:$0xff]  }
 0x8b6   :  { %5680 = vmatpush1.bf16.msra.mxu0 %v7384_v62  ;;  %5844 = vmatpush1.bf16.msra.mxu1 %v7387_v24  ;;  %v7444_v62 = vld [vmem:[%s12000_s13 + $0x2c0] ss:$16 sps:$4 sm:$0xff]   ;;  %v7447_v24 = vld [vmem:[%s12000_s13 + $0x2c8] ss:$16 sps:$4 sm:$0xff]  }
 0x8b7   :  { %5681 = vmatprep.subr.bf16.mxu0 %v7392_v10  ;;  %5845 = vmatprep.subr.bf16.mxu1 %v7395_v48  ;;  %v7452_v10 = vld [vmem:[%s12000_s13 + $0x2e4] ss:$16 sps:$4 sm:$0xff]   ;;  %v7455_v48 = vld [vmem:[%s12000_s13 + $0x2ec] ss:$16 sps:$4 sm:$0xff]  }
 0x8ba   :  { %5682 = vmatpush1.bf16.msra.mxu0 %v7390_v8  ;;  %5846 = vmatpush1.bf16.msra.mxu1 %v7393_v21  ;;  %v7450_v8 = vld [vmem:[%s12000_s13 + $0x2e0] ss:$16 sps:$4 sm:$0xff]   ;;  %v7453_v21 = vld [vmem:[%s12000_s13 + $0x2e8] ss:$16 sps:$4 sm:$0xff]  }
 0x8bb   :  { %5683 = vmatprep.subr.bf16.mxu0 %v7398_v40  ;;  %5847 = vmatprep.subr.bf16.mxu1 %v7401_v9  ;;  %v7458_v40 = vld [vmem:[%s12000_s13 + $0x304] ss:$16 sps:$4 sm:$0xff]   ;;  %v7461_v9 = vld [vmem:[%s12000_s13 + $0x30c] ss:$16 sps:$4 sm:$0xff]  }
 0x8be   :  { %5684 = vmatpush1.bf16.msra.mxu0 %v7396_v56  ;;  %5848 = vmatpush1.bf16.msra.mxu1 %v7399_v63  ;;  %v7456_v56 = vld [vmem:[%s12000_s13 + $0x300] ss:$16 sps:$4 sm:$0xff]   ;;  %v7459_v63 = vld [vmem:[%s12000_s13 + $0x308] ss:$16 sps:$4 sm:$0xff]  }
 0x8bf   :  { %5685 = vmatprep.subr.bf16.mxu0 %v7404_v60  ;;  %5849 = vmatprep.subr.bf16.mxu1 %v7407_v41  ;;  %v7464_v60 = vld [vmem:[%s12000_s13 + $0x324] ss:$16 sps:$4 sm:$0xff]   ;;  %v7467_v41 = vld [vmem:[%s12000_s13 + $0x32c] ss:$16 sps:$4 sm:$0xff]  }
 0x8c2   :  { %5686 = vmatpush1.bf16.msra.mxu0 %v7402_v59  ;;  %5850 = vmatpush1.bf16.msra.mxu1 %v7405_v39  ;;  %v7462_v59 = vld [vmem:[%s12000_s13 + $0x320] ss:$16 sps:$4 sm:$0xff]   ;;  %v7465_v39 = vld [vmem:[%s12000_s13 + $0x328] ss:$16 sps:$4 sm:$0xff]  }
 0x8c3   :  { %5696 = vmatprep.subr.bf16.mxu0 %v7410_v17  ;;  %5860 = vmatprep.subr.bf16.mxu1 %v7413_v6  ;;  %v7470_v17 = vld [vmem:[%s12000_s13 + $0x344] ss:$16 sps:$4 sm:$0xff]   ;;  %v7473_v6 = vld [vmem:[%s12000_s13 + $0x34c] ss:$16 sps:$4 sm:$0xff]  }
 0x918   :  { %v3951_v33 = vpop.f32.mrb[64].mxu0  ;;  %v11283_v61 = vpop.f32.mrb[80].mxu1 }
 0x919   :  { %v3952_v15 = vadd.f32 %v3951_v33, %v3240_v31  ;;  %v3953_v36 = vpop.f32.mrb[65].mxu0  ;;  %v3994_v27 = vpop.f32.mrb[81].mxu1  ;;  %v7468_v31 = vld [vmem:[%s12000_s13 + $0x340] ss:$16 sps:$4 sm:$0xff]   ;;  %v7479_v33 = vld [vmem:[%s12000_s13 + $0x36c] ss:$16 sps:$4 sm:$0xff]  }
 0x91a   :  { %v3954_v42 = vadd.f32 %v3953_v36, %v3244_v25  ;;  %v3995_v13 = vadd.f32 %v3994_v27, %v3252_v58  ;;  %v3955_v44 = vpop.f32.mrb[66].mxu0  ;;  %v3996_v4 = vpop.f32.mrb[82].mxu1  ;;  %v7471_v25 = vld [vmem:[%s12000_s13 + $0x348] ss:$16 sps:$4 sm:$0xff]   ;;  %v7476_v58 = vld [vmem:[%s12000_s13 + $0x364] ss:$16 sps:$4 sm:$0xff]  }
 0x91b   :  { %v4081_v1 = vmax.f32 %v3952_v15, 0.0  ;;  %v3956_v5 = vpop.f32.mrb[67].mxu0  ;;  %v3997_v18 = vpop.f32.mrb[83].mxu1  ;;  %v7474_v15 = vld [vmem:[%s12000_s13 + $0x360] ss:$16 sps:$4 sm:$0xff]  }
 0x91c   :  { %v4082_v52 = vmax.f32 %v3954_v42, 0.0  ;;  %v4084_v45 = vmax.f32 %v3995_v13, 0.0  ;;  %v7477_v36 = vld [vmem:[%s12000_s13 + $0x368] ss:$16 sps:$4 sm:$0xff]   ;;  %v7482_v27 = vld [vmem:[%s12000_s13 + $0x384] ss:$16 sps:$4 sm:$0xff]  }
 0x91d   :  { %v4089_v26 = vpack.c.bf16 %v4081_v1, %v4081_v1  ;;  %v7485_v42 = vld [vmem:[%s12000_s13 + $0x38c] ss:$16 sps:$4 sm:$0xff]   ;;  %v7480_v13 = vld [vmem:[%s12000_s13 + $0x380] ss:$16 sps:$4 sm:$0xff]   ;;  %v7483_v44 = vld [vmem:[%s12000_s13 + $0x388] ss:$16 sps:$4 sm:$0xff]  }
 0x91e   :  { %v4090_v57 = vpack.c.bf16 %v4082_v52, %v4082_v52  ;;  %v4092_v20 = vpack.c.bf16 %v4084_v45, %v4084_v45  ;;  %v7488_v4 = vld [vmem:[%s12000_s13 + $0x3a4] ss:$16 sps:$4 sm:$0xff]   ;;  %v7491_v1 = vld [vmem:[%s12000_s13 + $0x3ac] ss:$16 sps:$4 sm:$0xff]   ;;  %v7486_v5 = vld [vmem:[%s12000_s13 + $0x3a0] ss:$16 sps:$4 sm:$0xff]  }
 0x91f   :  { %v7489_v18 = vld [vmem:[%s12000_s13 + $0x3a8] ss:$16 sps:$4 sm:$0xff]  }
 0x920   :  { %5687 = vmatprep.mubr.bf16.mxu0 %v4090_v57  ;;  %5851 = vmatprep.mubr.bf16.mxu1 %v4090_v57  ;;  %v12634_v52 = vld [vmem:[#allocation5_spill] sm:$0xff]  ;;  %v7494_v57 = vld [vmem:[%s12000_s13 + $0x3c4] ss:$16 sps:$4 sm:$0xff]  }
 0x921   :  { %5688 = vmatmul.mubr.bf16.vlgmr.msra.gmra.mrb[72].mxu0 %v4089_v26  ;;  %5852 = vmatmul.mubr.bf16.vlgmr.msra.gmra.mrb[88].mxu1 %v4089_v26  ;;  %v3248_v45 = vrot.slane %v11275_v0, %v12634_v52 }
 0x922   :  { %5697 = vmatpush1.bf16.msra.mxu0 %v7408_v3  ;;  %5861 = vmatpush1.bf16.msra.mxu1 %v7411_v54  ;;  %v7497_v3 = vld [vmem:[%s12000_s13 + $0x3cc] ss:$16 sps:$4 sm:$0xff]   ;;  %v12635_v54 = vld [vmem:[#allocation2_spill] sm:$0xff] }
 0x923   :  { %5728 = vmatprep.mubr.bf16.mxu0 %v4092_v20  ;;  %5892 = vmatprep.mubr.bf16.mxu1 %v4092_v20  ;;  %v12636_v26 = vsub.s32 5, %v12635_v54  ;;  %v7495_v20 = vld [vmem:[%s12000_s13 + $0x3c8] ss:$16 sps:$4 sm:$0xff]  }
 0x924   :  { %5698 = vmatprep.subr.bf16.mxu0 %v7416_v51  ;;  %5862 = vmatprep.subr.bf16.mxu1 %v7419_v11  ;;  %v7492_v11 = vld [vmem:[%s12000_s13 + $0x3c0] ss:$16 sps:$4 sm:$0xff]  }
 0x925   :  { %v3260_v51 = vrot.slane %v11275_v0, %v12636_v26  ;;  %v7560_v26 = vld [vmem:[%s12000_s13 + $0x524] ss:$16 sps:$4 sm:$0xff]  }
 0x926   :  { %5699 = vmatpush1.bf16.msra.mxu0 %v7414_v23  ;;  %5863 = vmatpush1.bf16.msra.mxu1 %v7417_v35  ;;  %v3993_v23 = vadd.f32 %v11283_v61, %v3248_v45  ;;  %v7500_v35 = vld [vmem:[%s12000_s13 + $0x3e4] ss:$16 sps:$4 sm:$0xff]   ;;  %v7498_v61 = vld [vmem:[%s12000_s13 + $0x3e0] ss:$16 sps:$4 sm:$0xff]   ;;  %v7557_v45 = vld [vmem:[%s12000_s13 + $0x50c] ss:$16 sps:$4 sm:$0xff]  }
 0x927   :  { %5700 = vmatprep.subr.bf16.mxu0 %v7422_v7  ;;  %5864 = vmatprep.subr.bf16.mxu1 %v7425_v53  ;;  %v7503_v7 = vld [vmem:[%s12000_s13 + $0x3ec] ss:$16 sps:$4 sm:$0xff]  }
 0x92a   :  { %5701 = vmatpush1.bf16.msra.mxu0 %v7420_v12  ;;  %5865 = vmatpush1.bf16.msra.mxu1 %v7423_v50 }
 0x92b   :  { %5702 = vmatprep.subr.bf16.mxu0 %v7428_v28  ;;  %5866 = vmatprep.subr.bf16.mxu1 %v7431_v37 }
 0x92e   :  { %5703 = vmatpush1.bf16.msra.mxu0 %v7426_v29  ;;  %5867 = vmatpush1.bf16.msra.mxu1 %v7429_v32 }
 0x92f   :  { %5704 = vmatprep.subr.bf16.mxu0 %v7434_v2  ;;  %5868 = vmatprep.subr.bf16.mxu1 %v7437_v34  ;;  %v7501_v2 = vld [vmem:[%s12000_s13 + $0x3e8] ss:$16 sps:$4 sm:$0xff]   ;;  %v7506_v34 = vld [vmem:[%s12000_s13 + $0x404] ss:$16 sps:$4 sm:$0xff]  }
 0x932   :  { %5705 = vmatpush1.bf16.msra.mxu0 %v7432_v19  ;;  %5869 = vmatpush1.bf16.msra.mxu1 %v7435_v49  ;;  %v4083_v19 = vmax.f32 %v3993_v23, 0.0  ;;  %v7566_v23 = vld [vmem:[%s12000_s13 + $0x544] ss:$16 sps:$4 sm:$0xff]  }
 0x933   :  { %5706 = vmatprep.subr.bf16.mxu0 %v7440_v30  ;;  %5870 = vmatprep.subr.bf16.mxu1 %v7443_v14  ;;  %v7509_v14 = vld [vmem:[%s12000_s13 + $0x40c] ss:$16 sps:$4 sm:$0xff]  }
 0x936   :  { %5707 = vmatpush1.bf16.msra.mxu0 %v7438_v43  ;;  %5871 = vmatpush1.bf16.msra.mxu1 %v7441_v38  ;;  %v7504_v38 = vld [vmem:[%s12000_s13 + $0x400] ss:$16 sps:$4 sm:$0xff]  }
 0x937   :  { %5708 = vmatprep.subr.bf16.mxu0 %v7446_v55  ;;  %5872 = vmatprep.subr.bf16.mxu1 %v7449_v22  ;;  %v4091_v55 = vpack.c.bf16 %v4083_v19, %v4083_v19  ;;  %v7507_v22 = vld [vmem:[%s12000_s13 + $0x408] ss:$16 sps:$4 sm:$0xff]   ;;  %v7576_v19 = vld [vmem:[%s12000_s13 + $0x580] ss:$16 sps:$4 sm:$0xff]  }
 0x93a   :  { %5709 = vmatpush1.bf16.msra.mxu0 %v7444_v62  ;;  %5873 = vmatpush1.bf16.msra.mxu1 %v7447_v24  ;;  %v7512_v24 = vld [vmem:[%s12000_s13 + $0x424] ss:$16 sps:$4 sm:$0xff]  }
 0x93b   :  { %5710 = vmatprep.subr.bf16.mxu0 %v7452_v10  ;;  %5874 = vmatprep.subr.bf16.mxu1 %v7455_v48  ;;  %v7515_v10 = vld [vmem:[%s12000_s13 + $0x42c] ss:$16 sps:$4 sm:$0xff]   ;;  %v7510_v48 = vld [vmem:[%s12000_s13 + $0x420] ss:$16 sps:$4 sm:$0xff]  }
 0x93e   :  { %5711 = vmatpush1.bf16.msra.mxu0 %v7450_v8  ;;  %5875 = vmatpush1.bf16.msra.mxu1 %v7453_v21  ;;  %v7513_v8 = vld [vmem:[%s12000_s13 + $0x428] ss:$16 sps:$4 sm:$0xff]   ;;  %v7518_v21 = vld [vmem:[%s12000_s13 + $0x444] ss:$16 sps:$4 sm:$0xff]  }
 0x93f   :  { %5712 = vmatprep.subr.bf16.mxu0 %v7458_v40  ;;  %5876 = vmatprep.subr.bf16.mxu1 %v7461_v9  ;;  %v7521_v40 = vld [vmem:[%s12000_s13 + $0x44c] ss:$16 sps:$4 sm:$0xff]   ;;  %v7516_v9 = vld [vmem:[%s12000_s13 + $0x440] ss:$16 sps:$4 sm:$0xff]  }
 0x942   :  { %5713 = vmatpush1.bf16.msra.mxu0 %v7456_v56  ;;  %5877 = vmatpush1.bf16.msra.mxu1 %v7459_v63  ;;  %v7519_v56 = vld [vmem:[%s12000_s13 + $0x448] ss:$16 sps:$4 sm:$0xff]   ;;  %v7524_v63 = vld [vmem:[%s12000_s13 + $0x464] ss:$16 sps:$4 sm:$0xff]  }
 0x943   :  { %5714 = vmatprep.subr.bf16.mxu0 %v7464_v60  ;;  %5878 = vmatprep.subr.bf16.mxu1 %v7467_v41  ;;  %v7527_v60 = vld [vmem:[%s12000_s13 + $0x46c] ss:$16 sps:$4 sm:$0xff]   ;;  %v7522_v41 = vld [vmem:[%s12000_s13 + $0x460] ss:$16 sps:$4 sm:$0xff]  }
 0x946   :  { %5715 = vmatpush1.bf16.msra.mxu0 %v7462_v59  ;;  %5879 = vmatpush1.bf16.msra.mxu1 %v7465_v39  ;;  %v7525_v59 = vld [vmem:[%s12000_s13 + $0x468] ss:$16 sps:$4 sm:$0xff]   ;;  %v7530_v39 = vld [vmem:[%s12000_s13 + $0x484] ss:$16 sps:$4 sm:$0xff]  }
 0x947   :  { %5716 = vmatprep.subr.bf16.mxu0 %v7470_v17  ;;  %5880 = vmatprep.subr.bf16.mxu1 %v7473_v6  ;;  %v7533_v17 = vld [vmem:[%s12000_s13 + $0x48c] ss:$16 sps:$4 sm:$0xff]   ;;  %v7528_v6 = vld [vmem:[%s12000_s13 + $0x480] ss:$16 sps:$4 sm:$0xff]  }
 0x94a   :  { %5717 = vmatpush1.bf16.msra.mxu0 %v7468_v31  ;;  %5881 = vmatpush1.bf16.msra.mxu1 %v7471_v25  ;;  %v7531_v31 = vld [vmem:[%s12000_s13 + $0x488] ss:$16 sps:$4 sm:$0xff]   ;;  %v7536_v25 = vld [vmem:[%s12000_s13 + $0x4a4] ss:$16 sps:$4 sm:$0xff]  }
 0x94b   :  { %5718 = vmatprep.subr.bf16.mxu0 %v7476_v58  ;;  %5882 = vmatprep.subr.bf16.mxu1 %v7479_v33  ;;  %v7539_v58 = vld [vmem:[%s12000_s13 + $0x4ac] ss:$16 sps:$4 sm:$0xff]   ;;  %v7534_v33 = vld [vmem:[%s12000_s13 + $0x4a0] ss:$16 sps:$4 sm:$0xff]  }
 0x94e   :  { %5719 = vmatpush1.bf16.msra.mxu0 %v7474_v15  ;;  %5883 = vmatpush1.bf16.msra.mxu1 %v7477_v36  ;;  %v7537_v15 = vld [vmem:[%s12000_s13 + $0x4a8] ss:$16 sps:$4 sm:$0xff]   ;;  %v7542_v36 = vld [vmem:[%s12000_s13 + $0x4c4] ss:$16 sps:$4 sm:$0xff]  }
 0x94f   :  { %5720 = vmatprep.subr.bf16.mxu0 %v7482_v27  ;;  %5884 = vmatprep.subr.bf16.mxu1 %v7485_v42  ;;  %v7545_v27 = vld [vmem:[%s12000_s13 + $0x4cc] ss:$16 sps:$4 sm:$0xff]   ;;  %v7540_v42 = vld [vmem:[%s12000_s13 + $0x4c0] ss:$16 sps:$4 sm:$0xff]  }
 0x952   :  { %5721 = vmatpush1.bf16.msra.mxu0 %v7480_v13  ;;  %5885 = vmatpush1.bf16.msra.mxu1 %v7483_v44  ;;  %v7543_v13 = vld [vmem:[%s12000_s13 + $0x4c8] ss:$16 sps:$4 sm:$0xff]   ;;  %v7548_v44 = vld [vmem:[%s12000_s13 + $0x4e4] ss:$16 sps:$4 sm:$0xff]  }
 0x953   :  { %5722 = vmatprep.subr.bf16.mxu0 %v7488_v4  ;;  %5886 = vmatprep.subr.bf16.mxu1 %v7491_v1  ;;  %v7546_v4 = vld [vmem:[%s12000_s13 + $0x4e0] ss:$16 sps:$4 sm:$0xff]   ;;  %v7551_v1 = vld [vmem:[%s12000_s13 + $0x4ec] ss:$16 sps:$4 sm:$0xff]  }
 0x956   :  { %5723 = vmatpush1.bf16.msra.mxu0 %v7486_v5  ;;  %5887 = vmatpush1.bf16.msra.mxu1 %v7489_v18  ;;  %v7549_v5 = vld [vmem:[%s12000_s13 + $0x4e8] ss:$16 sps:$4 sm:$0xff]   ;;  %v7554_v18 = vld [vmem:[%s12000_s13 + $0x504] ss:$16 sps:$4 sm:$0xff]  }
 0x957   :  { %5724 = vmatprep.subr.bf16.mxu0 %v7494_v57  ;;  %5888 = vmatprep.subr.bf16.mxu1 %v7497_v3  ;;  %v7552_v57 = vld [vmem:[%s12000_s13 + $0x500] ss:$16 sps:$4 sm:$0xff]   ;;  %v7555_v3 = vld [vmem:[%s12000_s13 + $0x508] ss:$16 sps:$4 sm:$0xff]  }
 0x958   :  { %v11471_v53 = vpop.f32.mrb[68].mxu0  ;;  %v11473_v12 = vpop.f32.mrb[84].mxu1 }
 0x959   :  { %v4035_v50 = vpop.f32.mrb[69].mxu0  ;;  %v11475_v28 = vpop.f32.mrb[85].mxu1 }
 0x95a   :  { %v4036_v37 = vadd.f32 %v4035_v50, %v3260_v51  ;;  %v4037_v29 = vpop.f32.mrb[70].mxu0  ;;  %v4078_v32 = vpop.f32.mrb[86].mxu1  ;;  %5725 = vmatpush1.bf16.msra.mxu0 %v7492_v11  ;;  %5889 = vmatpush1.bf16.msra.mxu1 %v7495_v20  ;;  %v7563_v51 = vld [vmem:[%s12000_s13 + $0x52c] ss:$16 sps:$4 sm:$0xff]   ;;  %v7558_v11 = vld [vmem:[%s12000_s13 + $0x520] ss:$16 sps:$4 sm:$0xff]  }
 0x95b   :  { %v4038_v49 = vpop.f32.mrb[71].mxu0  ;;  %v4079_v30 = vpop.f32.mrb[87].mxu1  ;;  %5726 = vmatprep.subr.bf16.mxu0 %v7500_v35  ;;  %5890 = vmatprep.subr.bf16.mxu1 %v7503_v7  ;;  %v7561_v20 = vld [vmem:[%s12000_s13 + $0x528] ss:$16 sps:$4 sm:$0xff]   ;;  %v7569_v35 = vld [vmem:[%s12000_s13 + $0x54c] ss:$16 sps:$4 sm:$0xff]  }
 0x95c   :  { %v4086_v43 = vmax.f32 %v4036_v37, 0.0  ;;  %v7564_v7 = vld [vmem:[%s12000_s13 + $0x540] ss:$16 sps:$4 sm:$0xff]   ;;  %v7567_v50 = vld [vmem:[%s12000_s13 + $0x548] ss:$16 sps:$4 sm:$0xff]  }
 0x95d   :  { %v7575_v37 = vld [vmem:[%s12000_s13 + $0x56c] ss:$16 sps:$4 sm:$0xff]   ;;  %v7570_v29 = vld [vmem:[%s12000_s13 + $0x560] ss:$16 sps:$4 sm:$0xff]   ;;  %v7573_v32 = vld [vmem:[%s12000_s13 + $0x568] ss:$16 sps:$4 sm:$0xff]  }
 0x95e   :  { %5727 = vmatpush1.bf16.msra.mxu0 %v7498_v61  ;;  %5891 = vmatpush1.bf16.msra.mxu1 %v7501_v2  ;;  %v4094_v62 = vpack.c.bf16 %v4086_v43, %v4086_v43  ;;  %v7572_v61 = vld [vmem:[%s12000_s13 + $0x564] ss:$16 sps:$4 sm:$0xff]   ;;  %v7579_v49 = vld [vmem:[%s12000_s13 + $0x588] ss:$16 sps:$4 sm:$0xff]   ;;  %v7582_v43 = vld [vmem:[%s12000_s13 + $0x5a0] ss:$16 sps:$4 sm:$0xff]  }
 0x95f   :  { %5737 = vmatprep.subr.bf16.mxu0 %v7506_v34  ;;  %5901 = vmatprep.subr.bf16.mxu1 %v7509_v14  ;;  %v7578_v2 = vld [vmem:[%s12000_s13 + $0x584] ss:$16 sps:$4 sm:$0xff]   ;;  %v7581_v34 = vld [vmem:[%s12000_s13 + $0x58c] ss:$16 sps:$4 sm:$0xff]  }
 0x960   :  { %v7584_v30 = vld [vmem:[%s12000_s13 + $0x5a4] ss:$16 sps:$4 sm:$0xff]   ;;  %v7587_v14 = vld [vmem:[%s12000_s13 + $0x5ac] ss:$16 sps:$4 sm:$0xff]  }
 0x961   :  { %5729 = vmatmul.mubr.bf16.vlgmr.msra.gmra.mrb[72].mxu0 %v4091_v55  ;;  %5893 = vmatmul.mubr.bf16.vlgmr.msra.gmra.mrb[88].mxu1 %v4091_v55 }
 0x962   :  { %5738 = vmatpush1.bf16.msra.mxu0 %v7504_v38  ;;  %5769 = vmatprep.mubr.bf16.mxu0 %v4094_v62  ;;  %v12637_v38 = vsub.s32 4, %v12635_v54 }
 0x963   :  { %5902 = vmatpush1.bf16.msra.mxu1 %v7507_v22  ;;  %5933 = vmatprep.mubr.bf16.mxu1 %v4094_v62  ;;  %v7585_v22 = vld [vmem:[%s12000_s13 + $0x5a8] ss:$16 sps:$4 sm:$0xff]   ;;  %v7590_v62 = vld [vmem:[%s12000_s13 + $0x5c4] ss:$16 sps:$4 sm:$0xff]  }
 0x964   :  { %5739 = vmatprep.subr.bf16.mxu0 %v7512_v24  ;;  %5903 = vmatprep.subr.bf16.mxu1 %v7515_v10  ;;  %v3256_v55 = vrot.slane %v11275_v0, %v12637_v38  ;;  %v7593_v24 = vld [vmem:[%s12000_s13 + $0x5cc] ss:$16 sps:$4 sm:$0xff]   ;;  %v12638_v10 = vsub.s32 7, %v12635_v54  ;;  %v7654_v38 = vld [vmem:[%s12000_s13 + $0x720] ss:$16 sps:$4 sm:$0xff]  }
 0x966   :  { %5740 = vmatpush1.bf16.msra.mxu0 %v7510_v48  ;;  %v3268_v48 = vrot.slane %v11275_v0, %v12638_v10  ;;  %v7663_v10 = vld [vmem:[%s12000_s13 + $0x748] ss:$16 sps:$4 sm:$0xff]  }
 0x967   :  { %5904 = vmatpush1.bf16.msra.mxu1 %v7513_v8  ;;  %5741 = vmatprep.subr.bf16.mxu0 %v7518_v21  ;;  %v7588_v8 = vld [vmem:[%s12000_s13 + $0x5c0] ss:$16 sps:$4 sm:$0xff]   ;;  %v4034_v21 = vadd.f32 %v11471_v53, %v3256_v55  ;;  %v7657_v55 = vld [vmem:[%s12000_s13 + $0x728] ss:$16 sps:$4 sm:$0xff]  }
 0x968   :  { %5905 = vmatprep.subr.bf16.mxu1 %v7521_v40  ;;  %v7591_v40 = vld [vmem:[%s12000_s13 + $0x5c8] ss:$16 sps:$4 sm:$0xff]   ;;  %v7594_v53 = vld [vmem:[%s12000_s13 + $0x5e0] ss:$16 sps:$4 sm:$0xff]  }
 0x96a   :  { %5742 = vmatpush1.bf16.msra.mxu0 %v7516_v9  ;;  %v7596_v9 = vld [vmem:[%s12000_s13 + $0x5e4] ss:$16 sps:$4 sm:$0xff]  }
 0x96b   :  { %5906 = vmatpush1.bf16.msra.mxu1 %v7519_v56  ;;  %5743 = vmatprep.subr.bf16.mxu0 %v7524_v63  ;;  %v7599_v56 = vld [vmem:[%s12000_s13 + $0x5ec] ss:$16 sps:$4 sm:$0xff]   ;;  %v4077_v63 = vadd.f32 %v11475_v28, %v3268_v48  ;;  %v7668_v48 = vld [vmem:[%s12000_s13 + $0x764] ss:$16 sps:$4 sm:$0xff]  }
 0x96c   :  { %5907 = vmatprep.subr.bf16.mxu1 %v7527_v60  ;;  %v4085_v60 = vmax.f32 %v4034_v21, 0.0  ;;  %v7605_v28 = vld [vmem:[%s12000_s13 + $0x60c] ss:$16 sps:$4 sm:$0xff]   ;;  %v7666_v21 = vld [vmem:[%s12000_s13 + $0x760] ss:$16 sps:$4 sm:$0xff]  }
 0x96e   :  { %5744 = vmatpush1.bf16.msra.mxu0 %v7522_v41  ;;  %v7597_v41 = vld [vmem:[%s12000_s13 + $0x5e8] ss:$16 sps:$4 sm:$0xff]  }
 0x96f   :  { %5908 = vmatpush1.bf16.msra.mxu1 %v7525_v59  ;;  %5745 = vmatprep.subr.bf16.mxu0 %v7530_v39  ;;  %v7602_v59 = vld [vmem:[%s12000_s13 + $0x604] ss:$16 sps:$4 sm:$0xff]   ;;  %v4088_v39 = vmax.f32 %v4077_v63, 0.0  ;;  %v7672_v63 = vld [vmem:[%s12000_s13 + $0x780] ss:$16 sps:$4 sm:$0xff]  }
 0x970   :  { %5909 = vmatprep.subr.bf16.mxu1 %v7533_v17  ;;  %v7600_v17 = vld [vmem:[%s12000_s13 + $0x600] ss:$16 sps:$4 sm:$0xff]  }
 0x972   :  { %5746 = vmatpush1.bf16.msra.mxu0 %v7528_v6  ;;  %v4093_v6 = vpack.c.bf16 %v4085_v60, %v4085_v60  ;;  %v7680_v60 = vld [vmem:[%s12000_s13 + $0x7a4] ss:$16 sps:$4 sm:$0xff]  }
 0x973   :  { %5910 = vmatpush1.bf16.msra.mxu1 %v7531_v31  ;;  %5747 = vmatprep.subr.bf16.mxu0 %v7536_v25  ;;  %v7603_v31 = vld [vmem:[%s12000_s13 + $0x608] ss:$16 sps:$4 sm:$0xff]   ;;  %v7608_v25 = vld [vmem:[%s12000_s13 + $0x624] ss:$16 sps:$4 sm:$0xff]  }
 0x974   :  { %5911 = vmatprep.subr.bf16.mxu1 %v7539_v58  ;;  %v4096_v58 = vpack.c.bf16 %v4088_v39, %v4088_v39 }
 0x976   :  { %5748 = vmatpush1.bf16.msra.mxu0 %v7534_v33  ;;  %v7611_v33 = vld [vmem:[%s12000_s13 + $0x62c] ss:$16 sps:$4 sm:$0xff]  }
 0x977   :  { %5912 = vmatpush1.bf16.msra.mxu1 %v7537_v15  ;;  %5749 = vmatprep.subr.bf16.mxu0 %v7542_v36  ;;  %v7606_v15 = vld [vmem:[%s12000_s13 + $0x620] ss:$16 sps:$4 sm:$0xff]   ;;  %v7609_v36 = vld [vmem:[%s12000_s13 + $0x628] ss:$16 sps:$4 sm:$0xff]  }
 0x978   :  { %5913 = vmatprep.subr.bf16.mxu1 %v7545_v27  ;;  %v7614_v27 = vld [vmem:[%s12000_s13 + $0x644] ss:$16 sps:$4 sm:$0xff]  }
 0x97a   :  { %5750 = vmatpush1.bf16.msra.mxu0 %v7540_v42  ;;  %v7617_v42 = vld [vmem:[%s12000_s13 + $0x64c] ss:$16 sps:$4 sm:$0xff]  }
 0x97b   :  { %5914 = vmatpush1.bf16.msra.mxu1 %v7543_v13  ;;  %5751 = vmatprep.subr.bf16.mxu0 %v7548_v44  ;;  %v7612_v13 = vld [vmem:[%s12000_s13 + $0x640] ss:$16 sps:$4 sm:$0xff]   ;;  %v7615_v44 = vld [vmem:[%s12000_s13 + $0x648] ss:$16 sps:$4 sm:$0xff]  }
 0x97c   :  { %5915 = vmatprep.subr.bf16.mxu1 %v7551_v1  ;;  %v7623_v1 = vld [vmem:[%s12000_s13 + $0x66c] ss:$16 sps:$4 sm:$0xff]  }
 0x97e   :  { %5752 = vmatpush1.bf16.msra.mxu0 %v7546_v4  ;;  %v7620_v4 = vld [vmem:[%s12000_s13 + $0x664] ss:$16 sps:$4 sm:$0xff]  }
 0x97f   :  { %5916 = vmatpush1.bf16.msra.mxu1 %v7549_v5  ;;  %5753 = vmatprep.subr.bf16.mxu0 %v7554_v18  ;;  %v7618_v5 = vld [vmem:[%s12000_s13 + $0x660] ss:$16 sps:$4 sm:$0xff]   ;;  %v7621_v18 = vld [vmem:[%s12000_s13 + $0x668] ss:$16 sps:$4 sm:$0xff]  }
 0x980   :  { %5917 = vmatprep.subr.bf16.mxu1 %v7557_v45  ;;  %v7626_v45 = vld [vmem:[%s12000_s13 + $0x684] ss:$16 sps:$4 sm:$0xff]  }
 0x982   :  { %5754 = vmatpush1.bf16.msra.mxu0 %v7552_v57  ;;  %v7629_v57 = vld [vmem:[%s12000_s13 + $0x68c] ss:$16 sps:$4 sm:$0xff]  }
 0x983   :  { %5918 = vmatpush1.bf16.msra.mxu1 %v7555_v3  ;;  %5755 = vmatprep.subr.bf16.mxu0 %v7560_v26  ;;  %v7624_v3 = vld [vmem:[%s12000_s13 + $0x680] ss:$16 sps:$4 sm:$0xff]   ;;  %v7627_v26 = vld [vmem:[%s12000_s13 + $0x688] ss:$16 sps:$4 sm:$0xff]  }
 0x984   :  { %5919 = vmatprep.subr.bf16.mxu1 %v7563_v51  ;;  %v7632_v51 = vld [vmem:[%s12000_s13 + $0x6a4] ss:$16 sps:$4 sm:$0xff]  }
 0x986   :  { %5756 = vmatpush1.bf16.msra.mxu0 %v7558_v11  ;;  %v7635_v11 = vld [vmem:[%s12000_s13 + $0x6ac] ss:$16 sps:$4 sm:$0xff]  }
 0x987   :  { %5920 = vmatpush1.bf16.msra.mxu1 %v7561_v20  ;;  %5757 = vmatprep.subr.bf16.mxu0 %v7566_v23  ;;  %v7630_v20 = vld [vmem:[%s12000_s13 + $0x6a0] ss:$16 sps:$4 sm:$0xff]   ;;  %v7633_v23 = vld [vmem:[%s12000_s13 + $0x6a8] ss:$16 sps:$4 sm:$0xff]  }
 0x988   :  { %5921 = vmatprep.subr.bf16.mxu1 %v7569_v35  ;;  %v7638_v35 = vld [vmem:[%s12000_s13 + $0x6c4] ss:$16 sps:$4 sm:$0xff]  }
 0x98a   :  { %5758 = vmatpush1.bf16.msra.mxu0 %v7564_v7  ;;  %v7641_v7 = vld [vmem:[%s12000_s13 + $0x6cc] ss:$16 sps:$4 sm:$0xff]  }
 0x98b   :  { %5922 = vmatpush1.bf16.msra.mxu1 %v7567_v50  ;;  %5759 = vmatprep.subr.bf16.mxu0 %v7572_v61  ;;  %v7636_v50 = vld [vmem:[%s12000_s13 + $0x6c0] ss:$16 sps:$4 sm:$0xff]   ;;  %v7639_v61 = vld [vmem:[%s12000_s13 + $0x6c8] ss:$16 sps:$4 sm:$0xff]  }
 0x98c   :  { %5923 = vmatprep.subr.bf16.mxu1 %v7575_v37  ;;  %v7644_v37 = vld [vmem:[%s12000_s13 + $0x6e4] ss:$16 sps:$4 sm:$0xff]  }
 0x98e   :  { %5760 = vmatpush1.bf16.msra.mxu0 %v7570_v29  ;;  %v7647_v29 = vld [vmem:[%s12000_s13 + $0x6ec] ss:$16 sps:$4 sm:$0xff]  }
 0x98f   :  { %5924 = vmatpush1.bf16.msra.mxu1 %v7573_v32  ;;  %5761 = vmatprep.subr.bf16.mxu0 %v7578_v2  ;;  %v7642_v32 = vld [vmem:[%s12000_s13 + $0x6e0] ss:$16 sps:$4 sm:$0xff]   ;;  %v7645_v2 = vld [vmem:[%s12000_s13 + $0x6e8] ss:$16 sps:$4 sm:$0xff]  }
 0x990   :  { %5925 = vmatprep.subr.bf16.mxu1 %v7581_v34  ;;  %v7650_v34 = vld [vmem:[%s12000_s13 + $0x704] ss:$16 sps:$4 sm:$0xff]  }
 0x992   :  { %5762 = vmatpush1.bf16.msra.mxu0 %v7576_v19  ;;  %v7653_v19 = vld [vmem:[%s12000_s13 + $0x70c] ss:$16 sps:$4 sm:$0xff]  }
 0x993   :  { %5926 = vmatpush1.bf16.msra.mxu1 %v7579_v49  ;;  %5763 = vmatprep.subr.bf16.mxu0 %v7584_v30  ;;  %v7648_v49 = vld [vmem:[%s12000_s13 + $0x700] ss:$16 sps:$4 sm:$0xff]   ;;  %v7651_v30 = vld [vmem:[%s12000_s13 + $0x708] ss:$16 sps:$4 sm:$0xff]  }
 0x994   :  { %5927 = vmatprep.subr.bf16.mxu1 %v7587_v14  ;;  %v7656_v14 = vld [vmem:[%s12000_s13 + $0x724] ss:$16 sps:$4 sm:$0xff]  }
 0x996   :  { %5764 = vmatpush1.bf16.msra.mxu0 %v7582_v43  ;;  %v7659_v43 = vld [vmem:[%s12000_s13 + $0x72c] ss:$16 sps:$4 sm:$0xff]  }
 0x997   :  { %5928 = vmatpush1.bf16.msra.mxu1 %v7585_v22  ;;  %5765 = vmatprep.subr.bf16.mxu0 %v7590_v62  ;;  %v7662_v22 = vld [vmem:[%s12000_s13 + $0x744] ss:$16 sps:$4 sm:$0xff]   ;;  %v7665_v62 = vld [vmem:[%s12000_s13 + $0x74c] ss:$16 sps:$4 sm:$0xff]  }
 0x998   :  { %5929 = vmatprep.subr.bf16.mxu1 %v7593_v24  ;;  %v7660_v24 = vld [vmem:[%s12000_s13 + $0x740] ss:$16 sps:$4 sm:$0xff]  }
 0x99a   :  { %5766 = vmatpush1.bf16.msra.mxu0 %v7588_v8  ;;  %v7671_v8 = vld [vmem:[%s12000_s13 + $0x76c] ss:$16 sps:$4 sm:$0xff]  }
 0x99b   :  { %5930 = vmatpush1.bf16.msra.mxu1 %v7591_v40  ;;  %5767 = vmatprep.subr.bf16.mxu0 %v7596_v9  ;;  %v7669_v40 = vld [vmem:[%s12000_s13 + $0x768] ss:$16 sps:$4 sm:$0xff]   ;;  %v7674_v9 = vld [vmem:[%s12000_s13 + $0x784] ss:$16 sps:$4 sm:$0xff]  }
 0x99c   :  { %5931 = vmatprep.subr.bf16.mxu1 %v7599_v56  ;;  %v7677_v56 = vld [vmem:[%s12000_s13 + $0x78c] ss:$16 sps:$4 sm:$0xff]  }
 0x99e   :  { %5768 = vmatpush1.bf16.msra.mxu0 %v7594_v53  ;;  %v7675_v53 = vld [vmem:[%s12000_s13 + $0x788] ss:$16 sps:$4 sm:$0xff]  }
 0x99f   :  { %5932 = vmatpush1.bf16.msra.mxu1 %v7597_v41  ;;  %5778 = vmatprep.subr.bf16.mxu0 %v7602_v59  ;;  %v7683_v41 = vld [vmem:[%s12000_s13 + $0x7ac] ss:$16 sps:$4 sm:$0xff]   ;;  %v7678_v59 = vld [vmem:[%s12000_s13 + $0x7a0] ss:$16 sps:$4 sm:$0xff]  }
 0x9a0   :  { %5942 = vmatprep.subr.bf16.mxu1 %v7605_v28  ;;  %v12639_v28 = vsub.s32 6, %v12635_v54 }
 0x9a1   :  { %5770 = vmatmul.mubr.bf16.vlgmr.msra.gmra.mrb[72].mxu0 %v4093_v6 }
 0x9a2   :  { %5934 = vmatmul.mubr.bf16.vlgmr.msra.gmra.mrb[88].mxu1 %v4093_v6  ;;  %5779 = vmatpush1.bf16.msra.mxu0 %v7600_v17  ;;  %v3264_v39 = vrot.slane %v11275_v0, %v12639_v28  ;;  %v7681_v17 = vld [vmem:[%s12000_s13 + $0x7a8] ss:$16 sps:$4 sm:$0xff]   ;;  %v7686_v6 = vld [vmem:[%s12000_s13 + $0x7c4] ss:$16 sps:$4 sm:$0xff]   ;;  %v7684_v0 = vld [vmem:[%s12000_s13 + $0x7c0] ss:$16 sps:$4 sm:$0xff]  }
 0x9a3   :  { %5810 = vmatprep.mubr.bf16.mxu0 %v4096_v58  ;;  %5943 = vmatpush1.bf16.msra.mxu1 %v7603_v31  ;;  %v7689_v31 = vld [vmem:[%s12000_s13 + $0x7cc] ss:$16 sps:$4 sm:$0xff]  }
 0x9a4   :  { %5974 = vmatprep.mubr.bf16.mxu1 %v4096_v58  ;;  %5780 = vmatprep.subr.bf16.mxu0 %v7608_v25  ;;  %v4075_v54 = vadd.f32 %v11473_v12, %v3264_v39  ;;  %v7687_v25 = vld [vmem:[%s12000_s13 + $0x7c8] ss:$16 sps:$4 sm:$0xff]   ;;  %v7692_v58 = vld [vmem:[%s12000_s13 + $0x7e4] ss:$16 sps:$4 sm:$0xff]   ;;  %v7690_v12 = vld [vmem:[%s12000_s13 + $0x7e0] ss:$16 sps:$4 sm:$0xff]  }
 0x9a5   :  { %5944 = vmatprep.subr.bf16.mxu1 %v7611_v33  ;;  %v7695_v33 = vld [vmem:[%s12000_s13 + $0x7ec] ss:$16 sps:$4 sm:$0xff]  }
 0x9a6   :  { %5781 = vmatpush1.bf16.msra.mxu0 %v7606_v15  ;;  %v4087_v15 = vmax.f32 %v4075_v54, 0.0 }
 0x9a7   :  { %5945 = vmatpush1.bf16.msra.mxu1 %v7609_v36  ;;  %5782 = vmatprep.subr.bf16.mxu0 %v7614_v27  ;;  %v7693_v36 = vld [vmem:[%s12000_s13 + $0x7e8] ss:$16 sps:$4 sm:$0xff]   ;;  %v7696_v27 = vld [vmem:[%s12002_s15 + $0x40] sm:$0xff]  }
 0x9a8   :  { %5946 = vmatprep.subr.bf16.mxu1 %v7617_v42  ;;  %v7697_v42 = vld [vmem:[%s12002_s15 + $0xc0] sm:$0xff]  }
 0x9aa   :  { %5783 = vmatpush1.bf16.msra.mxu0 %v7612_v13  ;;  %v7698_v13 = vld [vmem:[%s12002_s15] sm:$0xff]  }
 0x9ab   :  { %5947 = vmatpush1.bf16.msra.mxu1 %v7615_v44  ;;  %5784 = vmatprep.subr.bf16.mxu0 %v7620_v4  ;;  %v4095_v44 = vpack.c.bf16 %v4087_v15, %v4087_v15  ;;  %v7699_v4 = vld [vmem:[%s12002_s15 + $0x80] sm:$0xff]  }
 0x9ac   :  { %5948 = vmatprep.subr.bf16.mxu1 %v7623_v1  ;;  %v7700_v1 = vld [vmem:[%s12002_s15 + $0x48] sm:$0xff]  }
 0x9ae   :  { %5785 = vmatpush1.bf16.msra.mxu0 %v7618_v5  ;;  %v7701_v5 = vld [vmem:[%s12002_s15 + $0xc8] sm:$0xff]  }
 0x9af   :  { %5949 = vmatpush1.bf16.msra.mxu1 %v7621_v18  ;;  %5786 = vmatprep.subr.bf16.mxu0 %v7626_v45  ;;  %v7702_v18 = vld [vmem:[%s12002_s15 + $0x8] sm:$0xff]  }
 0x9b0   :  { %5950 = vmatprep.subr.bf16.mxu1 %v7629_v57  ;;  %v7703_v45 = vld [vmem:[%s12002_s15 + $0x88] sm:$0xff]   ;;  %v7704_v57 = vld [vmem:[%s12002_s15 + $0x50] sm:$0xff]  }
 0x9b2   :  { %5787 = vmatpush1.bf16.msra.mxu0 %v7624_v3  ;;  %v7705_v3 = vld [vmem:[%s12002_s15 + $0xd0] sm:$0xff]  }
 0x9b3   :  { %5951 = vmatpush1.bf16.msra.mxu1 %v7627_v26  ;;  %5788 = vmatprep.subr.bf16.mxu0 %v7632_v51  ;;  %v7706_v26 = vld [vmem:[%s12002_s15 + $0x10] sm:$0xff]  }
 0x9b4   :  { %5952 = vmatprep.subr.bf16.mxu1 %v7635_v11  ;;  %v7707_v51 = vld [vmem:[%s12002_s15 + $0x90] sm:$0xff]   ;;  %v7708_v11 = vld [vmem:[%s12002_s15 + $0x58] sm:$0xff]  }
 0x9b6   :  { %5789 = vmatpush1.bf16.msra.mxu0 %v7630_v20  ;;  %v7709_v20 = vld [vmem:[%s12002_s15 + $0xd8] sm:$0xff]  }
 0x9b7   :  { %5953 = vmatpush1.bf16.msra.mxu1 %v7633_v23  ;;  %5790 = vmatprep.subr.bf16.mxu0 %v7638_v35  ;;  %v7710_v23 = vld [vmem:[%s12002_s15 + $0x18] sm:$0xff]  }
 0x9b8   :  { %5954 = vmatprep.subr.bf16.mxu1 %v7641_v7  ;;  %v7711_v35 = vld [vmem:[%s12002_s15 + $0x98] sm:$0xff]   ;;  %v7712_v7 = vld [vmem:[%s12002_s15 + $0x60] sm:$0xff]  }
 0x9ba   :  { %5791 = vmatpush1.bf16.msra.mxu0 %v7636_v50  ;;  %v7713_v50 = vld [vmem:[%s12002_s15 + $0xe0] sm:$0xff]  }
 0x9bb   :  { %5955 = vmatpush1.bf16.msra.mxu1 %v7639_v61  ;;  %5792 = vmatprep.subr.bf16.mxu0 %v7644_v37  ;;  %v7714_v61 = vld [vmem:[%s12002_s15 + $0x20] sm:$0xff]  }
 0x9bc   :  { %5956 = vmatprep.subr.bf16.mxu1 %v7647_v29  ;;  %v7715_v37 = vld [vmem:[%s12002_s15 + $0xa0] sm:$0xff]   ;;  %v7716_v29 = vld [vmem:[%s12002_s15 + $0x68] sm:$0xff]  }
 0x9be   :  { %5793 = vmatpush1.bf16.msra.mxu0 %v7642_v32  ;;  %v7717_v32 = vld [vmem:[%s12002_s15 + $0xe8] sm:$0xff]  }
 0x9bf   :  { %5957 = vmatpush1.bf16.msra.mxu1 %v7645_v2  ;;  %5794 = vmatprep.subr.bf16.mxu0 %v7650_v34  ;;  %v7718_v2 = vld [vmem:[%s12002_s15 + $0x28] sm:$0xff]  }
 0x9c0   :  { %5958 = vmatprep.subr.bf16.mxu1 %v7653_v19  ;;  %v7719_v34 = vld [vmem:[%s12002_s15 + $0xa8] sm:$0xff]   ;;  %v7720_v19 = vld [vmem:[%s12002_s15 + $0x70] sm:$0xff]  }
 0x9c2   :  { %5795 = vmatpush1.bf16.msra.mxu0 %v7648_v49  ;;  %v7721_v49 = vld [vmem:[%s12002_s15 + $0xf0] sm:$0xff]  }
 0x9c3   :  { %5959 = vmatpush1.bf16.msra.mxu1 %v7651_v30  ;;  %5796 = vmatprep.subr.bf16.mxu0 %v7656_v14  ;;  %v7722_v30 = vld [vmem:[%s12002_s15 + $0x30] sm:$0xff]  }
 0x9c4   :  { %5960 = vmatprep.subr.bf16.mxu1 %v7659_v43  ;;  %v7723_v14 = vld [vmem:[%s12002_s15 + $0xb0] sm:$0xff]   ;;  %v7724_v43 = vld [vmem:[%s12002_s15 + $0x78] sm:$0xff]  }
 0x9c6   :  { %5797 = vmatpush1.bf16.msra.mxu0 %v7654_v38  ;;  %v7725_v38 = vld [vmem:[%s12002_s15 + $0xf8] sm:$0xff]  }
 0x9c7   :  { %5961 = vmatpush1.bf16.msra.mxu1 %v7657_v55  ;;  %5798 = vmatprep.subr.bf16.mxu0 %v7662_v22  ;;  %v7726_v55 = vld [vmem:[%s12002_s15 + $0x38] sm:$0xff]  }
 0x9c8   :  { %5962 = vmatprep.subr.bf16.mxu1 %v7665_v62  ;;  %v7727_v22 = vld [vmem:[%s12002_s15 + $0xb8] sm:$0xff]   ;;  %v4353_v62 = vld [vmem:[%s12003_s14] sm:$0xf] }
 0x9ca   :  { %5799 = vmatpush1.bf16.msra.mxu0 %v7660_v24  ;;  %v4358_v24 = vrot.slane %v4353_v62, %v12631_v46 }
 0x9cb   :  { %5963 = vmatpush1.bf16.msra.mxu1 %v7663_v10  ;;  %5800 = vmatprep.subr.bf16.mxu0 %v7668_v48  ;;  %v4366_v10 = vrot.slane %v4353_v62, %v12634_v52  ;;  %v4362_v48 = vrot.slane %v4353_v62, %v12632_v47 }
 0x9cc   :  { %5964 = vmatprep.subr.bf16.mxu1 %v7671_v8  ;;  %v4370_v8 = vrot.slane %v4353_v62, %v12633_v16 }
 0x9ce   :  { %5801 = vmatpush1.bf16.msra.mxu0 %v7666_v21 }
 0x9cf   :  { %5965 = vmatpush1.bf16.msra.mxu1 %v7669_v40  ;;  %5802 = vmatprep.subr.bf16.mxu0 %v7674_v9 }
 0x9d0   :  { %5966 = vmatprep.subr.bf16.mxu1 %v7677_v56 }
 0x9d2   :  { %5803 = vmatpush1.bf16.msra.mxu0 %v7672_v63 }
 0x9d3   :  { %5967 = vmatpush1.bf16.msra.mxu1 %v7675_v53  ;;  %5804 = vmatprep.subr.bf16.mxu0 %v7680_v60 }
 0x9d4   :  { %5968 = vmatprep.subr.bf16.mxu1 %v7683_v41 }
 0x9d6   :  { %5805 = vmatpush1.bf16.msra.mxu0 %v7678_v59 }
 0x9d7   :  { %5969 = vmatpush1.bf16.msra.mxu1 %v7681_v17  ;;  %5806 = vmatprep.subr.bf16.mxu0 %v7686_v6 }
 0x9d8   :  { %5970 = vmatprep.subr.bf16.mxu1 %v7689_v31 }
 0x9da   :  { %5807 = vmatpush1.bf16.msra.mxu0 %v7684_v0 }
 0x9db   :  { %5971 = vmatpush1.bf16.msra.mxu1 %v7687_v25  ;;  %5808 = vmatprep.subr.bf16.mxu0 %v7692_v58 }
 0x9dc   :  { %5972 = vmatprep.subr.bf16.mxu1 %v7695_v33  ;;  %v6806_v33 = vld [vmem:[%s12004_s16] ss:$0 sm:$0xff] }
 0x9de   :  { %5809 = vmatpush1.bf16.msra.mxu0 %v7690_v12 }
 0x9df   :  { %5973 = vmatpush1.bf16.msra.mxu1 %v7693_v36  ;;  %6951 = vmatprep.subr.bf16.mxu0 %v7696_v27 }
 0x9e0   :  { %6973 = vmatprep.subr.bf16.mxu1 %v7697_v42 }
 0x9e1   :  { %5811 = vmatmul.mubr.bf16.vlgmr.msra.gmra.mrb[72].mxu0 %v4095_v44 }
 0x9e2   :  { %5975 = vmatmul.mubr.bf16.vlgmr.msra.gmra.mrb[88].mxu1 %v4095_v44  ;;  %6952 = vmatpush3.bf16.msra.mxu0 %v7698_v13 }
 0x9e3   :  { %6974 = vmatpush3.bf16.msra.mxu1 %v7699_v4  ;;  %6953 = vmatprep.subr.bf16.mxu0 %v7700_v1 }
 0x9e4   :  { %6975 = vmatprep.subr.bf16.mxu1 %v7701_v5 }
 0x9e6   :  { %6954 = vmatpush3.bf16.msra.mxu0 %v7702_v18 }
 0x9e7   :  { %6976 = vmatpush3.bf16.msra.mxu1 %v7703_v45  ;;  %6955 = vmatprep.subr.bf16.mxu0 %v7704_v57 }
 0x9e8   :  { %6977 = vmatprep.subr.bf16.mxu1 %v7705_v3 }
 0x9ea   :  { %6956 = vmatpush3.bf16.msra.mxu0 %v7706_v26 }
 0x9eb   :  { %6978 = vmatpush3.bf16.msra.mxu1 %v7707_v51  ;;  %6957 = vmatprep.subr.bf16.mxu0 %v7708_v11 }
 0x9ec   :  { %6979 = vmatprep.subr.bf16.mxu1 %v7709_v20 }
 0x9ee   :  { %6958 = vmatpush3.bf16.msra.mxu0 %v7710_v23 }
 0x9ef   :  { %6980 = vmatpush3.bf16.msra.mxu1 %v7711_v35  ;;  %6959 = vmatprep.subr.bf16.mxu0 %v7712_v7 }
 0x9f0   :  { %6981 = vmatprep.subr.bf16.mxu1 %v7713_v50 }
 0x9f2   :  { %6960 = vmatpush3.bf16.msra.mxu0 %v7714_v61 }
 0x9f3   :  { %6982 = vmatpush3.bf16.msra.mxu1 %v7715_v37  ;;  %6961 = vmatprep.subr.bf16.mxu0 %v7716_v29 }
 0x9f4   :  { %6983 = vmatprep.subr.bf16.mxu1 %v7717_v32 }
 0x9f6   :  { %6962 = vmatpush3.bf16.msra.mxu0 %v7718_v2 }
 0x9f7   :  { %6984 = vmatpush3.bf16.msra.mxu1 %v7719_v34  ;;  %6963 = vmatprep.subr.bf16.mxu0 %v7720_v19 }
 0x9f8   :  { %6985 = vmatprep.subr.bf16.mxu1 %v7721_v49 }
 0x9fa   :  { %6964 = vmatpush3.bf16.msra.mxu0 %v7722_v30 }
 0x9fb   :  { %6986 = vmatpush3.bf16.msra.mxu1 %v7723_v14  ;;  %6965 = vmatprep.subr.bf16.mxu0 %v7724_v43 }
 0x9fc   :  { %6987 = vmatprep.subr.bf16.mxu1 %v7725_v38 }
 0x9fe   :  { %6966 = vmatpush3.bf16.msra.mxu0 %v7726_v55 }
 0x9ff   :  { %6988 = vmatpush3.bf16.msra.mxu1 %v7727_v22 }
 0xab4   :  { %v5812_v21 = vpop.f32.mrb[72].mxu0 }
 0xab5   :  { %v7219_v40 = vadd.f32 %v5812_v21, %v4358_v24  ;;  %v5976_v9 = vpop.f32.mrb[88].mxu1  ;;  %v5814_v56 = vpop.f32.mrb[73].mxu0 }
 0xab6   :  { %v7221_v63 = vadd.f32 %v5976_v9, %v4366_v10  ;;  %v7220_v53 = vadd.f32 %v5814_v56, %v4362_v48  ;;  %v5978_v60 = vpop.f32.mrb[89].mxu1  ;;  %v5816_v41 = vpop.f32.mrb[74].mxu0 }
 0xab7   :  { %v5983_v59 = vmax.f32 %v7219_v40, 0.0  ;;  %v7222_v28 = vadd.f32 %v5978_v60, %v4370_v8  ;;  %v5980_v39 = vpop.f32.mrb[90].mxu1  ;;  %v5817_v17 = vpop.f32.mrb[75].mxu0 }
 0xab8   :  { %v5985_v6 = vmax.f32 %v7221_v63, 0.0  ;;  %v5984_v46 = vmax.f32 %v7220_v53, 0.0  ;;  %v5981_v31 = vpop.f32.mrb[91].mxu1 }
 0xab9   :  { %v5986_v52 = vmax.f32 %v7222_v28, 0.0  ;;  %v5987_v47 = vpack.c.bf16 %v5983_v59, %v5983_v59 }
 0xaba   :  { %v5988_v0 = vpack.c.bf16 %v5984_v46, %v5984_v46  ;;  %v5989_v16 = vpack.c.bf16 %v5985_v6, %v5985_v6 }
 0xabb   :  { %v5990_v54 = vpack.c.bf16 %v5986_v52, %v5986_v52 }
 0xabc   :  { %6286 = vmatprep.mubr.bf16.mxu0 %v5988_v0 }
 0xabd   :  { %6326 = vmatprep.mubr.bf16.mxu1 %v5990_v54  ;;  %6287 = vmatmul.mubr.bf16.vlgmr.msra.gmra.mrb[76].mxu0 %v5987_v47 }
 0xabe   :  { %6327 = vmatmul.mubr.bf16.vlgmr.msra.gmra.mrb[92].mxu1 %v5989_v16 }
 0xb90   :  { %v6967_v25 = vpop.f32.mrb[76].mxu0 }
 0xb91   :  { %v6989_v58 = vpop.f32.mrb[92].mxu1  ;;  %v6968_v12 = vpop.f32.mrb[77].mxu0 }
 0xb92   :  { %v6969_v15 = vadd.f32 %v6968_v12, %v6967_v25  ;;  %v6990_v36 = vpop.f32.mrb[93].mxu1  ;;  %v6970_v27 = vpop.f32.mrb[78].mxu0 }
 0xb93   :  { %v6991_v42 = vadd.f32 %v6990_v36, %v6989_v58  ;;  %v6992_v13 = vpop.f32.mrb[94].mxu1  ;;  %v6971_v44 = vpop.f32.mrb[79].mxu0 }
 0xb94   :  { %v6289_v4 = vadd.f32 %v6969_v15, %v6806_v33  ;;  %v6993_v1 = vpop.f32.mrb[95].mxu1 }
 0xb96   :  { %v6329_v5 = vadd.f32 %v6991_v42, %v6289_v4 }
 0xb98   :  { %6334 = vst [vmem:[%s12005_s17] sm:$0xff] %v6329_v5 }

</bundles_post_ra>
